<compile_context>
chip_gen: v6e
topology: v6e:2x2x1
jax: 0.10.0
libtpu: 0.0.40
codegen_flags: <defaults>
</compile_context>

<pallas_src>
import functools

import jax
import jax.numpy as jnp
from jax.experimental import pallas as pl
from jax.experimental.pallas import tpu as pltpu


def _cell_fused_kernel(x_ref, *refs, layer_cfg, bt):
    """Fused Conv1d->ReLU->MaxPool stack + flatten for a tile of `bt` batch rows.

    x_ref   : (bt, L0, C0)  input tile in NLC layout (C0 == 1 for this module).
    refs    : per-layer (w_r, b) ref pairs, then the output ref.
              w_r : (K*C_in, C_out)  im2col-ordered weights
              b   : (1, C_out)       bias
    out_ref : (bt, C_last*L_last)    flattened output, PyTorch (B, C*L) order.
    layer_cfg : static tuple of (K, pool, C_in, C_out, L_in, L_out, L_pool).
    """
    out_ref = refs[-1]
    w_refs = refs[:-1]

    h = x_ref[...].astype(jnp.float32)                     # (bt, L_in, C_in)
    for li, (K, pool, c_in, c_out, _l_in, l_out, l_pool) in enumerate(layer_cfg):
        w_r = w_refs[2 * li][...]                          # (K*c_in, c_out)
        b = w_refs[2 * li + 1][...]                        # (1, c_out)

        if c_in == 1:
            # VPU path: contraction dim is only K, so a (L,1)@(1,C) MXU matmul
            # would waste the systolic array — use broadcast multiply-adds.
            acc = jnp.zeros((bt, l_out, c_out), jnp.float32)
            for k in range(K):
                acc = acc + h[:, k:k + l_out, :] * w_r[k:k + 1, :].reshape(1, 1, c_out)
        else:
            # im2col: one MXU matmul with contraction K*c_in instead of K tiny dots.
            cols = jnp.concatenate([h[:, k:k + l_out, :] for k in range(K)],
                                   axis=-1)                # (bt, l_out, K*c_in)
            acc = jnp.dot(cols.reshape(bt * l_out, K * c_in), w_r,
                          preferred_element_type=jnp.float32)
            acc = acc.reshape(bt, l_out, c_out)

        acc = jnp.maximum(acc + b[None], 0.0)              # bias + ReLU
        # MaxPool1d(pool): default stride == pool, floor mode (drop the tail).
        h = jnp.max(acc[:, :l_pool * pool, :].reshape(bt, l_pool, pool, c_out),
                    axis=2)                                # (bt, l_pool, c_out)

    # PyTorch flattens (B, C, L) -> (B, C*L); we hold (bt, L, C), so transpose
    # the minor dims before flattening.  Emitting the flattened slab here keeps
    # the HBM store lane-dense (width C_last*L_last) instead of C_out-wide.
    _, _, _, c_last, _, _, l_last = layer_cfg[-1]
    out = jnp.transpose(h, (0, 2, 1)).reshape(bt, c_last * l_last)
    out_ref[...] = out.astype(out_ref.dtype)


def cell_forward(x_ncw, params, pools):
    """Full Cell.forward as a single fused pallas_call.

    x_ncw : (B, 1, D) NCW input (as consumed by the PyTorch module).
    params: list of (w, b) with w: (C_out, C_in, K) and b: (C_out,).
    pools : list of MaxPool1d sizes (one per layer).
    """
    B, c0, D = x_ncw.shape
    x = jnp.transpose(x_ncw, (0, 2, 1))                    # NCW -> NLC (B, D, C0)

    layer_cfg = []
    w_inputs = []
    c_in, l_in = c0, D
    for (w, b), pool in zip(params, pools):
        c_out, _, K = w.shape
        l_out = l_in - K + 1
        l_pool = l_out // pool
        # (C_out, C_in, K) -> (K, C_in, C_out) -> (K*C_in, C_out): column
        # k*C_in + c matches the im2col column ordering built in the kernel.
        w_inputs.append(jnp.transpose(w, (2, 1, 0)).reshape(K * c_in, c_out))
        w_inputs.append(b.reshape(1, c_out))
        layer_cfg.append((K, pool, c_in, c_out, l_in, l_out, l_pool))
        c_in, l_in = c_out, l_pool
    feat = c_in * l_in                                     # C_last * L_last

    # Batch tiling: whole batch in one block when small; 8-row tiles otherwise
    # (keeps the output block's sublane dim 8-divisible or equal to full B).
    bt = 8 if (B % 8 == 0) else B
    grid = (B // bt,)

    kernel = functools.partial(_cell_fused_kernel,
                               layer_cfg=tuple(layer_cfg), bt=bt)

    in_specs = [pl.BlockSpec((bt, D, c0), lambda i: (i, 0, 0))]
    # Weights/bias: single resident full blocks (constant index map).
    in_specs += [pl.BlockSpec(a.shape, lambda i: (0, 0)) for a in w_inputs]

    return pl.pallas_call(
        kernel,
        out_shape=jax.ShapeDtypeStruct((B, feat), x.dtype),
        grid=grid,
        in_specs=in_specs,
        out_specs=pl.BlockSpec((bt, feat), lambda i: (i, 0)),
        compiler_params=pltpu.CompilerParams(dimension_semantics=("parallel",)),
    )(x, *w_inputs)


def reference_forward(x_ncw, params, pools):
    """Pure-JAX reference of the PyTorch forward (NCW layout, same math)."""
    x = x_ncw
    for (w, b), p in zip(params, pools):
        B, Cin, L = x.shape
        Cout, _, K = w.shape
        Lout = L - K + 1
        out = jnp.zeros((B, Cout, Lout), dtype=jnp.float32)
        for k in range(K):
            out = out + jnp.einsum('bcl,oc->bol', x[:, :, k:k + Lout], w[:, :, k])
        out = out + b[None, :, None]
        out = jnp.maximum(out, 0.0)
        Lp = Lout // p
        out = out[:, :, :Lp * p].reshape(B, Cout, Lp, p).max(axis=-1)
        x = out
    return x.reshape(x.shape[0], -1)


if __name__ == "__main__":
    # Small synthetic config consistent with Cell(__init__):
    #   input_cell_feature_dim = 64, layer_num = 2,
    #   layer_hyperparameter = {'cnn_channels': [8,16], 'kernel_size': [7,5],
    #                           'maxpool1d': [2,2]}
    B = 2
    D = 64
    cnn_channels = [8, 16]
    kernel_size = [7, 5]
    maxpool1d = [2, 2]

    key = jax.random.PRNGKey(0)
    keys = jax.random.split(key, 1 + 2 * len(cnn_channels))
    x = jax.random.normal(keys[0], (B, 1, D), dtype=jnp.float32)  # NCW, in_channels=1

    # Deterministic parameter init (Conv1d weight (Cout, Cin, K), bias (Cout,)).
    params = []
    cin = 1
    for i, cout in enumerate(cnn_channels):
        w = 0.1 * jax.random.normal(keys[1 + 2 * i], (cout, cin, kernel_size[i]),
                                    dtype=jnp.float32)
        b = 0.1 * jax.random.normal(keys[2 + 2 * i], (cout,), dtype=jnp.float32)
        params.append((w, b))
        cin = cout

    out = cell_forward(x, params, maxpool1d)
    out = jax.block_until_ready(out)

    ref = reference_forward(x, params, maxpool1d)
    assert out.shape == ref.shape, (out.shape, ref.shape)
    assert jnp.allclose(out, ref, atol=1e-4, rtol=1e-4), "mismatch vs reference"
    print("KERNEL_OK")
</pallas_src>

<mosaic_0001>
module attributes {stable_mosaic.version = 11 : i64} {
  func.func @_cell_fused_kernel(%arg0: i32, %arg1: memref<2x64x1xf32, #tpu.memory_space<vmem>>, %arg2: memref<7x8xf32, #tpu.memory_space<vmem>>, %arg3: memref<1x8xf32, #tpu.memory_space<vmem>>, %arg4: memref<40x16xf32, #tpu.memory_space<vmem>>, %arg5: memref<1x16xf32, #tpu.memory_space<vmem>>, %arg6: memref<2x192xf32, #tpu.memory_space<vmem>>) attributes {dimension_semantics = [#tpu.dimension_semantics<parallel>], iteration_bounds = array<i64: 1>, scalar_prefetch = 0 : i64, scratch_operands = 0 : i64, tpu.core_type = #tpu.core_type<tc>, window_params = [{transform_indices = @transform_0, window_bounds = array<i64: 2, 64, 1>}, {pipeline_mode = #tpu.pipeline_mode<synchronous>, transform_indices = @transform_1, window_bounds = array<i64: 7, 8>}, {pipeline_mode = #tpu.pipeline_mode<synchronous>, transform_indices = @transform_2, window_bounds = array<i64: 1, 8>}, {pipeline_mode = #tpu.pipeline_mode<synchronous>, transform_indices = @transform_3, window_bounds = array<i64: 40, 16>}, {pipeline_mode = #tpu.pipeline_mode<synchronous>, transform_indices = @transform_4, window_bounds = array<i64: 1, 16>}, {transform_indices = @transform_5, window_bounds = array<i64: 2, 192>}]} {
    %c0 = arith.constant 0 : index
    %c0_0 = arith.constant 0 : index
    %c0_1 = arith.constant 0 : index
    %0 = vector.load %arg1[%c0, %c0_0, %c0_1] : memref<2x64x1xf32, #tpu.memory_space<vmem>>, vector<2x64x1xf32>
    %c0_2 = arith.constant 0 : index
    %c0_3 = arith.constant 0 : index
    %1 = vector.load %arg2[%c0_2, %c0_3] : memref<7x8xf32, #tpu.memory_space<vmem>>, vector<7x8xf32>
    %c0_4 = arith.constant 0 : index
    %c0_5 = arith.constant 0 : index
    %2 = vector.load %arg3[%c0_4, %c0_5] : memref<1x8xf32, #tpu.memory_space<vmem>>, vector<1x8xf32>
    %cst = arith.constant 0.000000e+00 : f32
    %3 = vector.broadcast %cst : f32 to vector<2x58x8xf32>
    %4 = vector.extract_strided_slice %0 {offsets = [0, 0, 0], sizes = [2, 58, 1], strides = [1, 1, 1]} : vector<2x64x1xf32> to vector<2x58x1xf32>
    %5 = vector.extract_strided_slice %1 {offsets = [0, 0], sizes = [1, 8], strides = [1, 1]} : vector<7x8xf32> to vector<1x8xf32>
    %6 = vector.shape_cast %5 : vector<1x8xf32> to vector<1x1x8xf32>
    %7 = vector.broadcast %4 : vector<2x58x1xf32> to vector<2x58x8xf32>
    %8 = vector.broadcast %6 : vector<1x1x8xf32> to vector<2x58x8xf32>
    %9 = arith.mulf %7, %8 : vector<2x58x8xf32>
    %10 = arith.addf %3, %9 : vector<2x58x8xf32>
    %11 = vector.extract_strided_slice %0 {offsets = [0, 1, 0], sizes = [2, 58, 1], strides = [1, 1, 1]} : vector<2x64x1xf32> to vector<2x58x1xf32>
    %12 = vector.extract_strided_slice %1 {offsets = [1, 0], sizes = [1, 8], strides = [1, 1]} : vector<7x8xf32> to vector<1x8xf32>
    %13 = vector.shape_cast %12 : vector<1x8xf32> to vector<1x1x8xf32>
    %14 = vector.broadcast %11 : vector<2x58x1xf32> to vector<2x58x8xf32>
    %15 = vector.broadcast %13 : vector<1x1x8xf32> to vector<2x58x8xf32>
    %16 = arith.mulf %14, %15 : vector<2x58x8xf32>
    %17 = arith.addf %10, %16 : vector<2x58x8xf32>
    %18 = vector.extract_strided_slice %0 {offsets = [0, 2, 0], sizes = [2, 58, 1], strides = [1, 1, 1]} : vector<2x64x1xf32> to vector<2x58x1xf32>
    %19 = vector.extract_strided_slice %1 {offsets = [2, 0], sizes = [1, 8], strides = [1, 1]} : vector<7x8xf32> to vector<1x8xf32>
    %20 = vector.shape_cast %19 : vector<1x8xf32> to vector<1x1x8xf32>
    %21 = vector.broadcast %18 : vector<2x58x1xf32> to vector<2x58x8xf32>
    %22 = vector.broadcast %20 : vector<1x1x8xf32> to vector<2x58x8xf32>
    %23 = arith.mulf %21, %22 : vector<2x58x8xf32>
    %24 = arith.addf %17, %23 : vector<2x58x8xf32>
    %25 = vector.extract_strided_slice %0 {offsets = [0, 3, 0], sizes = [2, 58, 1], strides = [1, 1, 1]} : vector<2x64x1xf32> to vector<2x58x1xf32>
    %26 = vector.extract_strided_slice %1 {offsets = [3, 0], sizes = [1, 8], strides = [1, 1]} : vector<7x8xf32> to vector<1x8xf32>
    %27 = vector.shape_cast %26 : vector<1x8xf32> to vector<1x1x8xf32>
    %28 = vector.broadcast %25 : vector<2x58x1xf32> to vector<2x58x8xf32>
    %29 = vector.broadcast %27 : vector<1x1x8xf32> to vector<2x58x8xf32>
    %30 = arith.mulf %28, %29 : vector<2x58x8xf32>
    %31 = arith.addf %24, %30 : vector<2x58x8xf32>
    %32 = vector.extract_strided_slice %0 {offsets = [0, 4, 0], sizes = [2, 58, 1], strides = [1, 1, 1]} : vector<2x64x1xf32> to vector<2x58x1xf32>
    %33 = vector.extract_strided_slice %1 {offsets = [4, 0], sizes = [1, 8], strides = [1, 1]} : vector<7x8xf32> to vector<1x8xf32>
    %34 = vector.shape_cast %33 : vector<1x8xf32> to vector<1x1x8xf32>
    %35 = vector.broadcast %32 : vector<2x58x1xf32> to vector<2x58x8xf32>
    %36 = vector.broadcast %34 : vector<1x1x8xf32> to vector<2x58x8xf32>
    %37 = arith.mulf %35, %36 : vector<2x58x8xf32>
    %38 = arith.addf %31, %37 : vector<2x58x8xf32>
    %39 = vector.extract_strided_slice %0 {offsets = [0, 5, 0], sizes = [2, 58, 1], strides = [1, 1, 1]} : vector<2x64x1xf32> to vector<2x58x1xf32>
    %40 = vector.extract_strided_slice %1 {offsets = [5, 0], sizes = [1, 8], strides = [1, 1]} : vector<7x8xf32> to vector<1x8xf32>
    %41 = vector.shape_cast %40 : vector<1x8xf32> to vector<1x1x8xf32>
    %42 = vector.broadcast %39 : vector<2x58x1xf32> to vector<2x58x8xf32>
    %43 = vector.broadcast %41 : vector<1x1x8xf32> to vector<2x58x8xf32>
    %44 = arith.mulf %42, %43 : vector<2x58x8xf32>
    %45 = arith.addf %38, %44 : vector<2x58x8xf32>
    %46 = vector.extract_strided_slice %0 {offsets = [0, 6, 0], sizes = [2, 58, 1], strides = [1, 1, 1]} : vector<2x64x1xf32> to vector<2x58x1xf32>
    %47 = vector.extract_strided_slice %1 {offsets = [6, 0], sizes = [1, 8], strides = [1, 1]} : vector<7x8xf32> to vector<1x8xf32>
    %48 = vector.shape_cast %47 : vector<1x8xf32> to vector<1x1x8xf32>
    %49 = vector.broadcast %46 : vector<2x58x1xf32> to vector<2x58x8xf32>
    %50 = vector.broadcast %48 : vector<1x1x8xf32> to vector<2x58x8xf32>
    %51 = arith.mulf %49, %50 : vector<2x58x8xf32>
    %52 = arith.addf %45, %51 : vector<2x58x8xf32>
    %53 = vector.shape_cast %2 : vector<1x8xf32> to vector<1x1x8xf32>
    %54 = vector.broadcast %53 : vector<1x1x8xf32> to vector<2x58x8xf32>
    %55 = arith.addf %52, %54 : vector<2x58x8xf32>
    %cst_6 = arith.constant 0.000000e+00 : f32
    %56 = vector.broadcast %cst_6 : f32 to vector<2x58x8xf32>
    %57 = arith.maximumf %55, %56 : vector<2x58x8xf32>
    %58 = vector.shape_cast %57 : vector<2x58x8xf32> to vector<2x29x2x8xf32>
    %cst_7 = arith.constant dense<0xFF800000> : vector<2x29x8xf32>
    %59 = vector.multi_reduction <maximumf>, %58, %cst_7 [2] : vector<2x29x2x8xf32> to vector<2x29x8xf32>
    %c0_8 = arith.constant 0 : index
    %c0_9 = arith.constant 0 : index
    %60 = vector.load %arg4[%c0_8, %c0_9] : memref<40x16xf32, #tpu.memory_space<vmem>>, vector<40x16xf32>
    %c0_10 = arith.constant 0 : index
    %c0_11 = arith.constant 0 : index
    %61 = vector.load %arg5[%c0_10, %c0_11] : memref<1x16xf32, #tpu.memory_space<vmem>>, vector<1x16xf32>
    %62 = vector.extract_strided_slice %59 {offsets = [0, 0, 0], sizes = [2, 25, 8], strides = [1, 1, 1]} : vector<2x29x8xf32> to vector<2x25x8xf32>
    %63 = vector.extract_strided_slice %59 {offsets = [0, 1, 0], sizes = [2, 25, 8], strides = [1, 1, 1]} : vector<2x29x8xf32> to vector<2x25x8xf32>
    %64 = vector.extract_strided_slice %59 {offsets = [0, 2, 0], sizes = [2, 25, 8], strides = [1, 1, 1]} : vector<2x29x8xf32> to vector<2x25x8xf32>
    %65 = vector.extract_strided_slice %59 {offsets = [0, 3, 0], sizes = [2, 25, 8], strides = [1, 1, 1]} : vector<2x29x8xf32> to vector<2x25x8xf32>
    %66 = vector.extract_strided_slice %59 {offsets = [0, 4, 0], sizes = [2, 25, 8], strides = [1, 1, 1]} : vector<2x29x8xf32> to vector<2x25x8xf32>
    %67 = tpu.concatenate %62, %63, %64, %65, %66 in 2 : vector<2x25x8xf32>, vector<2x25x8xf32>, vector<2x25x8xf32>, vector<2x25x8xf32>, vector<2x25x8xf32> -> vector<2x25x40xf32>
    %68 = vector.shape_cast %67 : vector<2x25x40xf32> to vector<50x40xf32>
    %cst_12 = arith.constant dense<0.000000e+00> : vector<50x16xf32>
    %69 = tpu.matmul %68, %60, %cst_12 {dimension_numbers = #tpu.dot_dimension_numbers<[1], [0], [0], [1], [0, 0, 1, 1], [], []>} : vector<50x40xf32>, vector<40x16xf32>, vector<50x16xf32> -> vector<50x16xf32>
    %70 = vector.shape_cast %69 : vector<50x16xf32> to vector<2x25x16xf32>
    %71 = vector.shape_cast %61 : vector<1x16xf32> to vector<1x1x16xf32>
    %72 = vector.broadcast %71 : vector<1x1x16xf32> to vector<2x25x16xf32>
    %73 = arith.addf %70, %72 : vector<2x25x16xf32>
    %cst_13 = arith.constant 0.000000e+00 : f32
    %74 = vector.broadcast %cst_13 : f32 to vector<2x25x16xf32>
    %75 = arith.maximumf %73, %74 : vector<2x25x16xf32>
    %76 = vector.extract_strided_slice %75 {offsets = [0, 0, 0], sizes = [2, 24, 16], strides = [1, 1, 1]} : vector<2x25x16xf32> to vector<2x24x16xf32>
    %77 = vector.shape_cast %76 : vector<2x24x16xf32> to vector<2x12x2x16xf32>
    %cst_14 = arith.constant dense<0xFF800000> : vector<2x12x16xf32>
    %78 = vector.multi_reduction <maximumf>, %77, %cst_14 [2] : vector<2x12x2x16xf32> to vector<2x12x16xf32>
    %79 = tpu.transpose %78, [0, 2, 1] : vector<2x12x16xf32> -> vector<2x16x12xf32>
    %80 = vector.shape_cast %79 : vector<2x16x12xf32> to vector<2x192xf32>
    %c0_15 = arith.constant 0 : index
    %c0_16 = arith.constant 0 : index
    %81 = vector.load %arg6[%c0_15, %c0_16] : memref<2x192xf32, #tpu.memory_space<vmem>>, vector<2x192xf32>
    tpu.vector_store %arg6[%c0_15, %c0_16], %80 {strides = array<i32>} : memref<2x192xf32, #tpu.memory_space<vmem>>, vector<2x192xf32>,
    return
  }
  func.func @transform_0(%arg0: i32) -> (i32, i32, i32) {
    %c0_i32 = arith.constant 0 : i32
    %c0_i32_0 = arith.constant 0 : i32
    %c0_i32_1 = arith.constant 0 : i32
    return %arg0, %c0_i32, %c0_i32_0 : i32, i32, i32
  }
  func.func @transform_1(%arg0: i32) -> (i32, i32) {
    %c0_i32 = arith.constant 0 : i32
    %c0_i32_0 = arith.constant 0 : i32
    %c0_i32_1 = arith.constant 0 : i32
    return %c0_i32, %c0_i32_0 : i32, i32
  }
  func.func @transform_2(%arg0: i32) -> (i32, i32) {
    %c0_i32 = arith.constant 0 : i32
    %c0_i32_0 = arith.constant 0 : i32
    %c0_i32_1 = arith.constant 0 : i32
    return %c0_i32, %c0_i32_0 : i32, i32
  }
  func.func @transform_3(%arg0: i32) -> (i32, i32) {
    %c0_i32 = arith.constant 0 : i32
    %c0_i32_0 = arith.constant 0 : i32
    %c0_i32_1 = arith.constant 0 : i32
    return %c0_i32, %c0_i32_0 : i32, i32
  }
  func.func @transform_4(%arg0: i32) -> (i32, i32) {
    %c0_i32 = arith.constant 0 : i32
    %c0_i32_0 = arith.constant 0 : i32
    %c0_i32_1 = arith.constant 0 : i32
    return %c0_i32, %c0_i32_0 : i32, i32
  }
  func.func @transform_5(%arg0: i32) -> (i32, i32) {
    %c0_i32 = arith.constant 0 : i32
    %c0_i32_0 = arith.constant 0 : i32
    return %arg0, %c0_i32 : i32, i32
  }
}

</mosaic_0001>

<bundles_post_ra>
// kernel: tpu_custom_call.1
= control target key start
LH: loop header
LB: loop body
LE: loop exit
PB: predicated region body
PF: predicated region fallthrough
CT: control target
= control target key end

     0   :  { %v4293_v2 = vmov 0   ;;  %s6567_s0 = inlined_call_operand.vmem [shape: f32[2,64,1], index: 0, kind: input, shape index: {}]   ;;  %s6568_s1 = inlined_call_operand.vmem [shape: f32[7,8], index: 1, kind: input, shape index: {}]   ;;  %s6569_s2 = inlined_call_operand.vmem [shape: f32[1,8], index: 2, kind: input, shape index: {}]   ;;  %s6570_s3 = inlined_call_operand.vmem [shape: f32[40,16], index: 3, kind: input, shape index: {}]   ;;  %s6571_s4 = inlined_call_operand.vmem [shape: f32[1,16], index: 4, kind: input, shape index: {}]   ;;  %s6572_s5 = inlined_call_operand.hbm [shape: f32[2,192], index: 5, kind: output, shape index: {}]  }
   0x1   :  { %v23_v0 = vld [vmem:[%s6567_s0 + $0x10] sm:$0xff]  ;;  %v21_v1 = vld [vmem:[%s6567_s0] sm:$0xff]  ;;  %4269 = vset.pattern.permute.xlu1 %v4293_v2  ;;  %4268 = vset.pattern.permute.xlu0 %v4293_v2  ;;  %v24_v3 = vld [vmem:[%s6567_s0 + $0x18] sm:$0xff] }
   0x2   :  { %51 = vperm.xlu1 %4269, %v23_v0   ;;  %41 = vperm.xlu0 %4268, %v21_v1   ;;  %v22_v4 = vld [vmem:[%s6567_s0 + $0x8] sm:$0xff] }
   0x6   :  { %56 = vperm.xlu1 %4269, %v24_v3   ;;  %46 = vperm.xlu0 %4268, %v22_v4  }
   0x7   :  { %10 = vsyncpa [#allocation3], 0  ;;  %v26_v5 = vld [vmem:[%s6567_s0 + $0x28] sm:$0xff]  ;;  %v25_v6 = vld [vmem:[%s6567_s0 + $0x20] sm:$0xff]  ;;  %v119_v17 = vlaneseq  ;;  %v4294_v27 = vmov 1983009808  }
   0x8   :  { %v29_v7 = vld [vmem:[%s6567_s0 + $0x40] sm:$0xff]  ;;  %v27_v8 = vld [vmem:[%s6567_s0 + $0x30] sm:$0xff]  ;;  %v30_v10 = vld [vmem:[%s6567_s0 + $0x48] sm:$0xff]  ;;  %v805_v28 = vunpack.c.l.s4 %v4294_v27  ;;  %vm191_vm0 = vcmask 1046528   ;;  %vm290_vm1 = vcmask 1045504   ;;  %vm389_vm2 = vcmask 1044480  }
   0x9   :  { %v31_v9 = vld [vmem:[%s6567_s0 + $0x50] sm:$0xff]  ;;  %v28_v11 = vld [vmem:[%s6567_s0 + $0x38] sm:$0xff]  ;;  %v34_v13 = vld [vmem:[%s6567_s0 + $0x68] sm:$0xff]  ;;  %v4395_v18 = vshrl.u32 %v119_v17, 7  ;;  %vm488_vm3 = vcmask 1043456   ;;  %vm587_vm4 = vcmask 1042432  }
   0xa   :  { %66 = vperm.xlu1 %4269, %v26_v5   ;;  %61 = vperm.xlu0 %4268, %v25_v6   ;;  %v32_v12 = vld [vmem:[%s6567_s0 + $0x58] sm:$0xff]  ;;  %v33_v14 = vld [vmem:[%s6567_s0 + $0x60] sm:$0xff]  ;;  %v35_v16 = vld [vmem:[%s6567_s0 + $0x70] sm:$0xff]  ;;  %v806_v36 = vunpack.c.0.s8 %v805_v28  ;;  %vm686_vm5 = vcmask 1041408   ;;  %vm1113_vm6 = vcmask 58368   ;;  %s4295_s27 = smov 8  }
   0xb   :  { %v36_v15 = vld [vmem:[%s6567_s0 + $0x78] sm:$0xff]  ;;  %6631 = vst [vmem:[#allocation5_spill] sm:$0xff] %v4395_v18  ;;  %v157_v19 = vsub.s32 1, %v4395_v18  ;;  %v256_v20 = vsub.s32 2, %v4395_v18  ;;  %v355_v21 = vsub.s32 3, %v4395_v18  ;;  %v454_v23 = vsub.s32 4, %v4395_v18 }
   0xc   :  { %v37_v22 = vld [vmem:[%s6568_s1] sm:$0x7f]  ;;  %v553_v24 = vsub.s32 5, %v4395_v18  ;;  %v652_v25 = vsub.s32 6, %v4395_v18  ;;  %v121_v26 = vsub.s32 0, %v4395_v18  ;;  %v4441_v48 = vsub.s32 %v806_v36, %v4395_v18  ;;  %s4296_s28 = smov 24  }
   0xd   :  { %v4407_v29 = vrot.slane %v37_v22, %v157_v19  ;;  %v4409_v30 = vrot.slane %v37_v22, %v256_v20  ;;  %v4411_v31 = vrot.slane %v37_v22, %v355_v21  ;;  %v4413_v32 = vrot.slane %v37_v22, %v454_v23  ;;  %s4297_s29 = smov 16   ;;  %s4298_s30 = smov 32  }
   0xe   :  { %81 = vperm.xlu1 %4269, %v29_v7   ;;  %71 = vperm.xlu0 %4268, %v27_v8   ;;  %v4415_v33 = vrot.slane %v37_v22, %v553_v24  ;;  %v4417_v34 = vrot.slane %v37_v22, %v652_v25  ;;  %v4419_v35 = vrot.slane %v37_v22, %v121_v26  ;;  %vm1576_vm7 = vcmask 1041409   ;;  %s4304_s18 = smov 48   ;;  %s4305_s19 = smov 36  }
   0xf   :  { %vm1578_vm8 = vcmask 1042434   ;;  %vm1580_vm9 = vcmask 1043459   ;;  %vm1582_vm10 = vcmask 1044484   ;;  %vm1584_vm11 = vcmask 1045509   ;;  %s4306_s20 = smov 72   ;;  %s4307_s21 = smov 60  }
  0x10   :  { %vm1586_vm12 = vcmask 1046534   ;;  %vm1588_vm13 = vcmask 1047559   ;;  %vm4300_vm14 = vmmov 0   ;;  %vm1905_vm15 = vcmask 64512   ;;  %s4308_s22 = smov 4   ;;  %s4309_s23 = smov 120  }
  0x11   :  { %s4310_s24 = smov 84   ;;  %s4311_s25 = smov 28  }
  0x12   :  { %91 = vperm.xlu1 %4269, %v31_v9   ;;  %86 = vperm.xlu0 %4268, %v30_v10   ;;  %s4312_s26 = smov 96   ;;  %s4313_s0 = smov 40  }
  0x13   :  { %s4314_s1 = smov 108  }
  0x16   :  { %76 = vperm.xlu1 %4269, %v28_v11   ;;  %96 = vperm.xlu0 %4268, %v32_v12  }
  0x1a   :  { %106 = vperm.xlu1 %4269, %v34_v13   ;;  %101 = vperm.xlu0 %4268, %v33_v14  }
  0x1e   :  { %116 = vperm.xlu1 %4269, %v36_v15   ;;  %111 = vperm.xlu0 %4268, %v35_v16  }
  0x7d   :  { %v52_v37 = vpop.permute.xlu1 %51  ;;  %v42_v41 = vpop.permute.xlu0 %41 }
  0x7e   :  { %v161_v38 = vmul.f32 %v4407_v29, %v52_v37  ;;  %v4423_v39 = vmul.f32 %v4409_v30, %v52_v37  ;;  %v4426_v40 = vmul.f32 %v4411_v31, %v52_v37  ;;  %v4429_v42 = vmul.f32 %v4413_v32, %v52_v37 }
  0x7f   :  { %v4432_v43 = vmul.f32 %v4415_v33, %v52_v37  ;;  %v4435_v44 = vmul.f32 %v4417_v34, %v52_v37  ;;  %v125_v45 = vmul.f32 %v4419_v35, %v52_v37  ;;  %v123_v46 = vmul.f32 %v4419_v35, %v42_v41 }
  0x80   :  { %v159_v47 = vmul.f32 %v4407_v29, %v42_v41  ;;  %v195_v49 = vrot.slane %v161_v38, 1  ;;  %v294_v50 = vrot.slane %v4423_v39, 2  ;;  %v393_v51 = vrot.slane %v4426_v40, 3 }
  0x81   :  { %v258_v52 = vmul.f32 %v4409_v30, %v42_v41  ;;  %v57_v53 = vpop.permute.xlu1 %56  ;;  %v492_v54 = vrot.slane %v4429_v42, 4  ;;  %v591_v55 = vrot.slane %v4432_v43, 5  ;;  %v357_v56 = vmul.f32 %v4411_v31, %v42_v41  ;;  %v47_v2 = vpop.permute.xlu0 %46 }
  0x82   :  { %v4450_v57 = vmul.f32 %v4413_v32, %v42_v41  ;;  %v690_v58 = vrot.slane %v4435_v44, 6  ;;  %v192_v59 = vrot.slane %v159_v47, 1  ;;  %v4454_v60 = vmul.f32 %v4415_v33, %v42_v41 }
  0x83   :  { %v4457_v61 = vmul.f32 %v4407_v29, %v57_v53  ;;  %v291_v62 = vrot.slane %v258_v52, 2  ;;  %v4460_v63 = vmul.f32 %v4417_v34, %v42_v41  ;;  %v4463_v0 = vmul.f32 %v4419_v35, %v57_v53 }
  0x84   :  { %v4466_v1 = vmul.f32 %v4409_v30, %v57_v53  ;;  %v390_v3 = vrot.slane %v357_v56, 3  ;;  %v4470_v5 = vmul.f32 %v4411_v31, %v57_v53  ;;  %v4473_v6 = vmul.f32 %v4413_v32, %v57_v53 }
  0x85   :  { %v197_v4 = vrot.slane %v4457_v61, 1  ;;  %v489_v7 = vrot.slane %v4450_v57, 4  ;;  %v4478_v9 = vmul.f32 %v4415_v33, %v57_v53  ;;  %v4481_v10 = vmul.f32 %v4417_v34, %v57_v53 }
  0x86   :  { %v296_v8 = vrot.slane %v4466_v1, 2  ;;  %v395_v12 = vrot.slane %v4470_v5, 3  ;;  %v494_v13 = vrot.slane %v4473_v6, 4  ;;  %v160_v14 = vmul.f32 %v4407_v29, %v47_v2 }
  0x87   :  { %v198_v11 = vsel %vm191_vm0, %v195_v49, %v197_v4  ;;  %v588_v15 = vrot.slane %v4454_v60, 5  ;;  %v124_v19 = vmul.f32 %v4419_v35, %v47_v2  ;;  %v593_v20 = vrot.slane %v4478_v9, 5 }
  0x88   :  { %v240_v16 = vadd.f32 %v198_v11, %v125_v45  ;;  %v297_v17 = vsel %vm290_vm1, %v294_v50, %v296_v8  ;;  %v692_v21 = vrot.slane %v4481_v10, 6  ;;  %v193_v22 = vrot.slane %v160_v14, 1 }
  0x89   :  { %v259_v23 = vmul.f32 %v4409_v30, %v47_v2  ;;  %v396_v25 = vsel %vm389_vm2, %v393_v51, %v395_v12  ;;  %v495_v26 = vsel %vm488_vm3, %v492_v54, %v494_v13  ;;  %v358_v27 = vmul.f32 %v4411_v31, %v47_v2 }
  0x8a   :  { %v339_v24 = vadd.f32 %v297_v17, %v240_v16  ;;  %v194_v28 = vsel %vm191_vm0, %v192_v59, %v193_v22  ;;  %v196_v36 = vsel %vm191_vm0, %v193_v22, %v195_v49  ;;  %v457_v38 = vmul.f32 %v4413_v32, %v47_v2  ;;  %v67_v49 = vpop.permute.xlu1 %66 }
  0x8b   :  { %v292_v37 = vrot.slane %v259_v23, 2  ;;  %v238_v40 = vadd.f32 %v194_v28, %v123_v46  ;;  %v239_v41 = vadd.f32 %v196_v36, %v124_v19  ;;  %v391_v45 = vrot.slane %v358_v27, 3 }
  0x8c   :  { %v438_v39 = vadd.f32 %v396_v25, %v339_v24  ;;  %v490_v53 = vrot.slane %v457_v38, 4  ;;  %v556_v56 = vmul.f32 %v4415_v33, %v47_v2  ;;  %v687_v14 = vrot.slane %v4460_v63, 6 }
  0x8d   :  { %v293_v47 = vsel %vm290_vm1, %v291_v62, %v292_v37  ;;  %v295_v52 = vsel %vm290_vm1, %v292_v37, %v294_v50  ;;  %v392_v59 = vsel %vm389_vm2, %v390_v3, %v391_v45  ;;  %v594_v46 = vsel %vm587_vm4, %v591_v55, %v593_v20  ;;  %v4524_v3 = vld [vmem:[%s6569_s2] ss:$0 sm:$0xff] }
  0x8e   :  { %v537_v57 = vadd.f32 %v495_v26, %v438_v39  ;;  %v337_v60 = vadd.f32 %v293_v47, %v238_v40  ;;  %v338_v11 = vadd.f32 %v295_v52, %v239_v41  ;;  %v394_v62 = vsel %vm389_vm2, %v391_v45, %v393_v51  ;;  %v4552_v40 = vpop.permute.xlu0 %61 }
  0x8f   :  { %v589_v50 = vrot.slane %v556_v56, 5  ;;  %v655_v22 = vmul.f32 %v4417_v34, %v47_v2  ;;  %v693_v63 = vsel %vm686_vm5, %v690_v58, %v692_v21  ;;  %v491_v23 = vsel %vm488_vm3, %v489_v7, %v490_v53 }
  0x90   :  { %v636_v16 = vadd.f32 %v594_v46, %v537_v57  ;;  %v436_v17 = vadd.f32 %v392_v59, %v337_v60  ;;  %v437_v19 = vadd.f32 %v394_v62, %v338_v11  ;;  %v493_v51 = vsel %vm488_vm3, %v490_v53, %v492_v54 }
  0x91   :  { %v4536_v24 = vmul.f32 %v4407_v29, %v67_v49  ;;  %v688_v27 = vrot.slane %v655_v22, 6  ;;  %v590_v28 = vsel %vm587_vm4, %v588_v15, %v589_v50  ;;  %v592_v36 = vsel %vm587_vm4, %v589_v50, %v591_v55 }
  0x92   :  { %v735_v2 = vadd.f32 %v693_v63, %v636_v16  ;;  %v535_v25 = vadd.f32 %v491_v23, %v436_v17  ;;  %v536_v26 = vadd.f32 %v493_v51, %v437_v19  ;;  %v4543_v7 = vmul.f32 %v4409_v30, %v67_v49 }
  0x93   :  { %v4546_v42 = vmul.f32 %v4411_v31, %v67_v49  ;;  %v4550_v39 = vmul.f32 %v4413_v32, %v67_v49  ;;  %v689_v15 = vsel %vm686_vm5, %v687_v14, %v688_v27  ;;  %v691_v43 = vsel %vm686_vm5, %v688_v27, %v690_v58 }
  0x94   :  { %v757_v54 = vadd.f32 %v4524_v3, %v735_v2  ;;  %v634_v37 = vadd.f32 %v590_v28, %v535_v25  ;;  %v635_v38 = vadd.f32 %v592_v36, %v536_v26  ;;  %v4559_v55 = vmul.f32 %v4419_v35, %v67_v49 }
  0x95   :  { %v201_v41 = vrot.slane %v4536_v24, 1  ;;  %v4565_v53 = vmul.f32 %v4415_v33, %v67_v49  ;;  %v300_v56 = vrot.slane %v4543_v7, 2  ;;  %v4569_v57 = vmul.f32 %v4417_v34, %v67_v49 }
  0x96   :  { %v4562_v45 = vmax.f32 %v757_v54, 0.0  ;;  %v733_v47 = vadd.f32 %v689_v15, %v634_v37  ;;  %v734_v52 = vadd.f32 %v691_v43, %v635_v38  ;;  %v163_v44 = vmul.f32 %v4407_v29, %v4552_v40 }
  0x97   :  { %v262_v58 = vmul.f32 %v4409_v30, %v4552_v40  ;;  %v399_v59 = vrot.slane %v4546_v42, 3  ;;  %v498_v14 = vrot.slane %v4550_v39, 4  ;;  %v127_v46 = vmul.f32 %v4419_v35, %v4552_v40 }
  0x98   :  { %v755_v60 = vadd.f32 %v4524_v3, %v733_v47  ;;  %v756_v11 = vadd.f32 %v4524_v3, %v734_v52  ;;  %v199_v62 = vrot.slane %v163_v44, 1  ;;  %v361_v50 = vmul.f32 %v4411_v31, %v4552_v40 }
  0x99   :  { %v298_v49 = vrot.slane %v262_v58, 2  ;;  %v4585_v16 = vrot.slane %v4562_v45, %v4441_v48  ;;  %v597_v19 = vrot.slane %v4565_v53, 5  ;;  %v460_v22 = vmul.f32 %v4413_v32, %v4552_v40 }
  0x9a   :  { %v772_v17 = vmax.f32 %v756_v11, 0.0  ;;  %v696_v63 = vrot.slane %v4569_v57, 6  ;;  %v200_v23 = vsel %vm191_vm0, %v197_v4, %v199_v62  ;;  %v202_v51 = vsel %vm191_vm0, %v199_v62, %v201_v41 }
  0x9b   :  { %v559_v2 = vmul.f32 %v4415_v33, %v4552_v40  ;;  %v4599_v25 = vmax.f32 %v755_v60, 0.0  ;;  %v299_v28 = vsel %vm290_vm1, %v296_v8, %v298_v49  ;;  %v241_v61 = vadd.f32 %v200_v23, %v4463_v0 }
  0x9c   :  { %v820_v26 = vcombine.high %v772_v17, %v772_v17  ;;  %v827_v27 = vrot.slane %v772_v17, %v4441_v48  ;;  %v242_v36 = vadd.f32 %v202_v51, %v127_v46  ;;  %v301_v4 = vsel %vm290_vm1, %v298_v49, %v300_v56 }
  0x9d   :  { %v397_v54 = vrot.slane %v361_v50, 3  ;;  %v496_v43 = vrot.slane %v460_v22, 4  ;;  %v340_v52 = vadd.f32 %v299_v28, %v241_v61  ;;  %v595_v44 = vrot.slane %v559_v2, 5  ;;  %v82_v50 = vpop.permute.xlu1 %81 }
  0x9e   :  { %v4610_v37 = vrot.slane %v820_v26, %v4441_v48  ;;  %v835_v38 = vcombine.high %v827_v27, %v827_v27  ;;  %v1142_v15 = vsel %vm1113_vm6, %v827_v27, -inf  ;;  %v341_v1 = vadd.f32 %v301_v4, %v242_v36 }
  0x9f   :  { %v1143_v47 = vrot.slane %v1142_v15, 4  ;;  %v398_v60 = vsel %vm389_vm2, %v395_v12, %v397_v54  ;;  %v4625_v11 = vrot.slane %v4599_v25, %v4441_v48  ;;  %v400_v62 = vsel %vm389_vm2, %v397_v54, %v399_v59 }
  0xa0   :  { %v1149_v8 = vsel %vm1113_vm6, %v835_v38, -inf  ;;  %v4618_v58 = vsel %vm1113_vm6, %v4610_v37, -inf  ;;  %v439_v49 = vadd.f32 %v398_v60, %v340_v52  ;;  %v440_v23 = vadd.f32 %v400_v62, %v341_v1 }
  0xa1   :  { %6632 = vst [vmem:[#allocation6_spill] sm:$0xff] %v4625_v11  ;;  %v4632_v17 = vmax.f32 %v1142_v15, %v1143_v47  ;;  %v1150_v22 = vrot.slane %v1149_v8, 4  ;;  %v497_v5 = vsel %vm488_vm3, %v494_v13, %v496_v43  ;;  %v499_v51 = vsel %vm488_vm3, %v496_v43, %v498_v14  ;;  %v92_v0 = vpop.permute.xlu1 %91 }
  0xa2   :  { %v538_v2 = vadd.f32 %v497_v5, %v439_v49  ;;  %v596_v26 = vsel %vm587_vm4, %v593_v20, %v595_v44  ;;  %v539_v27 = vadd.f32 %v499_v51, %v440_v23  ;;  %v598_v28 = vsel %vm587_vm4, %v595_v44, %v597_v19 }
  0xa3   :  { %v658_v6 = vmul.f32 %v4417_v34, %v4552_v40  ;;  %v4650_v13 = vmul.f32 %v4407_v29, %v82_v50  ;;  %v4653_v36 = vmul.f32 %v4409_v30, %v82_v50  ;;  %v4656_v4 = vmul.f32 %v4411_v31, %v82_v50  ;;  %v72_v40 = vpop.permute.xlu0 %71 }
  0xa4   :  { %v637_v61 = vadd.f32 %v596_v26, %v538_v2  ;;  %v4659_v9 = vmul.f32 %v4413_v32, %v82_v50  ;;  %v4662_v54 = vmax.f32 %v1149_v8, %v1150_v22  ;;  %v638_v38 = vadd.f32 %v598_v28, %v539_v27 }
  0xa5   :  { %v694_v15 = vrot.slane %v658_v6, 6  ;;  %v4665_v43 = vmul.f32 %v4419_v35, %v82_v50  ;;  %v207_v47 = vrot.slane %v4650_v13, 1  ;;  %v4670_v1 = vmul.f32 %v4415_v33, %v82_v50 }
  0xa6   :  { %v4681_v23 = vmul.f32 %v4417_v34, %v82_v50  ;;  %v4684_v5 = vmul.f32 %v4407_v29, %v72_v40  ;;  %v4687_v10 = vmul.f32 %v4409_v30, %v72_v40  ;;  %v4693_v51 = vmul.f32 %v4413_v32, %v72_v40 }
  0xa7   :  { %v695_v44 = vsel %vm686_vm5, %v692_v21, %v694_v15  ;;  %v697_v8 = vsel %vm686_vm5, %v694_v15, %v696_v63  ;;  %v4690_v21 = vmul.f32 %v4411_v31, %v72_v40  ;;  %v4696_v2 = vmul.f32 %v4415_v33, %v72_v40 }
  0xa8   :  { %v736_v49 = vadd.f32 %v695_v44, %v637_v61  ;;  %v737_v22 = vadd.f32 %v697_v8, %v638_v38  ;;  %v6577_v27 = vrot.slane %v4684_v5, 1  ;;  %v4702_v28 = vmul.f32 %v4417_v34, %v72_v40 }
  0xa9   :  { %v6576_v61 = vrot.slane %v4687_v10, 2  ;;  %v6573_v38 = vrot.slane %v4690_v21, 3  ;;  %v6575_v15 = vrot.slane %v4693_v51, 4  ;;  %v6574_v20 = vrot.slane %v4696_v2, 5 }
  0xaa   :  { %v758_v26 = vadd.f32 %v4524_v3, %v736_v49  ;;  %v759_v50 = vadd.f32 %v4524_v3, %v737_v22  ;;  %v4711_v49 = vmul.f32 %v4419_v35, %v72_v40  ;;  %v204_v22 = vsel %vm191_vm0, %v201_v41, %v6577_v27 }
  0xab   :  { %v243_v12 = vadd.f32 %v204_v22, %v4559_v55  ;;  %v303_v24 = vsel %vm290_vm1, %v300_v56, %v6576_v61  ;;  %v402_v41 = vsel %vm389_vm2, %v399_v59, %v6573_v38  ;;  %v4743_v7 = vmul.f32 %v4407_v29, %v92_v0 }
  0xac   :  { %v774_v44 = vmax.f32 %v758_v26, 0.0  ;;  %v4708_v8 = vmax.f32 %v759_v50, 0.0  ;;  %v6578_v26 = vrot.slane %v4702_v28, 6  ;;  %v4750_v22 = vmul.f32 %v4409_v30, %v92_v0 }
  0xad   :  { %v342_v40 = vadd.f32 %v303_v24, %v243_v12  ;;  %v600_v39 = vsel %vm587_vm4, %v597_v19, %v6574_v20  ;;  %v210_v20 = vrot.slane %v4743_v7, 1  ;;  %v4781_v57 = vmul.f32 %v4413_v32, %v92_v0 }
  0xae   :  { %v854_v50 = vcombine.high %v774_v44, %v774_v44  ;;  %v861_v6 = vrot.slane %v774_v44, %v4441_v48  ;;  %v4735_v55 = vrot.slane %v4708_v8, %v4441_v48  ;;  %v501_v44 = vsel %vm488_vm3, %v498_v14, %v6575_v15 }
  0xaf   :  { %v441_v12 = vadd.f32 %v402_v41, %v342_v40  ;;  %v4758_v14 = vmul.f32 %v4411_v31, %v92_v0  ;;  %v4771_v41 = vmul.f32 %v4419_v35, %v92_v0  ;;  %v6637_v13 = vrot.slane %v4750_v22, 2 }
  0xb0   :  { %v4746_v56 = vrot.slane %v854_v50, %v4441_v48  ;;  %v869_v42 = vcombine.high %v861_v6, %v861_v6  ;;  %v1198_v59 = vsel %vm1113_vm6, %v861_v6, -inf  ;;  %v699_v6 = vsel %vm686_vm5, %v696_v63, %v6578_v26 }
  0xb1   :  { %v1199_v38 = vrot.slane %v1198_v59, 4  ;;  %v540_v40 = vadd.f32 %v501_v44, %v441_v12  ;;  %v4788_v44 = vmul.f32 %v4417_v34, %v92_v0 }
  0xb2   :  { %6633 = vst [vmem:[#allocation7_spill] sm:$0xff] %v4746_v56  ;;  %v1205_v50 = vsel %vm1113_vm6, %v869_v42, -inf  ;;  %v4763_v24 = vsel %vm1113_vm6, %v4746_v56, -inf  ;;  %v87_v42 = vpop.permute.xlu0 %86 }
  0xb3   :  { %6634 = vst [vmem:[#allocation8_spill] sm:$0xff] %v4763_v24  ;;  %v4773_v53 = vmax.f32 %v1198_v59, %v1199_v38  ;;  %v1206_v19 = vrot.slane %v1205_v50, 4  ;;  %v639_v63 = vadd.f32 %v600_v39, %v540_v40  ;;  %v4785_v38 = vmul.f32 %v4415_v33, %v92_v0 }
  0xb4   :  { %v132_v15 = vmul.f32 %v4419_v35, %v87_v42  ;;  %v168_v61 = vmul.f32 %v4407_v29, %v87_v42  ;;  %v267_v62 = vmul.f32 %v4409_v30, %v87_v42  ;;  %v366_v39 = vmul.f32 %v4411_v31, %v87_v42 }
  0xb5   :  { %v4791_v12 = vmax.f32 %v1205_v50, %v1206_v19  ;;  %v738_v46 = vadd.f32 %v699_v6, %v639_v63  ;;  %v465_v40 = vmul.f32 %v4413_v32, %v87_v42  ;;  %v564_v0 = vmul.f32 %v4415_v33, %v87_v42  ;;  %v4801_v50 = vpop.permute.xlu1 %76 }
  0xb6   :  { %v208_v60 = vrot.slane %v168_v61, 1  ;;  %v663_v59 = vmul.f32 %v4417_v34, %v87_v42  ;;  %v307_v63 = vrot.slane %v267_v62, 2  ;;  %v406_v26 = vrot.slane %v366_v39, 3 }
  0xb7   :  { %6635 = vst [vmem:[#allocation9_spill] sm:$0xff] %v4791_v12  ;;  %v760_v19 = vadd.f32 %v4524_v3, %v738_v46  ;;  %v505_v18 = vrot.slane %v465_v40, 4  ;;  %v130_v46 = vmul.f32 %v4419_v35, %v4801_v50  ;;  %v6636_v6 = vrot.slane %v4653_v36, 2 }
  0xb8   :  { %v209_v52 = vsel %vm191_vm0, %v207_v47, %v208_v60  ;;  %v211_v61 = vsel %vm191_vm0, %v208_v60, %v210_v20  ;;  %v310_v47 = vsel %vm290_vm1, %v307_v63, %v6637_v13  ;;  %v604_v27 = vrot.slane %v564_v0, 5 }
  0xb9   :  { %v776_v42 = vmax.f32 %v760_v19, 0.0  ;;  %v246_v56 = vadd.f32 %v209_v52, %v4665_v43  ;;  %v247_v24 = vadd.f32 %v211_v61, %v132_v15  ;;  %v308_v62 = vsel %vm290_vm1, %v6636_v6, %v307_v63 }
  0xba   :  { %v703_v12 = vrot.slane %v663_v59, 6  ;;  %v6638_v43 = vrot.slane %v4656_v4, 3  ;;  %v6639_v15 = vrot.slane %v4758_v14, 3  ;;  %v6640_v6 = vrot.slane %v4659_v9, 4 }
  0xbb   :  { %v888_v60 = vcombine.high %v776_v42, %v776_v42  ;;  %v895_v39 = vrot.slane %v776_v42, %v4441_v48  ;;  %v345_v40 = vadd.f32 %v308_v62, %v246_v56  ;;  %v346_v19 = vadd.f32 %v310_v47, %v247_v24 }
  0xbc   :  { %v407_v52 = vsel %vm389_vm2, %v6638_v43, %v406_v26  ;;  %v409_v36 = vsel %vm389_vm2, %v406_v26, %v6639_v15  ;;  %v506_v61 = vsel %vm488_vm3, %v6640_v6, %v505_v18  ;;  %v6641_v0 = vrot.slane %v4781_v57, 4 }
  0xbd   :  { %v4835_v63 = vrot.slane %v888_v60, %v4441_v48  ;;  %v903_v56 = vcombine.high %v895_v39, %v895_v39  ;;  %v1254_v4 = vsel %vm1113_vm6, %v895_v39, -inf  ;;  %v444_v24 = vadd.f32 %v407_v52, %v345_v40 }
  0xbe   :  { %v508_v59 = vsel %vm488_vm3, %v505_v18, %v6641_v0  ;;  %v1255_v42 = vrot.slane %v1254_v4, 4  ;;  %v445_v62 = vadd.f32 %v409_v36, %v346_v19  ;;  %v6642_v13 = vrot.slane %v4670_v1, 5 }
  0xbf   :  { %v166_v9 = vmul.f32 %v4407_v29, %v4801_v50  ;;  %v1261_v47 = vsel %vm1113_vm6, %v903_v56, -inf  ;;  %v543_v43 = vadd.f32 %v506_v61, %v444_v24  ;;  %v6643_v18 = vrot.slane %v4785_v38, 5 }
  0xc0   :  { %v605_v26 = vsel %vm587_vm4, %v6642_v13, %v604_v27  ;;  %v6644_v15 = vrot.slane %v4681_v23, 6  ;;  %v4854_v1 = vsel %vm1113_vm6, %v4835_v63, -inf  ;;  %v544_v19 = vadd.f32 %v508_v59, %v445_v62 }
  0xc1   :  { %v607_v60 = vsel %vm587_vm4, %v604_v27, %v6643_v18  ;;  %v6645_v52 = vrot.slane %v4788_v44, 6  ;;  %v642_v6 = vadd.f32 %v605_v26, %v543_v43  ;;  %v205_v61 = vrot.slane %v166_v9, 1 }
  0xc2   :  { %v704_v39 = vsel %vm686_vm5, %v6644_v15, %v703_v12  ;;  %v265_v27 = vmul.f32 %v4409_v30, %v4801_v50  ;;  %v364_v23 = vmul.f32 %v4411_v31, %v4801_v50  ;;  %v4863_v0 = vmax.f32 %v1254_v4, %v1255_v42 }
  0xc3   :  { %v706_v36 = vsel %vm686_vm5, %v703_v12, %v6645_v52  ;;  %v1262_v56 = vrot.slane %v1261_v47, 4  ;;  %v643_v24 = vadd.f32 %v607_v60, %v544_v19  ;;  %v463_v13 = vmul.f32 %v4413_v32, %v4801_v50 }
  0xc4   :  { %v741_v59 = vadd.f32 %v704_v39, %v642_v6  ;;  %v6646_v62 = vrot.slane %v4684_v5, 1  ;;  %v245_v26 = vadd.f32 %v205_v61, %v130_v46  ;;  %v304_v9 = vrot.slane %v265_v27, 2  ;;  %v97_v5 = vpop.permute.xlu0 %96 }
  0xc5   :  { %v742_v43 = vadd.f32 %v706_v36, %v643_v24  ;;  %v403_v15 = vrot.slane %v364_v23, 3  ;;  %v502_v52 = vrot.slane %v463_v13, 4  ;;  %v6647_v42 = vrot.slane %v4687_v10, 2  ;;  %v107_v36 = vpop.permute.xlu1 %106 }
  0xc6   :  { %v206_v12 = vsel %vm191_vm0, %v6646_v62, %v205_v61  ;;  %v763_v4 = vadd.f32 %v4524_v3, %v741_v59  ;;  %v344_v19 = vadd.f32 %v304_v9, %v245_v26  ;;  %v4877_v39 = vmul.f32 %v4415_v33, %v4801_v50 }
  0xc7   :  { %v244_v18 = vadd.f32 %v206_v12, %v4711_v49  ;;  %v305_v60 = vsel %vm290_vm1, %v6647_v42, %v304_v9  ;;  %v764_v49 = vadd.f32 %v4524_v3, %v742_v43  ;;  %v4882_v61 = vmax.f32 %v1261_v47, %v1262_v56 }
  0xc8   :  { %6648 = vst [vmem:[#allocation10_spill] sm:$0xff] %v4877_v39  ;;  %v4884_v27 = vmax.f32 %v763_v4, 0.0  ;;  %v6650_v10 = vrot.slane %v4690_v21, 3  ;;  %v443_v24 = vadd.f32 %v403_v15, %v344_v19  ;;  %v6651_v62 = vrot.slane %v4693_v51, 4 }
  0xc9   :  { %v343_v6 = vadd.f32 %v305_v60, %v244_v18  ;;  %v780_v13 = vmax.f32 %v764_v49, 0.0  ;;  %v4893_v26 = vmul.f32 %v4407_v29, %v97_v5  ;;  %v6588_v47 = vrot.slane %v4877_v39, 5  ;;  %v117_v39 = vpop.permute.xlu1 %116 }
  0xca   :  { %6649 = vst [vmem:[#allocation11_spill] sm:$0xff] %v4884_v27  ;;  %v404_v23 = vsel %vm389_vm2, %v6650_v10, %v403_v15  ;;  %v503_v12 = vsel %vm488_vm3, %v6651_v62, %v502_v52  ;;  %v4895_v9 = vadd.f32 %v502_v52, %v443_v24  ;;  %v4900_v56 = vmul.f32 %v4417_v34, %v4801_v50 }
  0xcb   :  { %v442_v59 = vadd.f32 %v404_v23, %v343_v6  ;;  %v4903_v21 = vmul.f32 %v4419_v35, %v97_v5  ;;  %v4909_v51 = vrot.slane %v4884_v27, %v4441_v48  ;;  %v946_v18 = vcombine.high %v780_v13, %v780_v13 }
  0xcc   :  { %6652 = vst [vmem:[#allocation12_spill] sm:$0xff] %v4895_v9  ;;  %6653 = vst [vmem:[#allocation13_spill] sm:$0xff] %v4900_v56  ;;  %v953_v15 = vrot.slane %v780_v13, %v4441_v48  ;;  %v6586_v4 = vrot.slane %v4893_v26, 1  ;;  %v4914_v42 = vmul.f32 %v4409_v30, %v97_v5  ;;  %v4917_v50 = vmul.f32 %v4411_v31, %v97_v5 }
  0xcd   :  { %6654 = vst [vmem:[#allocation14_spill] sm:$0xff] %v4909_v51  ;;  %v541_v52 = vadd.f32 %v503_v12, %v442_v59  ;;  %v4920_v60 = vrot.slane %v946_v18, %v4441_v48  ;;  %v4924_v6 = vmul.f32 %v4413_v32, %v97_v5  ;;  %v6587_v23 = vrot.slane %v4900_v56, 6 }
  0xce   :  { %v961_v19 = vcombine.high %v953_v15, %v953_v15  ;;  %v1345_v49 = vsel %vm1113_vm6, %v953_v15, -inf  ;;  %v213_v24 = vsel %vm191_vm0, %v210_v20, %v6586_v4  ;;  %v6589_v13 = vrot.slane %v4914_v42, 2 }
  0xcf   :  { %6655 = vst [vmem:[#allocation15_spill] sm:$0xff] %v4920_v60  ;;  %v1346_v10 = vrot.slane %v1345_v49, 4  ;;  %v4936_v62 = vsel %vm1113_vm6, %v4920_v60, -inf  ;;  %v6657_v12 = vrot.slane %v4696_v2, 5  ;;  %v248_v15 = vadd.f32 %v213_v24, %v4771_v41 }
  0xd0   :  { %v1352_v59 = vsel %vm1113_vm6, %v961_v19, -inf  ;;  %6656 = vst [vmem:[#allocation16_spill] sm:$0xff] %v4936_v62  ;;  %v6658_v19 = vrot.slane %v4750_v22, 2  ;;  %v410_v4 = vrot.slane %v4917_v50, 3  ;;  %v509_v2 = vrot.slane %v4924_v6, 4 }
  0xd1   :  { %v602_v18 = vsel %vm587_vm4, %v6657_v12, %v6588_v47  ;;  %v4944_v43 = vmax.f32 %v1345_v49, %v1346_v10  ;;  %v1353_v7 = vrot.slane %v1352_v59, 4  ;;  %v566_v12 = vmul.f32 %v4415_v33, %v97_v5 }
  0xd2   :  { %v4946_v20 = vadd.f32 %v602_v18, %v541_v52  ;;  %v312_v40 = vsel %vm290_vm1, %v6658_v19, %v6589_v13  ;;  %v6659_v49 = vrot.slane %v4702_v28, 6  ;;  %v6660_v6 = vrot.slane %v4758_v14, 3 }
  0xd3   :  { %v347_v46 = vadd.f32 %v312_v40, %v248_v15  ;;  %v4967_v40 = vmul.f32 %v4417_v34, %v97_v5  ;;  %v608_v24 = vrot.slane %v566_v12, 5  ;;  %v4974_v18 = vmul.f32 %v4407_v29, %v107_v36 }
  0xd4   :  { %v4964_v22 = vsel %vm686_vm5, %v6659_v49, %v6587_v23  ;;  %v411_v10 = vsel %vm389_vm2, %v6660_v6, %v410_v4  ;;  %v4978_v28 = vmul.f32 %v4409_v30, %v107_v36  ;;  %v4981_v49 = vmul.f32 %v4411_v31, %v107_v36 }
  0xd5   :  { %v446_v15 = vadd.f32 %v411_v10, %v347_v46  ;;  %v6590_v19 = vrot.slane %v4967_v40, 6  ;;  %v4983_v5 = vmax.f32 %v1352_v59, %v1353_v7  ;;  %v6661_v23 = vrot.slane %v4781_v57, 4  ;;  %v102_v46 = vpop.permute.xlu0 %101 }
  0xd6   :  { %v4989_v12 = vmul.f32 %v4419_v35, %v107_v36  ;;  %v4992_v6 = vmul.f32 %v4413_v32, %v107_v36  ;;  %v6662_v47 = vrot.slane %v4785_v38, 5  ;;  %v4999_v59 = vmul.f32 %v4415_v33, %v107_v36 }
  0xd7   :  { %v510_v14 = vsel %vm488_vm3, %v6661_v23, %v509_v2  ;;  %v6663_v57 = vrot.slane %v4788_v44, 6  ;;  %v369_v13 = vmul.f32 %v4411_v31, %v102_v46  ;;  %v468_v44 = vmul.f32 %v4413_v32, %v102_v46 }
  0xd8   :  { %v545_v10 = vadd.f32 %v510_v14, %v446_v15  ;;  %v609_v41 = vsel %vm587_vm4, %v6662_v47, %v608_v24  ;;  %v5009_v15 = vmul.f32 %v4417_v34, %v107_v36  ;;  %v171_v47 = vmul.f32 %v4407_v29, %v102_v46 }
  0xd9   :  { %v708_v23 = vsel %vm686_vm5, %v6663_v57, %v6590_v19  ;;  %v270_v14 = vmul.f32 %v4409_v30, %v102_v46  ;;  %v567_v57 = vmul.f32 %v4415_v33, %v102_v46  ;;  %v666_v19 = vmul.f32 %v4417_v34, %v102_v46 }
  0xda   :  { %v644_v38 = vadd.f32 %v609_v41, %v545_v10  ;;  %v214_v50 = vrot.slane %v171_v47, 1  ;;  %v412_v36 = vrot.slane %v369_v13, 3  ;;  %v135_v9 = vmul.f32 %v4419_v35, %v102_v46 }
  0xdb   :  { %v313_v56 = vrot.slane %v270_v14, 2  ;;  %v511_v51 = vrot.slane %v468_v44, 4  ;;  %v6664_v27 = vrot.slane %v4893_v26, 1  ;;  %v6665_v62 = vrot.slane %v4974_v18, 1 }
  0xdc   :  { %v743_v7 = vadd.f32 %v708_v23, %v644_v38  ;;  %v610_v38 = vrot.slane %v567_v57, 5  ;;  %v709_v14 = vrot.slane %v666_v19, 6  ;;  %v138_v10 = vmul.f32 %v4419_v35, %v117_v39 }
  0xdd   :  { %v215_v60 = vsel %vm191_vm0, %v6664_v27, %v214_v50  ;;  %v217_v23 = vsel %vm191_vm0, %v214_v50, %v6665_v62  ;;  %v6666_v46 = vrot.slane %v4914_v42, 2  ;;  %v6667_v26 = vrot.slane %v4978_v28, 2 }
  0xde   :  { %v765_v52 = vadd.f32 %v4524_v3, %v743_v7  ;;  %v249_v13 = vadd.f32 %v215_v60, %v4903_v21  ;;  %v250_v47 = vadd.f32 %v217_v23, %v135_v9  ;;  %v413_v44 = vsel %vm389_vm2, %v410_v4, %v412_v36 }
  0xdf   :  { %v314_v7 = vsel %vm290_vm1, %v6666_v46, %v313_v56  ;;  %v316_v27 = vsel %vm290_vm1, %v313_v56, %v6667_v26  ;;  %v6668_v21 = vrot.slane %v4981_v49, 3  ;;  %v512_v60 = vsel %vm488_vm3, %v509_v2, %v511_v51  ;;  %v112_v46 = vpop.permute.xlu0 %111 }
  0xe0   :  { %v5030_v41 = vmax.f32 %v765_v52, 0.0  ;;  %v348_v62 = vadd.f32 %v314_v7, %v249_v13  ;;  %v349_v50 = vadd.f32 %v316_v27, %v250_v47  ;;  %v6669_v52 = vrot.slane %v4992_v6, 4 }
  0xe1   :  { %v415_v9 = vsel %vm389_vm2, %v412_v36, %v6668_v21  ;;  %v611_v19 = vsel %vm587_vm4, %v608_v24, %v610_v38  ;;  %v6670_v57 = vrot.slane %v4999_v59, 5  ;;  %v174_v4 = vmul.f32 %v4407_v29, %v117_v39 }
  0xe2   :  { %v514_v42 = vsel %vm488_vm3, %v511_v51, %v6669_v52  ;;  %v447_v23 = vadd.f32 %v413_v44, %v348_v62  ;;  %v448_v13 = vadd.f32 %v415_v9, %v349_v50  ;;  %v5052_v47 = vmul.f32 %v4409_v30, %v117_v39 }
  0xe3   :  { %v613_v56 = vsel %vm587_vm4, %v610_v38, %v6670_v57  ;;  %v5055_v36 = vmul.f32 %v4411_v31, %v117_v39  ;;  %v5059_v2 = vrot.slane %v5030_v41, %v4441_v48  ;;  %v220_v51 = vrot.slane %v174_v4, 1 }
  0xe4   :  { %v5062_v24 = vmul.f32 %v4413_v32, %v117_v39  ;;  %v5065_v38 = vmul.f32 %v4415_v33, %v117_v39  ;;  %v546_v7 = vadd.f32 %v512_v60, %v447_v23  ;;  %v547_v26 = vadd.f32 %v514_v42, %v448_v13 }
  0xe5   :  { %6671 = vst [vmem:[#allocation17_spill] sm:$0xff] %v5055_v36  ;;  %v6674_v27 = vrot.slane %v4967_v40, 6  ;;  %v5071_v62 = vmul.f32 %v4417_v34, %v117_v39  ;;  %v6676_v50 = vrot.slane %v5009_v15, 6  ;;  %v5076_v9 = vadd.f32 %v220_v51, %v138_v10 }
  0xe6   :  { %6672 = vst [vmem:[#allocation18_spill] sm:$0xff] %v5062_v24  ;;  %6673 = vst [vmem:[#allocation19_spill] sm:$0xff] %v5065_v38  ;;  %v6602_v57 = vrot.slane %v5055_v36, 3  ;;  %v645_v4 = vadd.f32 %v611_v19, %v546_v7  ;;  %v646_v60 = vadd.f32 %v613_v56, %v547_v26  ;;  %v6601_v42 = vrot.slane %v5062_v24, 4 }
  0xe7   :  { %v710_v44 = vsel %vm686_vm5, %v6674_v27, %v709_v14  ;;  %6675 = vst [vmem:[#allocation20_spill] sm:$0xff] %v5071_v62  ;;  %v712_v21 = vsel %vm686_vm5, %v709_v14, %v6676_v50  ;;  %v173_v40 = vmul.f32 %v4407_v29, %v112_v46  ;;  %v272_v39 = vmul.f32 %v4409_v30, %v112_v46 }
  0xe8   :  { %v371_v13 = vmul.f32 %v4411_v31, %v112_v46  ;;  %v470_v14 = vmul.f32 %v4413_v32, %v112_v46  ;;  %v744_v10 = vadd.f32 %v710_v44, %v645_v4  ;;  %v745_v27 = vadd.f32 %v712_v21, %v646_v60 }
  0xe9   :  { %v6600_v50 = vrot.slane %v5071_v62, 6  ;;  %v218_v52 = vrot.slane %v173_v40, 1  ;;  %v137_v19 = vmul.f32 %v4419_v35, %v112_v46  ;;  %v317_v56 = vrot.slane %v272_v39, 2 }
  0xea   :  { %v416_v7 = vrot.slane %v371_v13, 3  ;;  %v515_v26 = vrot.slane %v470_v14, 4  ;;  %v766_v29 = vadd.f32 %v4524_v3, %v744_v10  ;;  %v767_v23 = vadd.f32 %v4524_v3, %v745_v27 }
  0xeb   :  { %v6677_v30 = vrot.slane %v4974_v18, 1  ;;  %v221_v32 = vsel %vm191_vm0, %v218_v52, %v220_v51  ;;  %v6678_v4 = vrot.slane %v4978_v28, 2  ;;  %v569_v60 = vmul.f32 %v4415_v33, %v112_v46 }
  0xec   :  { %v252_v21 = vadd.f32 %v221_v32, %v137_v19  ;;  %v782_v40 = vmax.f32 %v766_v29, 0.0  ;;  %v5099_v39 = vmax.f32 %v767_v23, 0.0  ;;  %v6679_v13 = vrot.slane %v5052_v47, 2 }
  0xed   :  { %v219_v31 = vsel %vm191_vm0, %v6677_v30, %v218_v52  ;;  %v318_v35 = vsel %vm290_vm1, %v6678_v4, %v317_v56  ;;  %v6680_v14 = vrot.slane %v4981_v49, 3  ;;  %v419_v28 = vsel %vm389_vm2, %v416_v7, %v6602_v57 }
  0xee   :  { %v251_v44 = vadd.f32 %v219_v31, %v4989_v12  ;;  %v320_v18 = vsel %vm290_vm1, %v317_v56, %v6679_v13  ;;  %v6681_v10 = vrot.slane %v4992_v6, 4  ;;  %v980_v23 = vcombine.high %v782_v40, %v782_v40 }
  0xef   :  { %v417_v51 = vsel %vm389_vm2, %v6680_v14, %v416_v7  ;;  %v351_v12 = vadd.f32 %v320_v18, %v252_v21  ;;  %v987_v27 = vrot.slane %v782_v40, %v4441_v48  ;;  %v5116_v19 = vrot.slane %v5099_v39, %v4441_v48 }
  0xf0   :  { %v350_v52 = vadd.f32 %v318_v35, %v251_v44  ;;  %v516_v33 = vsel %vm488_vm3, %v6681_v10, %v515_v26  ;;  %v518_v49 = vsel %vm488_vm3, %v515_v26, %v6601_v42  ;;  %v614_v30 = vrot.slane %v569_v60, 5 }
  0xf1   :  { %v450_v29 = vadd.f32 %v419_v28, %v351_v12  ;;  %v668_v7 = vmul.f32 %v4417_v34, %v112_v46  ;;  %v5123_v6 = vrot.slane %v980_v23, %v4441_v48  ;;  %v995_v31 = vcombine.high %v987_v27, %v987_v27 }
  0xf2   :  { %v449_v56 = vadd.f32 %v417_v51, %v350_v52  ;;  %v1401_v32 = vsel %vm1113_vm6, %v987_v27, -inf  ;;  %v739_v44 = vadd.f32 %v4964_v22, %v4946_v20  ;;  %v6682_v40 = vrot.slane %v4999_v59, 5 }
  0xf3   :  { %v1402_v21 = vrot.slane %v1401_v32, 4  ;;  %v549_v35 = vadd.f32 %v518_v49, %v450_v29  ;;  %v1408_v34 = vsel %vm1113_vm6, %v995_v31, -inf  ;;  %v5136_v46 = vsel %vm1113_vm6, %v5123_v6, -inf }
  0xf4   :  { %v548_v4 = vadd.f32 %v516_v33, %v449_v56  ;;  %v615_v26 = vsel %vm587_vm4, %v6682_v40, %v614_v30  ;;  %v6683_v13 = vrot.slane %v5065_v38, 5  ;;  %v1409_v18 = vrot.slane %v1408_v34, 4 }
  0xf5   :  { %v5141_v22 = vmax.f32 %v1401_v32, %v1402_v21  ;;  %v713_v52 = vrot.slane %v668_v7, 6  ;;  %v761_v12 = vadd.f32 %v4524_v3, %v739_v44  ;;  %v837_v28 = vcombine.high %v4562_v45, %v4562_v45 }
  0xf6   :  { %v617_v20 = vsel %vm587_vm4, %v614_v30, %v6683_v13  ;;  %v647_v14 = vadd.f32 %v615_v26, %v548_v4  ;;  %v5148_v33 = vmax.f32 %v1408_v34, %v1409_v18  ;;  %v852_v23 = vcombine.high %v4585_v16, %v4585_v16 }
  0xf7   :  { %v648_v51 = vadd.f32 %v617_v20, %v549_v35  ;;  %v6684_v27 = vrot.slane %v4632_v17, 2  ;;  %v6685_v56 = vrot.slane %v5009_v15, 6  ;;  %v716_v30 = vsel %vm686_vm5, %v713_v52, %v6600_v50 }
  0xf8   :  { %v777_v45 = vmax.f32 %v761_v12, 0.0  ;;  %v851_v7 = vrot.slane %v837_v28, %v4441_v48  ;;  %v1152_v21 = vrot.slane %v4662_v54, 2  ;;  %v6686_v15 = vrot.slane %v4618_v58, 4 }
  0xf9   :  { %v1146_v49 = vmax.f32 %v4632_v17, %v6684_v27  ;;  %v714_v29 = vsel %vm686_vm5, %v6685_v56, %v713_v52  ;;  %v747_v32 = vadd.f32 %v716_v30, %v648_v51  ;;  %v1177_v57 = vsel %vm1113_vm6, %v852_v23, -inf }
  0xfa   :  { %v746_v31 = vadd.f32 %v714_v29, %v647_v14  ;;  %v912_v4 = vrot.slane %v777_v45, %v4441_v48  ;;  %v905_v35 = vcombine.high %v777_v45, %v777_v45  ;;  %v853_v17 = vcombine.high %v851_v7, %v851_v7 }
  0xfb   :  { %v1147_v44 = vrot.slane %v1146_v49, 1  ;;  %v1158_v40 = vmax.f32 %v4618_v58, %v6686_v15  ;;  %v5169_v34 = vadd.f32 %v4524_v3, %v747_v32  ;;  %v1153_v20 = vmax.f32 %v4662_v54, %v1152_v21 }
  0xfc   :  { %v768_v26 = vadd.f32 %v4524_v3, %v746_v31  ;;  %v920_v18 = vcombine.high %v912_v4, %v912_v4  ;;  %v1282_v14 = vsel %vm1113_vm6, %v912_v4, -inf  ;;  %v919_v51 = vrot.slane %v905_v35, %v4441_v48 }
  0xfd   :  { %v5171_v13 = vmax.f32 %v1146_v49, %v1147_v44  ;;  %v1159_v52 = vrot.slane %v1158_v40, 2  ;;  %v1283_v28 = vrot.slane %v1282_v14, 4  ;;  %v1154_v27 = vrot.slane %v1153_v20, 1 }
  0xfe   :  { %v5176_v12 = vmax.f32 %v768_v26, 0.0  ;;  %v6688_v58 = vcombine.high %v4610_v37, %v4610_v37  ;;  %v1289_v49 = vsel %vm1113_vm6, %v920_v18, -inf  ;;  %v921_v56 = vcombine.high %v919_v51, %v919_v51 }
  0xff   :  { %6687 = vst [vmem:[#allocation21_spill] sm:$0xff] %v5171_v13  ;;  %v1296_v54 = vsel %vm1113_vm6, %v919_v51, -inf  ;;  %v1160_v29 = vmax.f32 %v1158_v40, %v1159_v52  ;;  %v1284_v31 = vmax.f32 %v1282_v14, %v1283_v28  ;;  %v1290_v32 = vrot.slane %v1289_v49, 4 }
 0x100   :  { %v1163_v3 = vsel %vm1113_vm6, %v6688_v58, -inf  ;;  %v5188_v45 = vrot.slane %v5176_v12, %v4441_v48  ;;  %v1303_v44 = vsel %vm1113_vm6, %v921_v56, -inf  ;;  %v1297_v37 = vrot.slane %v1296_v54, 4 }
 0x101   :  { %v5191_v21 = vmax.f32 %v1153_v20, %v1154_v27  ;;  %v1161_v4 = vrot.slane %v1160_v29, 1  ;;  %v1285_v15 = vrot.slane %v1284_v31, 2  ;;  %v1291_v40 = vmax.f32 %v1289_v49, %v1290_v32 }
 0x102   :  { %v5195_v35 = vsel %vm1113_vm6, %v5188_v45, -inf  ;;  %v1304_v26 = vrot.slane %v1303_v44, 4  ;;  %v1298_v51 = vmax.f32 %v1296_v54, %v1297_v37  ;;  %v1164_v14 = vrot.slane %v1163_v3, 4 }
 0x103   :  { %v5198_v52 = vmax.f32 %v1160_v29, %v1161_v4  ;;  %v5200_v28 = vmax.f32 %v1284_v31, %v1285_v15  ;;  %v1292_v58 = vrot.slane %v1291_v40, 2  ;;  %v1170_v20 = vsel %vm1113_vm6, %v4585_v16, -inf }
 0x104   :  { %v1305_v56 = vmax.f32 %v1303_v44, %v1304_v26  ;;  %v1299_v27 = vrot.slane %v1298_v51, 2  ;;  %v1165_v50 = vmax.f32 %v1163_v3, %v1164_v14  ;;  %v1171_v42 = vrot.slane %v1170_v20, 4 }
 0x105   :  { %v1293_v49 = vmax.f32 %v1291_v40, %v1292_v58  ;;  %v1178_v30 = vrot.slane %v1177_v57, 4  ;;  %v1184_v54 = vsel %vm1113_vm6, %v851_v7, -inf  ;;  %v1191_v26 = vsel %vm1113_vm6, %v853_v17, -inf }
 0x106   :  { %v1306_v32 = vrot.slane %v1305_v56, 2  ;;  %v1300_v29 = vmax.f32 %v1298_v51, %v1299_v27  ;;  %v1166_v37 = vrot.slane %v1165_v50, 2  ;;  %v1172_v4 = vmax.f32 %v1170_v20, %v1171_v42 }
 0x107   :  { %v1185_v31 = vrot.slane %v1184_v54, 4  ;;  %v1294_v15 = vrot.slane %v1293_v49, 1  ;;  %v1179_v44 = vmax.f32 %v1177_v57, %v1178_v30  ;;  %v1192_v58 = vrot.slane %v1191_v26, 4 }
 0x108   :  { %v1307_v18 = vmax.f32 %v1305_v56, %v1306_v32  ;;  %v1301_v16 = vrot.slane %v1300_v29, 1  ;;  %v1167_v60 = vmax.f32 %v1165_v50, %v1166_v37  ;;  %v1173_v3 = vrot.slane %v1172_v4, 2 }
 0x109   :  { %v1186_v14 = vmax.f32 %v1184_v54, %v1185_v31  ;;  %v5207_v59 = vmax.f32 %v1293_v49, %v1294_v15  ;;  %v1180_v40 = vrot.slane %v1179_v44, 2  ;;  %v1193_v50 = vmax.f32 %v1191_v26, %v1192_v58 }
 0x10a   :  { %v1308_v23 = vrot.slane %v1307_v18, 1  ;;  %v5209_v10 = vmax.f32 %v1300_v29, %v1301_v16  ;;  %v1168_v7 = vrot.slane %v1167_v60, 1  ;;  %v1174_v51 = vmax.f32 %v1172_v4, %v1173_v3 }
 0x10b   :  { %6689 = vst [vmem:[#allocation22_spill] sm:$0xff] %v5207_v59  ;;  %v1187_v42 = vrot.slane %v1186_v14, 2  ;;  %1683 = vrot.lane.b32.xlu0 %v5207_v59, %s4295_s27  ;;  %v1181_v17 = vmax.f32 %v1179_v44, %v1180_v40  ;;  %v1194_v49 = vrot.slane %v1193_v50, 2  ;;  %v1839_v29 = vsel %vm1576_vm7, %v5191_v21, %v5171_v13 }
 0x10c   :  { %6690 = vst [vmem:[#allocation23_spill] sm:$0xff] %v5209_v10  ;;  %v5213_v57 = vmax.f32 %v1307_v18, %v1308_v23  ;;  %v5215_v30 = vmax.f32 %v1167_v60, %v1168_v7  ;;  %v1175_v56 = vrot.slane %v1174_v51, 1  ;;  %v1840_v4 = vsel %vm1578_vm8, %v5198_v52, %v1839_v29 }
 0x10d   :  { %v1188_v20 = vmax.f32 %v1186_v14, %v1187_v42  ;;  %v1182_v27 = vrot.slane %v1181_v17, 1  ;;  %v1195_v54 = vmax.f32 %v1193_v50, %v1194_v49  ;;  %v6691_v31 = vcombine.high %v4599_v25, %v4599_v25 }
 0x10e   :  { %1819 = vrot.lane.b32.xlu1 %v5213_v57, %s4296_s28  ;;  %v5219_v32 = vmax.f32 %v1174_v51, %v1175_v56  ;;  %v818_v44 = vcombine.high %v4625_v11, %v4625_v11  ;;  %v1841_v16 = vsel %vm1580_vm9, %v5215_v30, %v1840_v4  ;;  %v871_v3 = vcombine.high %v4708_v8, %v4708_v8 }
 0x10f   :  { %v1189_v18 = vrot.slane %v1188_v20, 1  ;;  %1751 = vrot.lane.b32.xlu0 %v5209_v10, %s4297_s29  ;;  %v5223_v60 = vmax.f32 %v1181_v17, %v1182_v27  ;;  %v817_v15 = vrot.slane %v6691_v31, %v4441_v48  ;;  %v1196_v26 = vrot.slane %v1195_v54, 1 }
 0x110   :  { %v886_v14 = vcombine.high %v4735_v55, %v4735_v55  ;;  %v1842_v23 = vsel %vm1582_vm10, %v5219_v32, %v1841_v16  ;;  %v1121_v25 = vsel %vm1113_vm6, %v818_v44, -inf  ;;  %v885_v56 = vrot.slane %v871_v3, %v4441_v48 }
 0x111   :  { %v5228_v37 = vmax.f32 %v1188_v20, %v1189_v18  ;;  %v819_v40 = vcombine.high %v817_v15, %v817_v15  ;;  %v1128_v58 = vsel %vm1113_vm6, %v817_v15, -inf  ;;  %v5248_v7 = vmax.f32 %v1195_v54, %v1196_v26  ;;  %v6693_v15 = vld [vmem:[#allocation9_spill] sm:$0xff]  ;;  %v6694_v26 = vld [vmem:[#allocation8_spill] sm:$0xff] }
 0x112   :  { %v1843_v51 = vsel %vm1584_vm11, %v5223_v60, %v1842_v23  ;;  %v1122_v42 = vrot.slane %v1121_v25, 4  ;;  %v1129_v17 = vrot.slane %v1128_v58, 4  ;;  %v6692_v20 = vrot.slane %v4773_v53, 2 }
 0x113   :  { %v1844_v8 = vsel %vm1586_vm12, %v5228_v37, %v1843_v51  ;;  %v1135_v50 = vsel %vm1113_vm6, %v819_v40, -inf  ;;  %v887_v4 = vcombine.high %v885_v56, %v885_v56  ;;  %v1208_v44 = vrot.slane %v6693_v15, 2  ;;  %v6696_v51 = vld [vmem:[#allocation7_spill] sm:$0xff] }
 0x114   :  { %v1202_v27 = vmax.f32 %v4773_v53, %v6692_v20  ;;  %v1845_v49 = vsel %vm1588_vm13, %v5248_v7, %v1844_v8  ;;  %v1123_v18 = vmax.f32 %v1121_v25, %v1122_v42  ;;  %v1130_v54 = vmax.f32 %v1128_v58, %v1129_v17 }
 0x115   :  { %v1136_v29 = vrot.slane %v1135_v50, 4  ;;  %1881 = vrot.lane.b32.xlu1 %v1845_v49, %s4298_s30  ;;  %v6695_v16 = vrot.slane %v6694_v26, 4  ;;  %v6697_v8 = vcombine.high %v6696_v51, %v6696_v51  ;;  %v1209_v42 = vmax.f32 %v6693_v15, %v1208_v44 }
 0x116   :  { %v1203_v31 = vrot.slane %v1202_v27, 1  ;;  %v1124_v23 = vrot.slane %v1123_v18, 2  ;;  %v1131_v40 = vrot.slane %v1130_v54, 2  ;;  %vm1914_vm0 = vcmask 130048  }
 0x117   :  { %v1214_v3 = vmax.f32 %v6694_v26, %v6695_v16  ;;  %v1137_v53 = vmax.f32 %v1135_v50, %v1136_v29  ;;  %v1219_v25 = vsel %vm1113_vm6, %v6697_v8, -inf  ;;  %v1226_v26 = vsel %vm1113_vm6, %v4735_v55, -inf }
 0x118   :  { %v5270_v58 = vmax.f32 %v1202_v27, %v1203_v31  ;;  %v1220_v20 = vrot.slane %v1219_v25, 4  ;;  %v1125_v49 = vmax.f32 %v1123_v18, %v1124_v23  ;;  %v1132_v11 = vmax.f32 %v1130_v54, %v1131_v40 }
 0x119   :  { %v1215_v17 = vrot.slane %v1214_v3, 2  ;;  %v1138_v62 = vrot.slane %v1137_v53, 2  ;;  %v1210_v16 = vrot.slane %v1209_v42, 1  ;;  %v1227_v29 = vrot.slane %v1226_v26, 4 }
 0x11a   :  { %v1221_v50 = vmax.f32 %v1219_v25, %v1220_v20  ;;  %v1126_v24 = vrot.slane %v1125_v49, 1  ;;  %v1133_v51 = vrot.slane %v1132_v11, 1  ;;  %v1233_v27 = vsel %vm1113_vm6, %v886_v14, -inf }
 0x11b   :  { %v1216_v38 = vmax.f32 %v1214_v3, %v1215_v17  ;;  %v1139_v36 = vmax.f32 %v1137_v53, %v1138_v62  ;;  %v5276_v31 = vmax.f32 %v1209_v42, %v1210_v16  ;;  %v1228_v8 = vmax.f32 %v1226_v26, %v1227_v29 }
 0x11c   :  { %v1222_v44 = vrot.slane %v1221_v50, 2  ;;  %v5278_v18 = vmax.f32 %v1125_v49, %v1126_v24  ;;  %v5280_v54 = vmax.f32 %v1132_v11, %v1133_v51  ;;  %v1234_v55 = vrot.slane %v1233_v27, 4 }
 0x11d   :  { %v1217_v15 = vrot.slane %v1216_v38, 1  ;;  %v1140_v23 = vrot.slane %v1139_v36, 1  ;;  %v1229_v25 = vrot.slane %v1228_v8, 2  ;;  %v1240_v17 = vsel %vm1113_vm6, %v885_v56, -inf }
 0x11e   :  { %6698 = vst [vmem:[#allocation9_spill] sm:$0xff] %v5278_v18  ;;  %6699 = vst [vmem:[#allocation8_spill] sm:$0xff] %v5280_v54  ;;  %v1223_v3 = vmax.f32 %v1221_v50, %v1222_v44  ;;  %v1635_v14 = vsel %vm1576_vm7, %v5280_v54, %v5278_v18  ;;  %v1235_v53 = vmax.f32 %v1233_v27, %v1234_v55  ;;  %v1241_v42 = vrot.slane %v1240_v17, 4 }
 0x11f   :  { %v5282_v40 = vmax.f32 %v1216_v38, %v1217_v15  ;;  %v5285_v62 = vmax.f32 %v1139_v36, %v1140_v23  ;;  %v1230_v20 = vmax.f32 %v1228_v8, %v1229_v25  ;;  %v1247_v11 = vsel %vm1113_vm6, %v887_v4, -inf }
 0x120   :  { %v1224_v24 = vrot.slane %v1223_v3, 1  ;;  %v1846_v38 = vsel %vm1576_vm7, %v5276_v31, %v5270_v58  ;;  %v1236_v56 = vrot.slane %v1235_v53, 2  ;;  %v1242_v36 = vmax.f32 %v1240_v17, %v1241_v42 }
 0x121   :  { %v1636_v49 = vsel %vm1578_vm8, %v5285_v62, %v1635_v14  ;;  %v1248_v26 = vrot.slane %v1247_v11, 4  ;;  %v1231_v29 = vrot.slane %v1230_v20, 1  ;;  %v1847_v51 = vsel %vm1578_vm8, %v5282_v40, %v1846_v38 }
 0x122   :  { %v1637_v16 = vsel %vm1580_vm9, %v5171_v13, %v1636_v49  ;;  %v5298_v50 = vmax.f32 %v1223_v3, %v1224_v24  ;;  %v1237_v27 = vmax.f32 %v1235_v53, %v1236_v56  ;;  %v1243_v15 = vrot.slane %v1242_v36, 2 }
 0x123   :  { %v1638_v4 = vsel %vm1582_vm10, %v5191_v21, %v1637_v16  ;;  %v1249_v44 = vmax.f32 %v1247_v11, %v1248_v26  ;;  %v5306_v23 = vmax.f32 %v1230_v20, %v1231_v29  ;;  %v1642_v3 = vsel %vm1576_vm7, %v5228_v37, %v5223_v60 }
 0x124   :  { %6700 = vst [vmem:[#allocation7_spill] sm:$0xff] %v5298_v50  ;;  %v1639_v8 = vsel %vm1584_vm11, %v5198_v52, %v1638_v4  ;;  %v1848_v55 = vsel %vm1580_vm9, %v5298_v50, %v1847_v51  ;;  %v1238_v17 = vrot.slane %v1237_v27, 1  ;;  %v1244_v14 = vmax.f32 %v1242_v36, %v1243_v15 }
 0x125   :  { %6701 = vst [vmem:[#allocation24_spill] sm:$0xff] %v5306_v23  ;;  %v1640_v25 = vsel %vm1586_vm12, %v5215_v30, %v1639_v8  ;;  %v1250_v53 = vrot.slane %v1249_v44, 2  ;;  %v1849_v24 = vsel %vm1582_vm10, %v5306_v23, %v1848_v55  ;;  %v1643_v20 = vsel %vm1578_vm8, %v5248_v7, %v1642_v3 }
 0x126   :  { %v1641_v42 = vsel %vm1588_vm13, %v5219_v32, %v1640_v25  ;;  %v6702_v11 = vrot.slane %v4863_v0, 2  ;;  %v5325_v49 = vmax.f32 %v1237_v27, %v1238_v17  ;;  %v1245_v56 = vrot.slane %v1244_v14, 1 }
 0x127   :  { %1677 = vrot.lane.b32.xlu0 %v1641_v42, %s4295_s27  ;;  %v1251_v36 = vmax.f32 %v1249_v44, %v1250_v53  ;;  %v1644_v26 = vsel %vm1580_vm9, %v5270_v58, %v1643_v20  ;;  %v1264_v51 = vrot.slane %v4882_v61, 2  ;;  %v6704_v4 = vrot.slane %v4854_v1, 4 }
 0x128   :  { %v1258_v38 = vmax.f32 %v4863_v0, %v6702_v11  ;;  %6703 = vst [vmem:[#allocation25_spill] sm:$0xff] %v5325_v49  ;;  %v1645_v16 = vsel %vm1582_vm10, %v5276_v31, %v1644_v26  ;;  %v5335_v0 = vmax.f32 %v1244_v14, %v1245_v56  ;;  %v1850_v27 = vsel %vm1584_vm11, %v5325_v49, %v1849_v24 }
 0x129   :  { %v1270_v15 = vmax.f32 %v4854_v1, %v6704_v4  ;;  %v1252_v8 = vrot.slane %v1251_v36, 1  ;;  %v1646_v44 = vsel %vm1584_vm11, %v5282_v40, %v1645_v16  ;;  %v1265_v25 = vmax.f32 %v4882_v61, %v1264_v51 }
 0x12a   :  { %v1259_v29 = vrot.slane %v1258_v38, 1  ;;  %v1647_v55 = vsel %vm1586_vm12, %v5298_v50, %v1646_v44  ;;  %v1851_v1 = vsel %vm1586_vm12, %v5335_v0, %v1850_v27  ;;  %v6705_v42 = vcombine.high %v4835_v63, %v4835_v63 }
 0x12b   :  { %v1271_v17 = vrot.slane %v1270_v15, 2  ;;  %v5346_v53 = vmax.f32 %v1251_v36, %v1252_v8  ;;  %v1648_v14 = vsel %vm1588_vm13, %v5306_v23, %v1647_v55  ;;  %v1266_v20 = vrot.slane %v1265_v25, 1 }
 0x12c   :  { %v5343_v3 = vmax.f32 %v1258_v38, %v1259_v29  ;;  %v1275_v24 = vsel %vm1113_vm6, %v6705_v42, -inf  ;;  %1679 = vrot.lane.b32.xlu0 %v1648_v14, %s4295_s27  ;;  %v1287_v61 = vrot.slane %v5200_v28, 1  ;;  %v1649_v36 = vsel %vm1576_vm7, %v5335_v0, %v5325_v49 }
 0x12d   :  { %v1272_v11 = vmax.f32 %v1270_v15, %v1271_v17  ;;  %v1276_v38 = vrot.slane %v1275_v24, 4  ;;  %v1852_v56 = vsel %vm1588_vm13, %v5346_v53, %v1851_v1  ;;  %v963_v26 = vcombine.high %v5030_v41, %v5030_v41 }
 0x12e   :  { %v978_v63 = vcombine.high %v5059_v2, %v5059_v2  ;;  %1883 = vrot.lane.b32.xlu1 %v1852_v56, %s4298_s30  ;;  %v5368_v16 = vmax.f32 %v1265_v25, %v1266_v20  ;;  %v5371_v4 = vmax.f32 %v5200_v28, %v1287_v61  ;;  %v1650_v15 = vsel %vm1578_vm8, %v5346_v53, %v1649_v36 }
 0x12f   :  { %v1273_v29 = vrot.slane %v1272_v11, 1  ;;  %v1277_v51 = vmax.f32 %v1275_v24, %v1276_v38  ;;  %v977_v8 = vrot.slane %v963_v26, %v4441_v48  ;;  %v6707_v27 = vrot.slane %v4944_v43, 2  ;;  %v6709_v38 = vld [vmem:[#allocation16_spill] sm:$0xff] }
 0x130   :  { %6706 = vst [vmem:[#allocation26_spill] sm:$0xff] %v5371_v4  ;;  %v1355_v44 = vrot.slane %v4983_v5, 2  ;;  %v1853_v17 = vsel %vm1576_vm7, %v5368_v16, %v5343_v3  ;;  %v1651_v28 = vsel %vm1580_vm9, %v5343_v3, %v1650_v15  ;;  %v6710_v61 = vrot.slane %v6709_v38, 4 }
 0x131   :  { %v1349_v41 = vmax.f32 %v4944_v43, %v6707_v27  ;;  %v5380_v55 = vmax.f32 %v1272_v11, %v1273_v29  ;;  %v1278_v25 = vrot.slane %v1277_v51, 2  ;;  %v1652_v1 = vsel %vm1582_vm10, %v5368_v16, %v1651_v28  ;;  %v6711_v29 = vld [vmem:[#allocation15_spill] sm:$0xff] }
 0x132   :  { %v979_v14 = vcombine.high %v977_v8, %v977_v8  ;;  %v1356_v24 = vmax.f32 %v4983_v5, %v1355_v44  ;;  %v1361_v56 = vmax.f32 %v6709_v38, %v6710_v61  ;;  %v6712_v15 = vcombine.high %v6711_v29, %v6711_v29 }
 0x133   :  { %6708 = vst [vmem:[#allocation27_spill] sm:$0xff] %v5380_v55  ;;  %v1350_v42 = vrot.slane %v1349_v41, 1  ;;  %v1279_v43 = vmax.f32 %v1277_v51, %v1278_v25  ;;  %v1854_v20 = vsel %vm1578_vm8, %v5380_v55, %v1853_v17  ;;  %v1653_v11 = vsel %vm1584_vm11, %v5380_v55, %v1652_v1 }
 0x134   :  { %v1357_v26 = vrot.slane %v1356_v24, 1  ;;  %v1366_v27 = vsel %vm1113_vm6, %v6712_v15, -inf  ;;  %v1373_v5 = vsel %vm1113_vm6, %v5059_v2, -inf  ;;  %v1362_v44 = vrot.slane %v1361_v56, 2 }
 0x135   :  { %v5397_v36 = vmax.f32 %v1349_v41, %v1350_v42  ;;  %v1280_v51 = vrot.slane %v1279_v43, 1  ;;  %v1367_v25 = vrot.slane %v1366_v27, 4  ;;  %v1374_v17 = vrot.slane %v1373_v5, 4 }
 0x136   :  { %v5405_v28 = vmax.f32 %v1356_v24, %v1357_v26  ;;  %v1380_v1 = vsel %vm1113_vm6, %v978_v63, -inf  ;;  %v1387_v41 = vsel %vm1113_vm6, %v977_v8, -inf  ;;  %v1394_v42 = vsel %vm1113_vm6, %v979_v14, -inf }
 0x137   :  { %v5410_v38 = vmax.f32 %v1279_v43, %v1280_v51  ;;  %v1363_v61 = vmax.f32 %v1361_v56, %v1362_v44  ;;  %v1368_v29 = vmax.f32 %v1366_v27, %v1367_v25  ;;  %v1375_v15 = vmax.f32 %v1373_v5, %v1374_v17 }
 0x138   :  { %v1381_v18 = vrot.slane %v1380_v1, 4  ;;  %v1388_v55 = vrot.slane %v1387_v41, 4  ;;  %v1395_v2 = vrot.slane %v1394_v42, 4  ;;  %v1860_v49 = vsel %vm1576_vm7, %v5405_v28, %v5397_v36 }
 0x139   :  { %6713 = vst [vmem:[#allocation16_spill] sm:$0xff] %v5410_v38  ;;  %v1855_v24 = vsel %vm1580_vm9, %v5410_v38, %v1854_v20  ;;  %v1654_v63 = vsel %vm1586_vm12, %v5410_v38, %v1653_v11  ;;  %v1364_v8 = vrot.slane %v1363_v61, 1  ;;  %v1369_v14 = vrot.slane %v1368_v29, 2 }
 0x13a   :  { %v1856_v43 = vsel %vm1582_vm10, %v5371_v4, %v1855_v24  ;;  %v1655_v56 = vsel %vm1588_vm13, %v5371_v4, %v1654_v63  ;;  %v1376_v26 = vrot.slane %v1375_v15, 2  ;;  %v1382_v27 = vmax.f32 %v1380_v1, %v1381_v18 }
 0x13b   :  { %v1857_v5 = vsel %vm1584_vm11, %v5207_v59, %v1856_v43  ;;  %1681 = vrot.lane.b32.xlu0 %v1655_v56, %s4295_s27  ;;  %v5426_v51 = vmax.f32 %v1363_v61, %v1364_v8  ;;  %v1370_v20 = vmax.f32 %v1368_v29, %v1369_v14  ;;  %v1389_v44 = vmax.f32 %v1387_v41, %v1388_v55  ;;  %v6715_v55 = vld [vmem:[#allocation11_spill] sm:$0xff] }
 0x13c   :  { %v1858_v11 = vsel %vm1586_vm12, %v5209_v10, %v1857_v5  ;;  %v1377_v25 = vmax.f32 %v1375_v15, %v1376_v26  ;;  %v1383_v17 = vrot.slane %v1382_v27, 2  ;;  %v1396_v24 = vmax.f32 %v1394_v42, %v1395_v2  ;;  %v6718_v2 = vld [vmem:[#allocation14_spill] sm:$0xff] }
 0x13d   :  { %6714 = vst [vmem:[#allocation15_spill] sm:$0xff] %v5426_v51  ;;  %v1859_v63 = vsel %vm1588_vm13, %v5213_v57, %v1858_v11  ;;  %v1371_v4 = vrot.slane %v1370_v20, 1  ;;  %v1390_v18 = vrot.slane %v1389_v44, 2  ;;  %v1861_v1 = vsel %vm1578_vm8, %v5426_v51, %v1860_v49 }
 0x13e   :  { %1885 = vrot.lane.b32.xlu1 %v1859_v63, %s4298_s30  ;;  %v1378_v61 = vrot.slane %v1377_v25, 1  ;;  %v1384_v8 = vmax.f32 %v1382_v27, %v1383_v17  ;;  %v1397_v29 = vrot.slane %v1396_v24, 2  ;;  %v6716_v41 = vcombine.high %v6715_v55, %v6715_v55 }
 0x13f   :  { %v5439_v14 = vmax.f32 %v1370_v20, %v1371_v4  ;;  %v1391_v42 = vmax.f32 %v1389_v44, %v1390_v18  ;;  %v944_v57 = vcombine.high %v6718_v2, %v6718_v2  ;;  %v997_v43 = vcombine.high %v5099_v39, %v5099_v39 }
 0x140   :  { %v943_v15 = vrot.slane %v6716_v41, %v4441_v48  ;;  %v5445_v49 = vmax.f32 %v1377_v25, %v1378_v61  ;;  %v1385_v56 = vrot.slane %v1384_v8, 1  ;;  %v1398_v26 = vmax.f32 %v1396_v24, %v1397_v29 }
 0x141   :  { %6717 = vst [vmem:[#allocation11_spill] sm:$0xff] %v5439_v14  ;;  %v1392_v5 = vrot.slane %v1391_v42, 1  ;;  %v1862_v11 = vsel %vm1580_vm9, %v5439_v14, %v1861_v1  ;;  %v1324_v17 = vsel %vm1113_vm6, %v944_v57, -inf  ;;  %v1011_v61 = vrot.slane %v997_v43, %v4441_v48 }
 0x142   :  { %v945_v27 = vcombine.high %v943_v15, %v943_v15  ;;  %v1331_v4 = vsel %vm1113_vm6, %v943_v15, -inf  ;;  %v5451_v20 = vmax.f32 %v1384_v8, %v1385_v56  ;;  %v1399_v44 = vrot.slane %v1398_v26, 1 }
 0x143   :  { %v1863_v63 = vsel %vm1582_vm10, %v5445_v49, %v1862_v11  ;;  %v1325_v39 = vrot.slane %v1324_v17, 4  ;;  %v5455_v25 = vmax.f32 %v1391_v42, %v1392_v5  ;;  %v1332_v18 = vrot.slane %v1331_v4, 4 }
 0x144   :  { %v1338_v24 = vsel %vm1113_vm6, %v945_v27, -inf  ;;  %v5459_v29 = vmax.f32 %v1398_v26, %v1399_v44  ;;  %v1864_v1 = vsel %vm1584_vm11, %v5451_v20, %v1863_v63  ;;  %v1012_v42 = vcombine.high %v5116_v19, %v5116_v19 }
 0x145   :  { %v1326_v55 = vmax.f32 %v1324_v17, %v1325_v39  ;;  %v1339_v8 = vrot.slane %v1338_v24, 4  ;;  %v1865_v41 = vsel %vm1586_vm12, %v5455_v25, %v1864_v1  ;;  %v1333_v15 = vmax.f32 %v1331_v4, %v1332_v18 }
 0x146   :  { %v1013_v57 = vcombine.high %v1011_v61, %v1011_v61  ;;  %v1866_v56 = vsel %vm1588_vm13, %v5459_v29, %v1865_v41  ;;  %v6719_v26 = vrot.slane %v5141_v22, 2  ;;  %v1411_v17 = vrot.slane %v5148_v33, 2 }
 0x147   :  { %v1327_v27 = vrot.slane %v1326_v55, 2  ;;  %v1340_v43 = vmax.f32 %v1338_v24, %v1339_v8  ;;  %1889 = vrot.lane.b32.xlu1 %v1866_v56, %s4298_s30  ;;  %v1334_v11 = vrot.slane %v1333_v15, 2  ;;  %v6720_v4 = vrot.slane %v5136_v46, 4 }
 0x148   :  { %v1405_v5 = vmax.f32 %v5141_v22, %v6719_v26  ;;  %v6721_v63 = vcombine.high %v5123_v6, %v5123_v6  ;;  %v1412_v22 = vmax.f32 %v5148_v33, %v1411_v17  ;;  %v1429_v26 = vsel %vm1113_vm6, %v5116_v19, -inf }
 0x149   :  { %v1417_v44 = vmax.f32 %v5136_v46, %v6720_v4  ;;  %v1328_v18 = vmax.f32 %v1326_v55, %v1327_v27  ;;  %v1341_v24 = vrot.slane %v1340_v43, 2  ;;  %v1335_v41 = vmax.f32 %v1333_v15, %v1334_v11 }
 0x14a   :  { %v1422_v39 = vsel %vm1113_vm6, %v6721_v63, -inf  ;;  %v1406_v1 = vrot.slane %v1405_v5, 1  ;;  %v1413_v6 = vrot.slane %v1412_v22, 1  ;;  %v1430_v63 = vrot.slane %v1429_v26, 4 }
 0x14b   :  { %v1423_v8 = vrot.slane %v1422_v39, 4  ;;  %v1418_v56 = vrot.slane %v1417_v44, 2  ;;  %v1329_v2 = vrot.slane %v1328_v18, 1  ;;  %v1342_v10 = vmax.f32 %v1340_v43, %v1341_v24 }
 0x14c   :  { %v5484_v59 = vmax.f32 %v1405_v5, %v1406_v1  ;;  %v1336_v4 = vrot.slane %v1335_v41, 1  ;;  %v1436_v15 = vsel %vm1113_vm6, %v1012_v42, -inf  ;;  %v5491_v11 = vmax.f32 %v1412_v22, %v1413_v6 }
 0x14d   :  { %v1424_v46 = vmax.f32 %v1422_v39, %v1423_v8  ;;  %v1419_v38 = vmax.f32 %v1417_v44, %v1418_v56  ;;  %v5486_v55 = vmax.f32 %v1328_v18, %v1329_v2  ;;  %v1343_v27 = vrot.slane %v1342_v10, 1 }
 0x14e   :  { %v5489_v33 = vmax.f32 %v1335_v41, %v1336_v4  ;;  %v1431_v17 = vmax.f32 %v1429_v26, %v1430_v63  ;;  %v1437_v39 = vrot.slane %v1436_v15, 4  ;;  %v1443_v24 = vsel %vm1113_vm6, %v1011_v61, -inf }
 0x14f   :  { %6722 = vst [vmem:[#allocation28_spill] sm:$0xff] %v5486_v55  ;;  %v1425_v23 = vrot.slane %v1424_v46, 2  ;;  %v1420_v19 = vrot.slane %v1419_v38, 1  ;;  %v5493_v43 = vmax.f32 %v1342_v10, %v1343_v27  ;;  %v1444_v42 = vrot.slane %v1443_v24, 4 }
 0x150   :  { %v1656_v2 = vsel %vm1576_vm7, %v5489_v33, %v5486_v55  ;;  %v1432_v18 = vrot.slane %v1431_v17, 2  ;;  %v1438_v41 = vmax.f32 %v1436_v15, %v1437_v39  ;;  %v1450_v10 = vsel %vm1113_vm6, %v1013_v57, -inf }
 0x151   :  { %v1426_v5 = vmax.f32 %v1424_v46, %v1425_v23  ;;  %v5499_v44 = vmax.f32 %v1419_v38, %v1420_v19  ;;  %v1657_v1 = vsel %vm1578_vm8, %v5493_v43, %v1656_v2  ;;  %v1445_v61 = vmax.f32 %v1443_v24, %v1444_v42 }
 0x152   :  { %v1658_v23 = vsel %vm1580_vm9, %v5397_v36, %v1657_v1  ;;  %v1433_v22 = vmax.f32 %v1431_v17, %v1432_v18  ;;  %v1451_v56 = vrot.slane %v1450_v10, 4  ;;  %v1439_v46 = vrot.slane %v1438_v41, 2 }
 0x153   :  { %v1427_v8 = vrot.slane %v1426_v5, 1  ;;  %v1659_v26 = vsel %vm1582_vm10, %v5405_v28, %v1658_v23  ;;  %v1867_v4 = vsel %vm1576_vm7, %v5491_v11, %v5484_v59  ;;  %v1446_v63 = vrot.slane %v1445_v61, 2 }
 0x154   :  { %v1660_v6 = vsel %vm1584_vm11, %v5426_v51, %v1659_v26  ;;  %v1434_v57 = vrot.slane %v1433_v22, 1  ;;  %v1452_v27 = vmax.f32 %v1450_v10, %v1451_v56  ;;  %v1440_v19 = vmax.f32 %v1438_v41, %v1439_v46 }
 0x155   :  { %v5508_v38 = vmax.f32 %v1426_v5, %v1427_v8  ;;  %v1661_v15 = vsel %vm1586_vm12, %v5439_v14, %v1660_v6  ;;  %v1868_v17 = vsel %vm1578_vm8, %v5499_v44, %v1867_v4  ;;  %v1663_v5 = vsel %vm1576_vm7, %v5455_v25, %v5451_v20 }
 0x156   :  { %v1662_v39 = vsel %vm1588_vm13, %v5445_v49, %v1661_v15  ;;  %v5524_v24 = vmax.f32 %v1433_v22, %v1434_v57  ;;  %v1447_v2 = vmax.f32 %v1445_v61, %v1446_v63  ;;  %v1453_v18 = vrot.slane %v1452_v27, 2 }
 0x157   :  { %1685 = vrot.lane.b32.xlu0 %v1662_v39, %s4295_s27  ;;  %v1441_v42 = vrot.slane %v1440_v19, 1  ;;  %v1869_v1 = vsel %vm1580_vm9, %v5508_v38, %v1868_v17  ;;  %v1664_v8 = vsel %vm1578_vm8, %v5459_v29, %v1663_v5  ;;  %v1703_v41 = vsel %vm1576_vm7, %v5285_v62, %v5280_v54 }
 0x158   :  { %v1448_v10 = vrot.slane %v1447_v2, 1  ;;  %v1454_v23 = vmax.f32 %v1452_v27, %v1453_v18  ;;  %v1870_v22 = vsel %vm1582_vm10, %v5524_v24, %v1869_v1  ;;  %v1665_v61 = vsel %vm1580_vm9, %v5484_v59, %v1664_v8 }
 0x159   :  { %v5538_v56 = vmax.f32 %v1440_v19, %v1441_v42  ;;  %v1666_v26 = vsel %vm1582_vm10, %v5491_v11, %v1665_v61  ;;  %v1704_v46 = vsel %vm1578_vm8, %v5171_v13, %v1703_v41  ;;  %v5545_v4 = vmax.f32 %v5169_v34, 0.0 }
 0x15a   :  { %v5547_v6 = vmax.f32 %v1447_v2, %v1448_v10  ;;  %v1455_v57 = vrot.slane %v1454_v23, 1  ;;  %v1667_v63 = vsel %vm1584_vm11, %v5499_v44, %v1666_v26  ;;  %v1705_v27 = vsel %vm1580_vm9, %v5191_v21, %v1704_v46 }
 0x15b   :  { %v1871_v15 = vsel %vm1584_vm11, %v5538_v56, %v1870_v22  ;;  %v1668_v19 = vsel %vm1586_vm12, %v5508_v38, %v1667_v63  ;;  %v1706_v17 = vsel %vm1582_vm10, %v5198_v52, %v1705_v27  ;;  %v6723_v34 = vcombine.high %v5176_v12, %v5176_v12 }
 0x15c   :  { %v5563_v39 = vmax.f32 %v1454_v23, %v1455_v57  ;;  %v1872_v2 = vsel %vm1586_vm12, %v5547_v6, %v1871_v15  ;;  %v1669_v18 = vsel %vm1588_vm13, %v5524_v24, %v1668_v19  ;;  %v1707_v42 = vsel %vm1584_vm11, %v5215_v30, %v1706_v17 }
 0x15d   :  { %v1028_v5 = vrot.slane %v6723_v34, %v4441_v48  ;;  %1687 = vrot.lane.b32.xlu0 %v1669_v18, %s4295_s27  ;;  %v1708_v1 = vsel %vm1586_vm12, %v5219_v32, %v1707_v42  ;;  %v1029_v12 = vcombine.high %v5188_v45, %v5188_v45  ;;  %v5578_v41 = vrot.slane %v5545_v4, %v4441_v48 }
 0x15e   :  { %v1873_v10 = vsel %vm1588_vm13, %v5563_v39, %v1872_v2  ;;  %v1709_v23 = vsel %vm1588_vm13, %v5223_v60, %v1708_v1  ;;  %v6724_v22 = vrot.slane %v5195_v35, 4  ;;  %v1771_v2 = vsel %vm1576_vm7, %v5171_v13, %v5285_v62 }
 0x15f   :  { %v1030_v8 = vcombine.high %v1028_v5, %v1028_v5  ;;  %v1471_v26 = vsel %vm1113_vm6, %v1028_v5, -inf  ;;  %1891 = vrot.lane.b32.xlu1 %v1873_v10, %s4298_s30  ;;  %v1464_v45 = vsel %vm1113_vm6, %v1029_v12, -inf  ;;  %v1485_v63 = vsel %vm1113_vm6, %v5578_v41, -inf }
 0x160   :  { %v1459_v61 = vmax.f32 %v5195_v35, %v6724_v22  ;;  %v1472_v46 = vrot.slane %v1471_v26, 4  ;;  %v1465_v15 = vrot.slane %v1464_v45, 4  ;;  %v1486_v17 = vrot.slane %v1485_v63, 4 }
 0x161   :  { %v1478_v57 = vsel %vm1113_vm6, %v1030_v8, -inf  ;;  %v1670_v35 = vsel %vm1576_vm7, %v5547_v6, %v5538_v56  ;;  %v1710_v5 = vsel %vm1576_vm7, %v5248_v7, %v5228_v37  ;;  %vm1932_vm1 = vcmask 261120  }
 0x162   :  { %v1460_v27 = vrot.slane %v1459_v61, 2  ;;  %v1479_v19 = vrot.slane %v1478_v57, 4  ;;  %v1473_v34 = vmax.f32 %v1471_v26, %v1472_v46  ;;  %v1466_v42 = vmax.f32 %v1464_v45, %v1465_v15 }
 0x163   :  { %v1487_v12 = vmax.f32 %v1485_v63, %v1486_v17  ;;  %1745 = vrot.lane.b32.xlu1 %v1709_v23, %s4297_s29  ;;  %v1671_v10 = vsel %vm1578_vm8, %v5563_v39, %v1670_v35  ;;  %v1711_v22 = vsel %vm1578_vm8, %v5270_v58, %v1710_v5  ;;  %v1772_v26 = vsel %vm1578_vm8, %v5191_v21, %v1771_v2 }
 0x164   :  { %v1461_v18 = vmax.f32 %v1459_v61, %v1460_v27  ;;  %v1480_v1 = vmax.f32 %v1478_v57, %v1479_v19  ;;  %v1474_v8 = vrot.slane %v1473_v34, 2  ;;  %v1467_v55 = vrot.slane %v1466_v42, 2 }
 0x165   :  { %v1488_v13 = vrot.slane %v1487_v12, 2  ;;  %v1712_v45 = vsel %vm1580_vm9, %v5276_v31, %v1711_v22  ;;  %v1773_v23 = vsel %vm1580_vm9, %v5198_v52, %v1772_v26  ;;  %v1717_v57 = vsel %vm1576_vm7, %v5346_v53, %v5335_v0 }
 0x166   :  { %v1462_v46 = vrot.slane %v1461_v18, 1  ;;  %v1481_v54 = vrot.slane %v1480_v1, 2  ;;  %v1475_v61 = vmax.f32 %v1473_v34, %v1474_v8  ;;  %v1468_v27 = vmax.f32 %v1466_v42, %v1467_v55 }
 0x167   :  { %v1489_v19 = vmax.f32 %v1487_v12, %v1488_v13  ;;  %v1713_v35 = vsel %vm1582_vm10, %v5282_v40, %v1712_v45  ;;  %v1774_v34 = vsel %vm1582_vm10, %v5215_v30, %v1773_v23  ;;  %v1718_v5 = vsel %vm1578_vm8, %v5343_v3, %v1717_v57  ;;  %v6727_v23 = vld [vmem:[#allocation25_spill] sm:$0xff] }
 0x168   :  { %v5616_v63 = vmax.f32 %v1461_v18, %v1462_v46  ;;  %v1482_v15 = vmax.f32 %v1480_v1, %v1481_v54  ;;  %v1476_v17 = vrot.slane %v1475_v61, 1  ;;  %v1469_v2 = vrot.slane %v1468_v27, 1 }
 0x169   :  { %v1490_v22 = vrot.slane %v1489_v19, 1  ;;  %v1714_v13 = vsel %vm1584_vm11, %v5298_v50, %v1713_v35  ;;  %v1775_v54 = vsel %vm1584_vm11, %v5219_v32, %v1774_v34  ;;  %v1719_v55 = vsel %vm1580_vm9, %v5368_v16, %v1718_v5 }
 0x16a   :  { %v1483_v8 = vrot.slane %v1482_v15, 1  ;;  %v1672_v18 = vsel %vm1580_vm9, %v5616_v63, %v1671_v10  ;;  %v5626_v26 = vmax.f32 %v1475_v61, %v1476_v17  ;;  %v6725_v42 = vrot.slane %v5052_v47, 2  ;;  %v6726_v10 = vld [vmem:[#allocation24_spill] sm:$0xff]  ;;  %v6728_v17 = vld [vmem:[#allocation27_spill] sm:$0xff] }
 0x16b   :  { %v5637_v12 = vmax.f32 %v1468_v27, %v1469_v2  ;;  %v1715_v61 = vsel %vm1586_vm12, %v6726_v10, %v1714_v13  ;;  %v5643_v45 = vmax.f32 %v1489_v19, %v1490_v22  ;;  %v1720_v35 = vsel %vm1582_vm10, %v6728_v17, %v1719_v55  ;;  %v6730_v2 = vld [vmem:[#allocation26_spill] sm:$0xff] }
 0x16c   :  { %v352_v1 = vadd.f32 %v6725_v42, %v5076_v9  ;;  %v5639_v46 = vmax.f32 %v1482_v15, %v1483_v8  ;;  %v1716_v57 = vsel %vm1588_vm13, %v6727_v23, %v1715_v61  ;;  %v1778_v47 = vsel %vm1576_vm7, %v5270_v58, %v5248_v7  ;;  %v6729_v15 = vld [vmem:[#allocation16_spill] sm:$0xff] }
 0x16d   :  { %v1673_v9 = vsel %vm1582_vm10, %v5637_v12, %v1672_v18  ;;  %1747 = vrot.lane.b32.xlu1 %v1716_v57, %s4297_s29  ;;  %v1776_v27 = vsel %vm1586_vm12, %v5223_v60, %v1775_v54  ;;  %v1721_v19 = vsel %vm1584_vm11, %v6729_v15, %v1720_v35  ;;  %v1779_v34 = vsel %vm1578_vm8, %v5276_v31, %v1778_v47  ;;  %v6731_v54 = vld [vmem:[#allocation22_spill] sm:$0xff] }
 0x16e   :  { %v1674_v5 = vsel %vm1584_vm11, %v5626_v26, %v1673_v9  ;;  %v1722_v8 = vsel %vm1586_vm12, %v6730_v2, %v1721_v19  ;;  %v1780_v22 = vsel %vm1580_vm9, %v5282_v40, %v1779_v34  ;;  %v1724_v18 = vsel %vm1576_vm7, %v5493_v43, %v5489_v33 }
 0x16f   :  { %v1675_v13 = vsel %vm1586_vm12, %v5639_v46, %v1674_v5  ;;  %v1723_v55 = vsel %vm1588_vm13, %v6731_v54, %v1722_v8  ;;  %v1781_v42 = vsel %vm1582_vm10, %v5298_v50, %v1780_v22  ;;  %v1725_v61 = vsel %vm1578_vm8, %v5397_v36, %v1724_v18 }
 0x170   :  { %v1676_v57 = vsel %vm1588_vm13, %v5643_v45, %v1675_v13  ;;  %v1782_v35 = vsel %vm1584_vm11, %v6726_v10, %v1781_v42  ;;  %v1726_v47 = vsel %vm1580_vm9, %v5405_v28, %v1725_v61  ;;  %v1785_v9 = vsel %vm1576_vm7, %v5343_v3, %v5346_v53 }
 0x171   :  { %1689 = vrot.lane.b32.xlu0 %v1676_v57, %s4295_s27  ;;  %v1777_v19 = vsel %vm1588_vm13, %v5228_v37, %v1776_v27  ;;  %1749 = vrot.lane.b32.xlu1 %v1723_v55, %s4297_s29  ;;  %v1727_v34 = vsel %vm1582_vm10, %v5426_v51, %v1726_v47  ;;  %v1786_v5 = vsel %vm1578_vm8, %v5368_v16, %v1785_v9  ;;  %vm1923_vm2 = vcmask 195584  }
 0x172   :  { %v1783_v8 = vsel %vm1586_vm12, %v6727_v23, %v1782_v35  ;;  %v1728_v22 = vsel %vm1584_vm11, %v5439_v14, %v1727_v34  ;;  %v1787_v18 = vsel %vm1580_vm9, %v6728_v17, %v1786_v5  ;;  %v1792_v27 = vsel %vm1576_vm7, %v5397_v36, %v5493_v43  ;;  %v6732_v34 = vld [vmem:[#allocation17_spill] sm:$0xff] }
 0x173   :  { %v1729_v13 = vsel %vm1586_vm12, %v5445_v49, %v1728_v22  ;;  %v1788_v55 = vsel %vm1582_vm10, %v6729_v15, %v1787_v18  ;;  %v1793_v42 = vsel %vm1578_vm8, %v5405_v28, %v1792_v27  ;;  %v1731_v61 = vsel %vm1576_vm7, %v5459_v29, %v5455_v25 }
 0x174   :  { %v1730_v57 = vsel %vm1588_vm13, %v5451_v20, %v1729_v13  ;;  %v1789_v35 = vsel %vm1584_vm11, %v6730_v2, %v1788_v55  ;;  %v1794_v47 = vsel %vm1580_vm9, %v5426_v51, %v1793_v42  ;;  %v1732_v9 = vsel %vm1578_vm8, %v5484_v59, %v1731_v61 }
 0x175   :  { %v6733_v5 = vrot.slane %v6732_v34, 3  ;;  %1813 = vrot.lane.b32.xlu0 %v1777_v19, %s4296_s28  ;;  %1753 = vrot.lane.b32.xlu1 %v1730_v57, %s4297_s29  ;;  %v1795_v18 = vsel %vm1582_vm10, %v5439_v14, %v1794_v47  ;;  %v1733_v27 = vsel %vm1580_vm9, %v5491_v11, %v1732_v9  ;;  %v1790_v13 = vsel %vm1586_vm12, %v6731_v54, %v1789_v35  ;;  %v6734_v34 = vld [vmem:[#allocation23_spill] sm:$0xff] }
 0x176   :  { %v1796_v55 = vsel %vm1584_vm11, %v5445_v49, %v1795_v18  ;;  %v1734_v42 = vsel %vm1582_vm10, %v5499_v44, %v1733_v27  ;;  %v1784_v19 = vsel %vm1588_vm13, %v5335_v0, %v1783_v8  ;;  %v1046_v54 = vcombine.high %v5578_v41, %v5578_v41 }
 0x177   :  { %v451_v22 = vadd.f32 %v6733_v5, %v352_v1  ;;  %v1799_v1 = vsel %vm1576_vm7, %v5484_v59, %v5459_v29  ;;  %v1797_v61 = vsel %vm1586_vm12, %v5451_v20, %v1796_v55  ;;  %v1735_v47 = vsel %vm1584_vm11, %v5508_v38, %v1734_v42 }
 0x178   :  { %v1800_v57 = vsel %vm1578_vm8, %v5491_v11, %v1799_v1  ;;  %v1798_v35 = vsel %vm1588_vm13, %v5455_v25, %v1797_v61  ;;  %v1738_v8 = vsel %vm1576_vm7, %v5563_v39, %v5547_v6  ;;  %v1791_v5 = vsel %vm1588_vm13, %v6734_v34, %v1790_v13  ;;  %v6736_v61 = vld [vmem:[#allocation10_spill] sm:$0xff] }
 0x179   :  { %v1801_v9 = vsel %vm1580_vm9, %v5499_v44, %v1800_v57  ;;  %1815 = vrot.lane.b32.xlu0 %v1784_v19, %s4296_s28  ;;  %1821 = vrot.lane.b32.xlu1 %v1798_v35, %s4296_s28  ;;  %v1492_v18 = vsel %vm1113_vm6, %v1046_v54, -inf  ;;  %v1739_v27 = vsel %vm1578_vm8, %v5616_v63, %v1738_v8  ;;  %v6735_v19 = vld [vmem:[#allocation12_spill] sm:$0xff]  ;;  %v6737_v13 = vrot.slane %v6736_v61, 5 }
 0x17a   :  { %v1802_v41 = vsel %vm1582_vm10, %v5508_v38, %v1801_v9  ;;  %v1493_v42 = vrot.slane %v1492_v18, 4  ;;  %v1740_v1 = vsel %vm1580_vm9, %v5637_v12, %v1739_v27  ;;  %v1736_v35 = vsel %vm1586_vm12, %v5524_v24, %v1735_v47 }
 0x17b   :  { %v1803_v55 = vsel %vm1584_vm11, %v5524_v24, %v1802_v41  ;;  %v641_v57 = vadd.f32 %v6737_v13, %v6735_v19  ;;  %v1031_v9 = vcombine.high %v5545_v4, %v5545_v4  ;;  %v1806_v8 = vsel %vm1576_vm7, %v5616_v63, %v5563_v39  ;;  %v6738_v19 = vld [vmem:[#allocation13_spill] sm:$0xff]  ;;  %v6740_v13 = vld [vmem:[#allocation18_spill] sm:$0xff] }
 0x17c   :  { %v1804_v54 = vsel %vm1586_vm12, %v5538_v56, %v1803_v55  ;;  %v1494_v41 = vmax.f32 %v1492_v18, %v1493_v42  ;;  %v1741_v27 = vsel %vm1582_vm10, %v5626_v26, %v1740_v1  ;;  %v6739_v61 = vrot.slane %v6738_v19, 6  ;;  %v4270_v18 = vld [vmem:[%s6569_s2] ss:$0 sm:$0xff] }
 0x17d   :  { %v1805_v34 = vsel %vm1588_vm13, %v5547_v6, %v1804_v54  ;;  %v6741_v14 = vrot.slane %v6740_v13, 4  ;;  %1817 = vrot.lane.b32.xlu0 %v1791_v5, %s4296_s28  ;;  %v1045_v4 = vrot.slane %v1031_v9, %v4441_v48  ;;  %v1807_v15 = vsel %vm1578_vm8, %v5637_v12, %v1806_v8 }
 0x17e   :  { %v740_v47 = vadd.f32 %v6739_v61, %v641_v57  ;;  %1823 = vrot.lane.b32.xlu1 %v1805_v34, %s4296_s28  ;;  %v1495_v54 = vrot.slane %v1494_v41, 2  ;;  %v1737_v1 = vsel %vm1588_vm13, %v5538_v56, %v1736_v35  ;;  %v1808_v8 = vsel %vm1580_vm9, %v5626_v26, %v1807_v15  ;;  %v6742_v61 = vld [vmem:[#allocation19_spill] sm:$0xff] }
 0x17f   :  { %v550_v55 = vadd.f32 %v6741_v14, %v451_v22  ;;  %v1742_v14 = vsel %vm1584_vm11, %v5639_v46, %v1741_v27  ;;  %v1499_v22 = vsel %vm1113_vm6, %v1045_v4, -inf  ;;  %v1047_v5 = vcombine.high %v1045_v4, %v1045_v4 }
 0x180   :  { %v762_v42 = vadd.f32 %v4270_v18, %v740_v47  ;;  %v1496_v57 = vmax.f32 %v1494_v41, %v1495_v54  ;;  %v1500_v34 = vrot.slane %v1499_v22, 4  ;;  %v1874_v35 = vsel %vm1576_vm7, %v5637_v12, %v5616_v63 }
 0x181   :  { %1755 = vrot.lane.b32.xlu0 %v1737_v1, %s4297_s29  ;;  %v1506_v19 = vsel %vm1113_vm6, %v1047_v5, -inf  ;;  %v6743_v47 = vrot.slane %v6742_v61, 5  ;;  %v1809_v15 = vsel %vm1582_vm10, %v5639_v46, %v1808_v8  ;;  %v6744_v1 = vld [vmem:[#allocation20_spill] sm:$0xff]  ;;  %vm2580_vm3 = vcmask 326656  }
 0x182   :  { %v778_v9 = vmax.f32 %v762_v42, 0.0  ;;  %v1497_v13 = vrot.slane %v1496_v57, 1  ;;  %v1501_v41 = vmax.f32 %v1499_v22, %v1500_v34  ;;  %v1507_v54 = vrot.slane %v1506_v19, 4 }
 0x183   :  { %v649_v27 = vadd.f32 %v6743_v47, %v550_v55  ;;  %v1743_v42 = vsel %vm1586_vm12, %v5643_v45, %v1742_v14  ;;  %v6745_v5 = vrot.slane %v6744_v1, 6  ;;  %v1810_v14 = vsel %vm1584_vm11, %v5643_v45, %v1809_v15 }
 0x184   :  { %v928_v4 = vrot.slane %v778_v9, %v4441_v48  ;;  %v1498_v51 = vmax.f32 %v1496_v57, %v1497_v13  ;;  %v1502_v17 = vrot.slane %v1501_v41, 2  ;;  %v1508_v61 = vmax.f32 %v1506_v19, %v1507_v54 }
 0x185   :  { %v748_v50 = vadd.f32 %v6745_v5, %v649_v27  ;;  %v1875_v9 = vsel %vm1578_vm8, %v5626_v26, %v1874_v35  ;;  %vm3648_vm4 = vcmask 123904  }
 0x186   :  { %v1310_v2 = vsel %vm1113_vm6, %v928_v4, -inf  ;;  %v1744_v34 = vsel %vm1588_vm13, %v1498_v51, %v1743_v42  ;;  %v1503_v47 = vmax.f32 %v1501_v41, %v1502_v17  ;;  %v1509_v8 = vrot.slane %v1508_v61, 2 }
 0x187   :  { %v1311_v55 = vrot.slane %v1310_v2, 4  ;;  %v770_v22 = vadd.f32 %v4270_v18, %v748_v50  ;;  %1757 = vrot.lane.b32.xlu0 %v1744_v34, %s4297_s29  ;;  %v1876_v19 = vsel %vm1580_vm9, %v5639_v46, %v1875_v9  ;;  %v1811_v54 = vsel %vm1586_vm12, %v1498_v51, %v1810_v14 }
 0x188   :  { %v1504_v13 = vrot.slane %v1503_v47, 1  ;;  %v1510_v35 = vmax.f32 %v1508_v61, %v1509_v8  ;;  %v1877_v41 = vsel %vm1582_vm10, %v5643_v45, %v1876_v19 }
 0x189   :  { %v1312_v27 = vmax.f32 %v1310_v2, %v1311_v55  ;;  %v786_v57 = vmax.f32 %v770_v22, 0.0  ;;  %v1878_v55 = vsel %vm1584_vm11, %v1498_v51, %v1877_v41 }
 0x18a   :  { %v1505_v18 = vmax.f32 %v1503_v47, %v1504_v13  ;;  %v1511_v5 = vrot.slane %v1510_v35, 1  ;;  %v1611_v47 = vsel %vm1576_vm7, %v5451_v20, %v5445_v49  ;;  %v1618_v13 = vsel %vm1576_vm7, %v5538_v56, %v5524_v24 }
 0x18b   :  { %v1313_v4 = vrot.slane %v1312_v27, 2  ;;  %v1054_v50 = vrot.slane %v786_v57, %v4441_v48  ;;  %v1612_v8 = vsel %vm1578_vm8, %v5455_v25, %v1611_v47  ;;  %v1619_v20 = vsel %vm1578_vm8, %v5547_v6, %v1618_v13 }
 0x18c   :  { %v1812_v2 = vsel %vm1588_vm13, %v1505_v18, %v1811_v54  ;;  %v1879_v61 = vsel %vm1586_vm12, %v1505_v18, %v1878_v55  ;;  %v1512_v14 = vmax.f32 %v1510_v35, %v1511_v5  ;;  %v1613_v57 = vsel %vm1580_vm9, %v5459_v29, %v1612_v8  ;;  %v5905_v54 = vpop.permute.xlu1 %1819 }
 0x18d   :  { %v1314_v17 = vmax.f32 %v1312_v27, %v1313_v4  ;;  %v1513_v42 = vsel %vm1113_vm6, %v1054_v50, -inf  ;;  %1825 = vrot.lane.b32.xlu0 %v1812_v2, %s4296_s28  ;;  %v1620_v29 = vsel %vm1580_vm9, %v5563_v39, %v1619_v20  ;;  %v4299_v4 = vmov 0.0   ;;  %v5907_v50 = vpop.permute.xlu0 %1683  ;;  %v6747_v2 = vld [vmem:[#allocation14_spill] sm:$0xff]  ;;  %v6748_v20 = vld [vmem:[#allocation9_spill] sm:$0xff] }
 0x18e   :  { %v1514_v15 = vrot.slane %v1513_v42, 4  ;;  %v1880_v19 = vsel %vm1588_vm13, %v1512_v14, %v1879_v61  ;;  %4203 = vmatprep.subr.mxu0 %v4299_v4  ;;  %4234 = vmatprep.subr.mxu1 %v4299_v4 }
 0x18f   :  { %v1315_v1 = vrot.slane %v1314_v17, 1  ;;  %4213 = vmatprep.mubr.msk.f32.mxu0 %vm4300_vm14, %v4299_v4  ;;  %4225 = vmatprep.mubr.msk.f32.mxu1 %vm4300_vm14, %v4299_v4 }
 0x190   :  { %v1515_v9 = vmax.f32 %v1513_v42, %v1514_v15  ;;  %v1317_v15 = vsel %vm1113_vm6, %v6747_v2, -inf  ;;  %v4301_v2 = vmov 1966171168  }
 0x191   :  { %v1316_v22 = vmax.f32 %v1314_v17, %v1315_v1  ;;  %1691 = vrot.lane.b32.xlu0 %v1498_v51, %s4295_s27  ;;  %v1614_v51 = vsel %vm1582_vm10, %v5484_v59, %v1613_v57  ;;  %v1524_v59 = vld [vmem:[%s6570_s3 + $0x20] sm:$0xff]  ;;  %v5911_v17 = vpop.permute.xlu1 %1881  ;;  %v5913_v42 = vpop.permute.xlu0 %1751  ;;  %v1318_v55 = vrot.slane %v1317_v15, 4  ;;  %s4315_s27 = smov 52  }
 0x192   :  { %v1516_v34 = vrot.slane %v1515_v9, 2  ;;  %v1615_v49 = vsel %vm1584_vm11, %v5491_v11, %v1614_v51  ;;  %v1621_v11 = vsel %vm1582_vm10, %v5616_v63, %v1620_v29  ;;  %4204 = vmatpush3.msra.mxu0 %v1524_v59  ;;  %v1522_v63 = vld [vmem:[%s6570_s3 + $0x10] sm:$0xff]  ;;  %4239 = vmatpush3.msra.mxu1 %v1524_v59  ;;  %v6749_v59 = vld [vmem:[#allocation8_spill] sm:$0xff] }
 0x193   :  { %1887 = vrot.lane.b32.xlu1 %v1316_v22, %s4298_s30  ;;  %v1616_v25 = vsel %vm1586_vm12, %v5499_v44, %v1615_v49  ;;  %v1622_v6 = vsel %vm1584_vm11, %v5637_v12, %v1621_v11  ;;  %v1523_v44 = vld [vmem:[%s6570_s3 + $0x18] sm:$0xff]  ;;  %4205 = vmatprep.subr.mxu0 %v4299_v4  ;;  %v1590_v11 = vsel %vm1576_vm7, %v5223_v60, %v5219_v32  ;;  %v6751_v60 = vld [vmem:[#allocation21_spill] sm:$0xff] }
 0x194   :  { %v1517_v27 = vmax.f32 %v1515_v9, %v1516_v34  ;;  %v5865_v56 = vsel %vm1588_vm13, %v5508_v38, %v1616_v25  ;;  %v1623_v38 = vsel %vm1586_vm12, %v5626_v26, %v1622_v6  ;;  %4206 = vmatpush3.msra.mxu0 %v1523_v44  ;;  %v1521_v26 = vld [vmem:[%s6570_s3 + $0x8] sm:$0xff]  ;;  %4235 = vmatprep.subr.mxu1 %v4299_v4 }
 0x195   :  { %1827 = vrot.lane.b32.xlu0 %v1512_v14, %s4296_s28  ;;  %v5881_v39 = vsel %vm1588_vm13, %v5639_v46, %v1623_v38  ;;  %4207 = vmatprep.subr.mxu0 %v4299_v4  ;;  %v1520_v46 = vld [vmem:[%s6570_s3] sm:$0xff]  ;;  %v1319_v34 = vmax.f32 %v1317_v15, %v1318_v55  ;;  %v1951_v15 = vunpack.c.l.s4 %v4301_v2 }
 0x196   :  { %v1518_v24 = vrot.slane %v1517_v27, 1  ;;  %4208 = vmatpush3.msra.mxu0 %v1522_v63  ;;  %4240 = vmatpush3.msra.mxu1 %v1523_v44  ;;  %v1597_v44 = vsel %vm1576_vm7, %v6727_v23, %v6726_v10 }
 0x197   :  { %1893 = vrot.lane.b32.xlu1 %v1880_v19, %s4298_s30  ;;  %4209 = vmatprep.subr.mxu0 %v4299_v4  ;;  %v1320_v14 = vrot.slane %v1319_v34, 2 }
 0x198   :  { %v1519_v12 = vmax.f32 %v1517_v27, %v1518_v24  ;;  %4210 = vmatpush3.msra.mxu0 %v1521_v26  ;;  %4236 = vmatprep.subr.mxu1 %v4299_v4 }
 0x199   :  { %4211 = vmatprep.subr.mxu0 %v4299_v4  ;;  %4241 = vmatpush3.msra.mxu1 %v1522_v63  ;;  %v1678_v22 = vpop.permute.xlu0 %1677  ;;  %v1321_v13 = vmax.f32 %v1319_v34, %v1320_v14  ;;  %v6750_v63 = vld [vmem:[#allocation28_spill] sm:$0xff] }
 0x19a   :  { %4212 = vmatpush3.msra.mxu0 %v1520_v46  ;;  %4237 = vmatprep.subr.mxu1 %v4299_v4 }
 0x19b   :  { %1759 = vrot.lane.b32.xlu1 %v1505_v18, %s4297_s29  ;;  %4242 = vmatpush3.msra.mxu1 %v1521_v26  ;;  %v6746_v18 = vld [vmem:[#allocation6_spill] sm:$0xff]  ;;  %v1322_v49 = vrot.slane %v1321_v13, 1 }
 0x19c   :  { %4238 = vmatprep.subr.mxu1 %v4299_v4  ;;  %v1114_v35 = vsel %vm1113_vm6, %v6746_v18, -inf  ;;  %vm4121_vm6 = vcmask 97280  }
 0x19d   :  { %4243 = vmatpush3.msra.mxu1 %v1520_v46  ;;  %v1115_v41 = vrot.slane %v1114_v35, 4  ;;  %v1323_v6 = vmax.f32 %v1321_v13, %v1322_v49  ;;  %v1591_v46 = vsel %vm1578_vm8, %v5228_v37, %v1590_v11  ;;  %v6754_v13 = vld [vmem:[#allocation26_spill] sm:$0xff]  ;;  %v6757_v11 = vld [vmem:[#allocation16_spill] sm:$0xff] }
 0x19e   :  { %v1680_v8 = vpop.permute.xlu0 %1679  ;;  %v1592_v23 = vsel %vm1580_vm9, %v5248_v7, %v1591_v46 }
 0x19f   :  { %1895 = vrot.lane.b32.xlu1 %v1519_v12, %s4298_s30  ;;  %v1116_v1 = vmax.f32 %v1114_v35, %v1115_v41  ;;  %v1604_v12 = vsel %vm1576_vm7, %v6750_v63, %v1323_v6  ;;  %v1598_v35 = vsel %vm1578_vm8, %v5335_v0, %v1597_v44  ;;  %v6758_v63 = vld [vmem:[#allocation11_spill] sm:$0xff] }
 0x1a0   :  { %v5917_v5 = vpop.permute.xlu1 %1883  ;;  %v1605_v32 = vsel %vm1578_vm8, %v5489_v33, %v1604_v12  ;;  %v1599_v41 = vsel %vm1580_vm9, %v5346_v53, %v1598_v35  ;;  %v1593_v33 = vsel %vm1582_vm10, %v5270_v58, %v1592_v23 }
 0x1a1   :  { %v1117_v9 = vrot.slane %v1116_v1, 2  ;;  %v1606_v37 = vsel %vm1580_vm9, %v5493_v43, %v1605_v32  ;;  %v1600_v55 = vsel %vm1582_vm10, %v5343_v3, %v1599_v41  ;;  %v1594_v43 = vsel %vm1584_vm11, %v5276_v31, %v1593_v33  ;;  %v6752_v31 = vld [vmem:[#allocation27_spill] sm:$0xff] }
 0x1a2   :  { %v1607_v7 = vsel %vm1582_vm10, %v5397_v36, %v1606_v37 }
 0x1a3   :  { %v1118_v47 = vmax.f32 %v1116_v1, %v1117_v9  ;;  %v1952_v9 = vunpack.c.0.s8 %v1951_v15  ;;  %v1608_v58 = vsel %vm1584_vm11, %v5405_v28, %v1607_v7  ;;  %v1909_v28 = vsel %vm1905_vm15, %v6754_v13, %v5907_v50 }
 0x1a5   :  { %v1119_v27 = vrot.slane %v1118_v47, 1 }
 0x1a7   :  { %v1120_v19 = vmax.f32 %v1118_v47, %v1119_v27 }
 0x1a9   :  { %v1577_v25 = vsel %vm1576_vm7, %v6748_v20, %v1120_v19  ;;  %v6755_v19 = vld [vmem:[#allocation15_spill] sm:$0xff] }
 0x1aa   :  { %v1579_v24 = vsel %vm1578_vm8, %v6749_v59, %v1577_v25  ;;  %v1609_v49 = vsel %vm1586_vm12, %v6755_v19, %v1608_v58  ;;  %v6756_v59 = vld [vmem:[#allocation7_spill] sm:$0xff] }
 0x1ab   :  { %v1581_v26 = vsel %vm1580_vm9, %v5285_v62, %v1579_v24  ;;  %v1610_v12 = vsel %vm1588_vm13, %v6758_v63, %v1609_v49 }
 0x1ac   :  { %v1583_v10 = vsel %vm1582_vm10, %v6751_v60, %v1581_v26 }
 0x1ad   :  { %v1682_v51 = vpop.permute.xlu0 %1681  ;;  %v1585_v0 = vsel %vm1584_vm11, %v5191_v21, %v1583_v10  ;;  %v1601_v21 = vsel %vm1584_vm11, %v5368_v16, %v1600_v55  ;;  %v6753_v16 = vld [vmem:[#allocation5_spill] sm:$0xff] }
 0x1ae   :  { %v1587_v53 = vsel %vm1586_vm12, %v5198_v52, %v1585_v0  ;;  %v1595_v52 = vsel %vm1586_vm12, %v5282_v40, %v1594_v43  ;;  %v1602_v14 = vsel %vm1586_vm12, %v6752_v31, %v1601_v21  ;;  %v5977_v27 = vsub.s32 %v1952_v9, %v6753_v16 }
 0x1af   :  { %v1589_v3 = vsel %vm1588_vm13, %v5215_v30, %v1587_v53  ;;  %v1596_v24 = vsel %vm1588_vm13, %v6756_v59, %v1595_v52  ;;  %v1603_v6 = vsel %vm1588_vm13, %v6757_v11, %v1602_v14 }
 0x1b0   :  { %v5919_v61 = vpop.permute.xlu1 %1885  ;;  %v1906_v36 = vsel %vm1905_vm15, %v1589_v3, %v1678_v22  ;;  %v1918_v22 = vsel %vm1914_vm0, %v1909_v28, %v5913_v42  ;;  %v1907_v44 = vsel %vm1905_vm15, %v1596_v24, %v1680_v8  ;;  %v1908_v42 = vsel %vm1905_vm15, %v1603_v6, %v1682_v51 }
 0x1b1   :  { %v6003_v10 = vsel %vm1923_vm2, %v1918_v22, %v5905_v54 }
 0x1b9   :  { %v5921_v57 = vpop.permute.xlu1 %1889 }
 0x1c9   :  { %v1686_v38 = vpop.permute.xlu0 %1685 }
 0x1cf   :  { %v1688_v62 = vpop.permute.xlu0 %1687 }
 0x1d0   :  { %v6010_v51 = vsel %vm1905_vm15, %v5865_v56, %v1688_v62 }
 0x1d1   :  { %v5925_v29 = vpop.permute.xlu1 %1891 }
 0x1d5   :  { %v1746_v18 = vpop.permute.xlu1 %1745 }
 0x1d6   :  { %v1915_v30 = vsel %vm1914_vm0, %v1906_v36, %v1746_v18  ;;  %v1910_v18 = vsel %vm1905_vm15, %v1610_v12, %v1686_v38 }
 0x1df   :  { %v1748_v1 = vpop.permute.xlu1 %1747 }
 0x1e0   :  { %v1916_v35 = vsel %vm1914_vm0, %v1907_v44, %v1748_v1 }
 0x1e3   :  { %v1690_v34 = vpop.permute.xlu0 %1689  ;;  %v1750_v47 = vpop.permute.xlu1 %1749 }
 0x1e4   :  { %v6014_v38 = vsel %vm1905_vm15, %v5881_v39, %v1690_v34  ;;  %v1917_v56 = vsel %vm1914_vm0, %v1908_v42, %v1750_v47 }
 0x1e7   :  { %v1814_v40 = vpop.permute.xlu0 %1813  ;;  %v1754_v20 = vpop.permute.xlu1 %1753 }
 0x1e8   :  { %v1924_v25 = vsel %vm1923_vm2, %v1915_v30, %v1814_v40  ;;  %v1919_v41 = vsel %vm1914_vm0, %v1910_v18, %v1754_v20 }
 0x1e9   :  { %v1933_v50 = vsel %vm1932_vm1, %v1924_v25, %v5911_v17 }
 0x1ea   :  { %v1949_v26 = vcombine.high %v1933_v50, %v1933_v50  ;;  %v1956_v46 = vrot.slane %v1933_v50, %v5977_v27 }
 0x1eb   :  { %v1816_v32 = vpop.permute.xlu0 %1815  ;;  %v1822_v60 = vpop.permute.xlu1 %1821 }
 0x1ec   :  { %v1963_v17 = vrot.slane %v1949_v26, %v5977_v27  ;;  %v1964_v8 = vcombine.high %v1956_v46, %v1956_v46  ;;  %v1925_v23 = vsel %vm1923_vm2, %v1916_v35, %v1816_v32  ;;  %v1928_v54 = vsel %vm1923_vm2, %v1919_v41, %v1822_v60 }
 0x1ed   :  { %v1934_v37 = vsel %vm1932_vm1, %v1925_v23, %v5917_v5  ;;  %v1972_v15 = vrot.slane %v1956_v46, %v5977_v27  ;;  %v1937_v39 = vsel %vm1932_vm1, %v1928_v54, %v5921_v57 }
 0x1ee   :  { %v1965_v2 = vcombine.high %v1963_v17, %v1963_v17  ;;  %v1986_v0 = vrot.slane %v1964_v8, %v5977_v27  ;;  %v1998_v33 = vcombine.high %v1934_v37, %v1934_v37  ;;  %v1979_v1 = vrot.slane %v1963_v17, %v5977_v27 }
 0x1ef   :  { %v2005_v62 = vrot.slane %v1934_v37, %v5977_v27  ;;  %v1818_v55 = vpop.permute.xlu0 %1817  ;;  %v2110_v58 = vcombine.high %v1937_v39, %v1937_v39  ;;  %v2117_v59 = vrot.slane %v1937_v39, %v5977_v27 }
 0x1f0   :  { %v1993_v5 = vrot.slane %v1965_v2, %v5977_v27  ;;  %v2271_v7 = vcombine.low %v1972_v15, %v1986_v0  ;;  %v4177_v53 = vcombine.high %v1972_v15, %v1986_v0  ;;  %v2012_v43 = vrot.slane %v1998_v33, %v5977_v27  ;;  %v1824_v2 = vpop.permute.xlu1 %1823 }
 0x1f1   :  { %v2013_v9 = vcombine.high %v2005_v62, %v2005_v62  ;;  %v2021_v21 = vrot.slane %v2005_v62, %v5977_v27  ;;  %v1926_v34 = vsel %vm1923_vm2, %v1917_v56, %v1818_v55  ;;  %v2124_v6 = vrot.slane %v2110_v58, %v5977_v27 }
 0x1f2   :  { %v2273_v3 = vcombine.low %v1979_v1, %v1993_v5  ;;  %v4178_v47 = vcombine.high %v1979_v1, %v1993_v5  ;;  %v6031_v52 = vrot.slane %v2271_v7, %v5977_v27  ;;  %v6034_v36 = vrot.slane %v4177_v53, %v5977_v27 }
 0x1f3   :  { %v2014_v57 = vcombine.high %v2012_v43, %v2012_v43  ;;  %v2028_v31 = vrot.slane %v2012_v43, %v5977_v27  ;;  %v2035_v14 = vrot.slane %v2013_v9, %v5977_v27  ;;  %v1935_v13 = vsel %vm1932_vm1, %v1926_v34, %v5919_v61  ;;  %v1756_v28 = vpop.permute.xlu0 %1755 }
 0x1f4   :  { %v6041_v19 = vrot.slane %v2273_v3, %v5977_v27  ;;  %v2302_v49 = vrot.slane %v4178_v47, %v5977_v27  ;;  %v2047_v30 = vcombine.high %v1935_v13, %v1935_v13  ;;  %v2054_v40 = vrot.slane %v1935_v13, %v5977_v27 }
 0x1f5   :  { %v2042_v20 = vrot.slane %v2014_v57, %v5977_v27  ;;  %v2320_v22 = vcombine.low %v2021_v21, %v2035_v14  ;;  %v4179_v25 = vcombine.high %v2021_v21, %v2035_v14  ;;  %v2125_v18 = vcombine.high %v2117_v59, %v2117_v59 }
 0x1f6   :  { %v2061_v24 = vrot.slane %v2047_v30, %v5977_v27  ;;  %v2062_v11 = vcombine.high %v2054_v40, %v2054_v40  ;;  %v2070_v61 = vrot.slane %v2054_v40, %v5977_v27  ;;  %v2126_v60 = vcombine.high %v2124_v6, %v2124_v6 }
 0x1f7   :  { %v2322_v50 = vcombine.low %v2028_v31, %v2042_v20  ;;  %v4180_v44 = vcombine.high %v2028_v31, %v2042_v20  ;;  %v6051_v63 = vrot.slane %v2320_v22, %v5977_v27  ;;  %v6054_v12 = vrot.slane %v4179_v25, %v5977_v27 }
 0x1f8   :  { %v2063_v26 = vcombine.high %v2061_v24, %v2061_v24  ;;  %v2077_v46 = vrot.slane %v2061_v24, %v5977_v27  ;;  %v2084_v42 = vrot.slane %v2062_v11, %v5977_v27  ;;  %v6065_v17 = vrot.slane %v2117_v59, %v5977_v27 }
 0x1f9   :  { %v6059_v35 = vrot.slane %v2322_v50, %v5977_v27  ;;  %v6062_v32 = vrot.slane %v4180_v44, %v5977_v27  ;;  %v1758_v8 = vpop.permute.xlu0 %1757  ;;  %v2140_v54 = vrot.slane %v2124_v6, %v5977_v27  ;;  %v2147_v15 = vrot.slane %v2125_v18, %v5977_v27 }
 0x1fa   :  { %v2091_v23 = vrot.slane %v2063_v26, %v5977_v27  ;;  %v2369_v41 = vcombine.low %v2070_v61, %v2084_v42  ;;  %v4181_v37 = vcombine.high %v2070_v61, %v2084_v42  ;;  %v2154_v0 = vrot.slane %v2126_v60, %v5977_v27 }
 0x1fb   :  { %v2155_v33 = vcombine.high %v6065_v17, %v6065_v17  ;;  %v1920_v1 = vsel %vm1914_vm0, %v6010_v51, %v1756_v28  ;;  %v2156_v5 = vcombine.high %v2140_v54, %v2140_v54  ;;  %v2157_v7 = vcombine.high %v2147_v15, %v2147_v15 }
 0x1fc   :  { %v2371_v56 = vcombine.low %v2077_v46, %v2091_v23  ;;  %v4182_v62 = vcombine.high %v2077_v46, %v2091_v23  ;;  %v6076_v55 = vrot.slane %v2369_v41, %v5977_v27  ;;  %v2386_v39 = vrot.slane %v4181_v37, %v5977_v27 }
 0x1fd   :  { %v6079_v53 = vcombine.low %v2147_v15, %v2155_v33  ;;  %v1929_v43 = vsel %vm1923_vm2, %v1920_v1, %v1824_v2  ;;  %v2158_v34 = vcombine.high %v2154_v0, %v2154_v0  ;;  %v6090_v58 = vcombine.low %v2157_v7, %v2140_v54 }
 0x1fe   :  { %v6083_v9 = vrot.slane %v2371_v56, %v5977_v27  ;;  %v6086_v21 = vrot.slane %v4182_v62, %v5977_v27  ;;  %v1938_v51 = vsel %vm1932_vm1, %v1929_v43, %v5925_v29  ;;  %v6092_v3 = vcombine.low %v2154_v0, %v2156_v5 }
 0x1ff   :  { %v2159_v47 = vcombine.high %v1938_v51, %v1938_v51  ;;  %v2166_v57 = vrot.slane %v1938_v51, %v5977_v27  ;;  %v1826_v31 = vpop.permute.xlu0 %1825  ;;  %v1921_v14 = vsel %vm1914_vm0, %v6014_v38, %v1758_v8  ;;  %v2435_v13 = vrot.slane %v6079_v53, %v5977_v27 }
 0x200   :  { %v2303_v28 = vcombine.low %v6031_v52, %v6034_v36  ;;  %v2304_v29 = vcombine.low %v6041_v19, %v2302_v49  ;;  %v2442_v30 = vrot.slane %v6090_v58, %v5977_v27  ;;  %v1930_v25 = vsel %vm1923_vm2, %v1921_v14, %v1826_v31 }
 0x201   :  { %v2173_v40 = vrot.slane %v2159_v47, %v5977_v27  ;;  %v2174_v20 = vcombine.high %v2166_v57, %v2166_v57  ;;  %v2182_v22 = vrot.slane %v2166_v57, %v5977_v27  ;;  %v2352_v24 = vcombine.low %v6051_v63, %v6054_v12 }
 0x202   :  { %v2311_v38 = vrot.slane %v2303_v28, %v5977_v27  ;;  %v2318_v59 = vrot.slane %v2304_v29, %v5977_v27  ;;  %v2353_v8 = vcombine.low %v6059_v35, %v6062_v32  ;;  %v2401_v54 = vcombine.low %v6076_v55, %v2386_v39 }
 0x203   :  { %v2175_v52 = vcombine.high %v2173_v40, %v2173_v40  ;;  %v2189_v36 = vrot.slane %v2173_v40, %v5977_v27  ;;  %v2196_v19 = vrot.slane %v2174_v20, %v5977_v27  ;;  %v2204_v49 = vcombine.high %v2182_v22, %v2182_v22  ;;  %v1692_v61 = vpop.permute.xlu0 %1691 }
 0x204   :  { %v6113_v6 = vcombine.low %v2158_v34, %v2182_v22  ;;  %v2319_v44 = vcombine.low %v2311_v38, %v2318_v59  ;;  %v1913_v26 = vsel %vm1905_vm15, %v5643_v45, %v1692_v61  ;;  %v2367_v33 = vrot.slane %v2353_v8, %v5977_v27 }
 0x205   :  { %v1888_v11 = vpop.permute.xlu1 %1887  ;;  %v2205_v46 = vcombine.high %v2189_v36, %v2189_v36  ;;  %v2206_v42 = vcombine.high %v2196_v19, %v2196_v19  ;;  %v2468_v63 = vcombine.low %v2196_v19, %v2204_v49  ;;  %v2203_v60 = vrot.slane %v2175_v52, %v5977_v27 }
 0x206   :  { %v1936_v50 = vsel %vm1932_vm1, %v6003_v10, %v1888_v11  ;;  %v2477_v18 = vrot.slane %v6113_v6, %v5977_v27  ;;  %4214 = vmatmul.mubr.msk.f32.vlgmr.msra.gmra.mxu0 %vm2580_vm3, %v2319_v44  ;;  %v2360_v10 = vrot.slane %v2352_v24, %v5977_v27  ;;  %v2402_v5 = vcombine.low %v6083_v9, %v6086_v21 }
 0x207   :  { %v2102_v12 = vrot.slane %v1936_v50, %v5977_v27  ;;  %v2469_v23 = vcombine.low %v2206_v42, %v2189_v36  ;;  %v2484_v45 = vrot.slane %v2468_v63, %v5977_v27  ;;  %4216 = vmatprep.mubr.msk.f32.mxu0 %vm4300_vm14, %v4299_v4  ;;  %v2207_v15 = vcombine.high %v2203_v60, %v2203_v60  ;;  %v1828_v34 = vpop.permute.xlu0 %1827 }
 0x208   :  { %v2470_v0 = vcombine.low %v2203_v60, %v2205_v46  ;;  %v2368_v62 = vcombine.low %v2360_v10, %v2367_v33  ;;  %v2409_v7 = vrot.slane %v2401_v54, %v5977_v27  ;;  %v2449_v55 = vrot.slane %v6092_v3, %v5977_v27 }
 0x209   :  { %v2109_v41 = vrot.slane %v2102_v12, %v5977_v27  ;;  %v1894_v37 = vpop.permute.xlu1 %1893  ;;  %v2491_v35 = vrot.slane %v2469_v23, %v5977_v27  ;;  %v2416_v9 = vrot.slane %v2402_v5, %v5977_v27  ;;  %v2499_v50 = vcombine.low %v2477_v18, %v2484_v45 }
 0x20a   :  { %v1939_v2 = vsel %vm1932_vm1, %v1930_v25, %v1894_v37  ;;  %4217 = vmatmul.mubr.msk.f32.gmra.mxu0 %vm2580_vm3, %v2368_v62  ;;  %v2451_v21 = vcombine.low %v2442_v30, %v2449_v55  ;;  %v2498_v47 = vrot.slane %v2470_v0, %v5977_v27  ;;  %vm4143_vm15 = vcmask 228352  }
 0x20b   :  { %v2418_v32 = vcombine.low %v2109_v41, %v6065_v17  ;;  %v2208_v1 = vcombine.high %v1939_v2, %v1939_v2  ;;  %v2215_v56 = vrot.slane %v1939_v2, %v5977_v27  ;;  %4219 = vmatprep.mubr.msk.f32.mxu0 %vm4300_vm14, %v4299_v4  ;;  %v2417_v20 = vcombine.low %v2409_v7, %v2416_v9 }
 0x20c   :  { %v2465_v52 = vrot.slane %v2451_v21, %v5977_v27  ;;  %v2500_v44 = vcombine.low %v2491_v35, %v2498_v47  ;;  %v2507_v60 = vrot.slane %v2499_v50, %v5977_v27 }
 0x20d   :  { %v2428_v39 = vrot.slane %v2418_v32, %v5977_v27  ;;  %v2222_v53 = vrot.slane %v2208_v1, %v5977_v27  ;;  %v2223_v43 = vcombine.high %v2215_v56, %v2215_v56  ;;  %v2231_v51 = vrot.slane %v2215_v56, %v5977_v27  ;;  %v1760_v17 = vpop.permute.xlu1 %1759 }
 0x20e   :  { %v1922_v58 = vsel %vm1914_vm0, %v1913_v26, %v1760_v17  ;;  %4220 = vmatmul.mubr.msk.f32.gmra.mxu0 %vm2580_vm3, %v2417_v20  ;;  %v2514_v8 = vrot.slane %v2500_v44, %v5977_v27 }
 0x20f   :  { %v2450_v57 = vcombine.low %v2428_v39, %v2435_v13  ;;  %v2224_v3 = vcombine.high %v2222_v53, %v2222_v53  ;;  %v2238_v31 = vrot.slane %v2222_v53, %v5977_v27  ;;  %v2245_v14 = vrot.slane %v2223_v43, %v5977_v27  ;;  %4222 = vmatprep.mubr.msk.f32.mxu0 %vm4300_vm14, %v4299_v4 }
 0x210   :  { %v2253_v28 = vcombine.high %v2231_v51, %v2231_v51  ;;  %v2516_v29 = vcombine.low %v2207_v15, %v2231_v51  ;;  %v1931_v40 = vsel %vm1923_vm2, %v1922_v58, %v1828_v34  ;;  %v2515_v41 = vcombine.low %v2507_v60, %v2514_v8  ;;  %v4190_v15 = vld [vmem:[%s6571_s4] ss:$0 sm:$0xff]  ;;  %s4303_s4 = smov 12  }
 0x211   :  { %v2252_v22 = vrot.slane %v2224_v3, %v5977_v27  ;;  %v2254_v25 = vcombine.high %v2238_v31, %v2238_v31  ;;  %v2255_v30 = vcombine.high %v2245_v14, %v2245_v14  ;;  %v1896_v38 = vpop.permute.xlu1 %1895  ;;  %v2458_v13 = vrot.slane %v2450_v57, %v5977_v27 }
 0x212   :  { %v2517_v59 = vcombine.low %v2245_v14, %v2253_v28  ;;  %v1940_v24 = vsel %vm1932_vm1, %v1931_v40, %v1896_v38  ;;  %v2526_v49 = vrot.slane %v2516_v29, %v5977_v27  ;;  %4226 = vmatmul.mubr.msk.f32.vlgmr.msra.gmra.mxu1 %vm2580_vm3, %v2515_v41  ;;  %v3063_v0 = vcombine.high %v4190_v15, %v4190_v15 }
 0x213   :  { %v2518_v36 = vcombine.low %v2255_v30, %v2238_v31  ;;  %v2519_v19 = vcombine.low %v2252_v22, %v2254_v25  ;;  %v2263_v11 = vrot.slane %v1940_v24, %v5977_v27  ;;  %v2466_v6 = vcombine.low %v2458_v13, %v2465_v52  ;;  %4228 = vmatprep.mubr.msk.f32.mxu1 %vm4300_vm14, %v4299_v4 }
 0x214   :  { %v2533_v61 = vrot.slane %v2517_v59, %v5977_v27  ;;  %v2256_v12 = vcombine.high %v2252_v22, %v2252_v22  ;;  %v3070_v33 = vrot.slane %v4190_v15, %v5977_v27  ;;  %v3077_v35 = vrot.slane %v3063_v0, %v5977_v27 }
 0x215   :  { %v2540_v26 = vrot.slane %v2518_v36, %v5977_v27  ;;  %v2547_v46 = vrot.slane %v2519_v19, %v5977_v27  ;;  %v2270_v42 = vrot.slane %v2263_v11, %v5977_v27  ;;  %4223 = vmatmul.mubr.msk.f32.gmra.mxu0 %vm2580_vm3, %v2466_v6  ;;  %vm4138_vm1 = vcmask 982016  }
 0x216   :  { %v2548_v63 = vcombine.low %v2526_v49, %v2533_v61  ;;  %v3078_v32 = vcombine.high %v3070_v33, %v3070_v33  ;;  %v3079_v1 = vcombine.high %v3077_v35, %v3077_v35  ;;  %v6187_v62 = vrot.slane %v3070_v33, %v5977_v27 }
 0x217   :  { %v2549_v10 = vcombine.low %v2540_v26, %v2547_v46  ;;  %v2565_v23 = vcombine.low %v2256_v12, %v2270_v42  ;;  %v6190_v5 = vrot.slane %v3077_v35, %v5977_v27 }
 0x218   :  { %v2556_v18 = vrot.slane %v2548_v63, %v5977_v27  ;;  %v6193_v7 = vrot.slane %v3078_v32, %v5977_v27  ;;  %v6197_v53 = vrot.slane %v3079_v1, %v5977_v27  ;;  %v6203_v58 = vcombine.high %v6187_v62, %v6187_v62 }
 0x219   :  { %v2563_v45 = vrot.slane %v2549_v10, %v5977_v27  ;;  %v2572_v54 = vrot.slane %v2565_v23, %v5977_v27  ;;  %v6207_v9 = vcombine.high %v6190_v5, %v6190_v5 }
 0x21a   :  { %v6211_v21 = vcombine.high %v6193_v7, %v6193_v7  ;;  %v6217_v14 = vcombine.high %v6197_v53, %v6197_v53 }
 0x21b   :  { %v2564_v37 = vcombine.low %v2556_v18, %v2563_v45  ;;  %v2579_v2 = vrot.slane %v2572_v54, %v5977_v27 }
 0x21d   :  { %4229 = vmatmul.mubr.msk.f32.gmra.mxu1 %vm2580_vm3, %v2564_v37 }
 0x21e   :  { %4231 = vmatprep.mubr.msk.f32.mxu1 %vm4300_vm14, %v4299_v4  ;;  %vm4136_vm14 = vcmask 883712  }
 0x221   :  { %4232 = vmatmul.mubr.msk.f32.gmra.mxu1 %vm2580_vm3, %v2579_v2 }
 0x2c6   :  { %v2661_v56 = vpop.f32.mrf.mxu0 }
 0x2c7   :  { %v2702_v55 = vcombine.high %v2661_v56, %v2661_v56  ;;  %v2709_v39 = vrot.slane %v2661_v56, %v5977_v27 }
 0x2c8   :  { %v4215_v43 = vpop.f32.mrf.mxu0 }
 0x2c9   :  { %v2716_v51 = vrot.slane %v2702_v55, %v5977_v27  ;;  %v2717_v17 = vcombine.high %v2709_v39, %v2709_v39  ;;  %v2725_v34 = vrot.slane %v2709_v39, %v5977_v27 }
 0x2ca   :  { %v2666_v29 = vpop.f32.mrf.mxu0 }
 0x2cb   :  { %v2718_v47 = vcombine.high %v2716_v51, %v2716_v51  ;;  %v2732_v57 = vrot.slane %v2716_v51, %v5977_v27  ;;  %v2739_v3 = vrot.slane %v2717_v17, %v5977_v27  ;;  %v2747_v31 = vcombine.high %v2725_v34, %v2725_v34 }
 0x2cc   :  { %v3120_v28 = vadd.f32 %v6187_v62, %v2725_v34  ;;  %v2751_v13 = vcombine.high %v2666_v29, %v2666_v29  ;;  %v4218_v59 = vpop.f32.mrf.mxu0  ;;  %v2758_v6 = vrot.slane %v2666_v29, %v5977_v27 }
 0x2cd   :  { %v2746_v40 = vrot.slane %v2718_v47, %v5977_v27  ;;  %v2748_v20 = vcombine.high %v2732_v57, %v2732_v57  ;;  %v2749_v22 = vcombine.high %v2739_v3, %v2739_v3  ;;  %v3121_v25 = vadd.f32 %v6193_v7, %v2739_v3 }
 0x2ce   :  { %v3122_v30 = vadd.f32 %v6203_v58, %v2747_v31  ;;  %v3124_v38 = vadd.f32 %v6190_v5, %v2732_v57  ;;  %v3168_v49 = vmax.f32 %v3120_v28, 0.0  ;;  %v6228_v50 = vpop.f32.mrf.mxu0  ;;  %v2765_v12 = vrot.slane %v2751_v13, %v5977_v27 }
 0x2cf   :  { %v2750_v24 = vcombine.high %v2746_v40, %v2746_v40  ;;  %v3123_v52 = vadd.f32 %v6211_v21, %v2749_v22  ;;  %v3125_v36 = vadd.f32 %v6197_v53, %v2746_v40  ;;  %v3126_v19 = vadd.f32 %v6207_v9, %v2748_v20 }
 0x2d0   :  { %v3169_v11 = vmax.f32 %v3121_v25, 0.0  ;;  %v3170_v61 = vmax.f32 %v3122_v30, 0.0  ;;  %v3172_v46 = vmax.f32 %v3124_v38, 0.0  ;;  %v2766_v60 = vcombine.high %v2758_v6, %v2758_v6  ;;  %v4221_v10 = vpop.f32.mrf.mxu0 }
 0x2d1   :  { %v3127_v44 = vadd.f32 %v6217_v14, %v2750_v24  ;;  %v3171_v26 = vmax.f32 %v3123_v52, 0.0  ;;  %v3173_v42 = vmax.f32 %v3125_v36, 0.0  ;;  %v2774_v8 = vrot.slane %v2758_v6, %v5977_v27 }
 0x2d2   :  { %v3264_v63 = vcombine.low %v3168_v49, %v3169_v11  ;;  %v3174_v23 = vmax.f32 %v3126_v19, 0.0  ;;  %v2767_v54 = vcombine.high %v2765_v12, %v2765_v12  ;;  %v2781_v2 = vrot.slane %v2765_v12, %v5977_v27  ;;  %v6249_v40 = vpop.f32.mrf.mxu1 }
 0x2d3   :  { %v3175_v41 = vmax.f32 %v3127_v44, 0.0  ;;  %v3279_v18 = vcombine.low %v3170_v61, %v3171_v26  ;;  %v3294_v45 = vcombine.low %v3172_v46, %v3173_v42  ;;  %v2788_v15 = vrot.slane %v2766_v60, %v5977_v27 }
 0x2d4   :  { %v3271_v37 = vrot.slane %v3264_v63, %v5977_v27  ;;  %v2796_v1 = vcombine.high %v2774_v8, %v2774_v8  ;;  %v2795_v55 = vrot.slane %v2767_v54, %v5977_v27  ;;  %v2797_v39 = vcombine.high %v2781_v2, %v2781_v2  ;;  %v4227_v52 = vpop.f32.mrf.mxu1 }
 0x2d5   :  { %v6236_v0 = vpop.f32.mrf.mxu0  ;;  %v3286_v33 = vrot.slane %v3279_v18, %v5977_v27  ;;  %v3301_v35 = vrot.slane %v3294_v45, %v5977_v27  ;;  %v3309_v32 = vcombine.low %v3174_v23, %v3175_v41  ;;  %v2798_v43 = vcombine.high %v2788_v15, %v2788_v15 }
 0x2d6   :  { %v3278_v56 = vrot.slane %v3271_v37, %v5977_v27  ;;  %v3128_v57 = vadd.f32 %v6187_v62, %v2774_v8  ;;  %v2799_v31 = vcombine.high %v2795_v55, %v2795_v55  ;;  %v3129_v28 = vadd.f32 %v6193_v7, %v2788_v15 }
 0x2d7   :  { %v4224_v51 = vpop.f32.mrf.mxu0  ;;  %v3293_v17 = vrot.slane %v3286_v33, %v5977_v27  ;;  %v3308_v34 = vrot.slane %v3301_v35, %v5977_v27  ;;  %v3316_v47 = vrot.slane %v3309_v32, %v5977_v27  ;;  %v3130_v29 = vadd.f32 %v6203_v58, %v2796_v1 }
 0x2d8   :  { %v3649_v3 = vsel %vm3648_vm4, %v3278_v56, -inf  ;;  %v3131_v59 = vadd.f32 %v6211_v21, %v2798_v43  ;;  %v3132_v24 = vadd.f32 %v6190_v5, %v2781_v2  ;;  %v3133_v19 = vadd.f32 %v6197_v53, %v2795_v55 }
 0x2d9   :  { %v3323_v20 = vrot.slane %v3316_v47, %v5977_v27  ;;  %v3650_v22 = vrot.slane %v3649_v3, 4  ;;  %v3656_v25 = vsel %vm3648_vm4, %v3293_v17, -inf  ;;  %v3663_v30 = vsel %vm3648_vm4, %v3308_v34, -inf }
 0x2da   :  { %v3657_v38 = vrot.slane %v3656_v25, 4  ;;  %v3664_v13 = vrot.slane %v3663_v30, 4  ;;  %v3134_v49 = vadd.f32 %v6207_v9, %v2797_v39  ;;  %v2800_v11 = vcombine.high %v6228_v50, %v6228_v50 }
 0x2db   :  { %v3651_v36 = vmax.f32 %v3649_v3, %v3650_v22  ;;  %v6261_v44 = vsel %vm3648_vm4, %v3323_v20, -inf  ;;  %v3135_v26 = vadd.f32 %v6217_v14, %v2799_v31  ;;  %v3176_v63 = vmax.f32 %v3128_v57, 0.0 }
 0x2dc   :  { %v3658_v61 = vmax.f32 %v3656_v25, %v3657_v38  ;;  %v3665_v6 = vmax.f32 %v3663_v30, %v3664_v13  ;;  %v3177_v12 = vmax.f32 %v3129_v28, 0.0  ;;  %v3178_v60 = vmax.f32 %v3130_v29, 0.0 }
 0x2dd   :  { %v6264_v46 = vpop.f32.mrf.mxu1  ;;  %v3652_v42 = vrot.slane %v3651_v36, 2  ;;  %v3179_v23 = vmax.f32 %v3131_v59, 0.0  ;;  %v3180_v41 = vmax.f32 %v3132_v24, 0.0  ;;  %v3181_v37 = vmax.f32 %v3133_v19, 0.0 }
 0x2de   :  { %v3659_v8 = vrot.slane %v3658_v61, 2  ;;  %v3666_v10 = vrot.slane %v3665_v6, 2  ;;  %v3182_v54 = vmax.f32 %v3134_v49, 0.0  ;;  %v3183_v2 = vmax.f32 %v3135_v26, 0.0 }
 0x2df   :  { %v4230_v18 = vpop.f32.mrf.mxu1  ;;  %v3653_v45 = vmax.f32 %v3651_v36, %v3652_v42  ;;  %v3671_v33 = vrot.slane %v6261_v44, 4  ;;  %v3324_v35 = vcombine.low %v3176_v63, %v3177_v12  ;;  %v3339_v32 = vcombine.low %v3178_v60, %v3179_v23 }
 0x2e0   :  { %v6266_v15 = vmax.f32 %v3658_v61, %v3659_v8  ;;  %v3354_v55 = vcombine.low %v3180_v41, %v3181_v37  ;;  %v6271_v39 = vcombine.low %v3182_v54, %v3183_v2  ;;  %v2807_v43 = vrot.slane %v6228_v50, %v5977_v27 }
 0x2e1   :  { %v6269_v1 = vpop.f32.mrf.mxu1  ;;  %v3654_v56 = vrot.slane %v3653_v45, 1  ;;  %v6275_v51 = vmax.f32 %v3665_v6, %v3666_v10  ;;  %v3331_v17 = vrot.slane %v3324_v35, %v5977_v27  ;;  %v3346_v34 = vrot.slane %v3339_v32, %v5977_v27 }
 0x2e2   :  { %v2814_v47 = vrot.slane %v2800_v11, %v5977_v27  ;;  %v3661_v31 = vrot.slane %v6266_v15, 1  ;;  %v3361_v28 = vrot.slane %v3354_v55, %v5977_v27  ;;  %v2815_v29 = vcombine.high %v2807_v43, %v2807_v43 }
 0x2e3   :  { %v4233_v57 = vpop.f32.mrf.mxu1  ;;  %v6280_v3 = vmax.f32 %v3653_v45, %v3654_v56  ;;  %v3338_v20 = vrot.slane %v3331_v17, %v5977_v27  ;;  %v3376_v50 = vrot.slane %v6271_v39, %v5977_v27  ;;  %v2823_v25 = vrot.slane %v2807_v43, %v5977_v27 }
 0x2e4   :  { %v2816_v22 = vcombine.high %v2814_v47, %v2814_v47  ;;  %v6289_v30 = vrot.slane %v3346_v34, %v5977_v27  ;;  %v2830_v38 = vrot.slane %v2814_v47, %v5977_v27  ;;  %v2837_v13 = vrot.slane %v2815_v29, %v5977_v27 }
 0x2e5   :  { %v2849_v59 = vcombine.high %v6236_v0, %v6236_v0  ;;  %v3677_v24 = vsel %vm3648_vm4, %v3338_v20, -inf  ;;  %v2845_v36 = vcombine.high %v2823_v25, %v2823_v25  ;;  %v3136_v19 = vadd.f32 %v6187_v62, %v2823_v25 }
 0x2e6   :  { %v2844_v52 = vrot.slane %v2816_v22, %v5977_v27  ;;  %v3678_v49 = vrot.slane %v3677_v24, 4  ;;  %v2846_v11 = vcombine.high %v2830_v38, %v2830_v38  ;;  %v2847_v61 = vcombine.high %v2837_v13, %v2837_v13 }
 0x2e7   :  { %v3137_v6 = vadd.f32 %v6193_v7, %v2837_v13  ;;  %v3138_v42 = vadd.f32 %v6203_v58, %v2845_v36  ;;  %v3140_v63 = vadd.f32 %v6190_v5, %v2830_v38  ;;  %v6303_v60 = vrot.slane %v3361_v28, %v5977_v27 }
 0x2e8   :  { %v2848_v26 = vcombine.high %v2844_v52, %v2844_v52  ;;  %v3141_v12 = vadd.f32 %v6197_v53, %v2844_v52  ;;  %v6305_v8 = vmax.f32 %v3677_v24, %v3678_v49  ;;  %v3139_v10 = vadd.f32 %v6211_v21, %v2847_v61 }
 0x2e9   :  { %v3142_v23 = vadd.f32 %v6207_v9, %v2846_v11  ;;  %v3184_v18 = vmax.f32 %v3136_v19, 0.0  ;;  %v3185_v45 = vmax.f32 %v3137_v6, 0.0  ;;  %v3186_v37 = vmax.f32 %v3138_v42, 0.0 }
 0x2ea   :  { %v3143_v41 = vadd.f32 %v6217_v14, %v2848_v26  ;;  %v3187_v54 = vmax.f32 %v3139_v10, 0.0  ;;  %v3188_v2 = vmax.f32 %v3140_v63, 0.0  ;;  %v3189_v35 = vmax.f32 %v3141_v12, 0.0 }
 0x2eb   :  { %v2856_v32 = vrot.slane %v6236_v0, %v5977_v27  ;;  %v3190_v56 = vmax.f32 %v3142_v23, 0.0  ;;  %v3384_v43 = vcombine.low %v3184_v18, %v3185_v45  ;;  %v2863_v17 = vrot.slane %v2849_v59, %v5977_v27 }
 0x2ec   :  { %v3191_v55 = vmax.f32 %v3143_v41, 0.0  ;;  %v3399_v34 = vcombine.low %v3186_v37, %v3187_v54  ;;  %v3414_v47 = vcombine.low %v3188_v2, %v3189_v35  ;;  %v2898_v59 = vcombine.high %v6249_v40, %v6249_v40 }
 0x2ed   :  { %v2864_v57 = vcombine.high %v2856_v32, %v2856_v32  ;;  %v2872_v28 = vrot.slane %v2856_v32, %v5977_v27  ;;  %v3391_v29 = vrot.slane %v3384_v43, %v5977_v27  ;;  %v2865_v22 = vcombine.high %v2863_v17, %v2863_v17 }
 0x2ee   :  { %v6315_v20 = vcombine.low %v3190_v56, %v3191_v55  ;;  %v2879_v25 = vrot.slane %v2863_v17, %v5977_v27  ;;  %v3406_v38 = vrot.slane %v3399_v34, %v5977_v27  ;;  %v3421_v52 = vrot.slane %v3414_v47, %v5977_v27 }
 0x2ef   :  { %v2886_v0 = vrot.slane %v2864_v57, %v5977_v27  ;;  %v2894_v13 = vcombine.high %v2872_v28, %v2872_v28  ;;  %v3398_v24 = vrot.slane %v3391_v29, %v5977_v27  ;;  %v2893_v36 = vrot.slane %v2865_v22, %v5977_v27 }
 0x2f0   :  { %v2895_v19 = vcombine.high %v2879_v25, %v2879_v25  ;;  %v3413_v49 = vrot.slane %v3406_v38, %v5977_v27  ;;  %v3436_v11 = vrot.slane %v6315_v20, %v5977_v27  ;;  %v3147_v12 = vadd.f32 %v6211_v21, %v2879_v25 }
 0x2f1   :  { %v2896_v61 = vcombine.high %v2886_v0, %v2886_v0  ;;  %v3144_v6 = vadd.f32 %v6187_v62, %v2886_v0  ;;  %v3705_v26 = vsel %vm3648_vm4, %v3398_v24, -inf  ;;  %v2897_v42 = vcombine.high %v2893_v36, %v2893_v36 }
 0x2f2   :  { %v3145_v63 = vadd.f32 %v6193_v7, %v2894_v13  ;;  %v3706_v10 = vrot.slane %v3705_v26, 4  ;;  %v6333_v23 = vsel %vm3648_vm4, %v3413_v49, -inf  ;;  %v3148_v18 = vadd.f32 %v6190_v5, %v2893_v36 }
 0x2f3   :  { %v3146_v41 = vadd.f32 %v6203_v58, %v2896_v61  ;;  %v6338_v45 = vrot.slane %v3421_v52, %v5977_v27  ;;  %v3149_v37 = vadd.f32 %v6197_v53, %v2895_v19  ;;  %v3192_v54 = vmax.f32 %v3144_v6, 0.0 }
 0x2f4   :  { %v3193_v2 = vmax.f32 %v3145_v63, 0.0  ;;  %v3713_v35 = vrot.slane %v6333_v23, 4  ;;  %v3195_v56 = vmax.f32 %v3147_v12, 0.0  ;;  %v3196_v55 = vmax.f32 %v3148_v18, 0.0 }
 0x2f5   :  { %v3194_v32 = vmax.f32 %v3146_v41, 0.0  ;;  %v3197_v43 = vmax.f32 %v3149_v37, 0.0  ;;  %v2905_v34 = vrot.slane %v6249_v40, %v5977_v27  ;;  %v2912_v47 = vrot.slane %v2898_v59, %v5977_v27 }
 0x2f6   :  { %v3444_v17 = vcombine.low %v3192_v54, %v3193_v2  ;;  %v6345_v57 = vmax.f32 %v3705_v26, %v3706_v10  ;;  %v3150_v29 = vadd.f32 %v6207_v9, %v2897_v42  ;;  %v2947_v22 = vcombine.high %v6264_v46, %v6264_v46 }
 0x2f7   :  { %v3459_v28 = vcombine.low %v3194_v32, %v3195_v56  ;;  %v3474_v38 = vcombine.low %v3196_v55, %v3197_v43  ;;  %v2913_v0 = vcombine.high %v2905_v34, %v2905_v34  ;;  %v2914_v13 = vcombine.high %v2912_v47, %v2912_v47 }
 0x2f8   :  { %v3451_v25 = vrot.slane %v3444_v17, %v5977_v27  ;;  %v2921_v52 = vrot.slane %v2905_v34, %v5977_v27  ;;  %v2928_v40 = vrot.slane %v2912_v47, %v5977_v27  ;;  %v2954_v59 = vrot.slane %v6264_v46, %v5977_v27 }
 0x2f9   :  { %v3466_v24 = vrot.slane %v3459_v28, %v5977_v27  ;;  %v3481_v19 = vrot.slane %v3474_v38, %v5977_v27  ;;  %v2935_v49 = vrot.slane %v2913_v0, %v5977_v27  ;;  %v3198_v61 = vmax.f32 %v3150_v29, 0.0 }
 0x2fa   :  { %v3458_v36 = vrot.slane %v3451_v25, %v5977_v27  ;;  %v2942_v26 = vrot.slane %v2914_v13, %v5977_v27  ;;  %v2943_v42 = vcombine.high %v2921_v52, %v2921_v52  ;;  %v2944_v63 = vcombine.high %v2928_v40, %v2928_v40 }
 0x2fb   :  { %v3473_v6 = vrot.slane %v3466_v24, %v5977_v27  ;;  %v3488_v12 = vrot.slane %v3481_v19, %v5977_v27  ;;  %v2945_v41 = vcombine.high %v2935_v49, %v2935_v49  ;;  %v3151_v46 = vadd.f32 %v6217_v14, %v2921_v52 }
 0x2fc   :  { %v3733_v10 = vsel %vm3648_vm4, %v3458_v36, -inf  ;;  %v3152_v54 = vadd.f32 %v6187_v62, %v2935_v49  ;;  %v3153_v2 = vadd.f32 %v6193_v7, %v2943_v42  ;;  %v3155_v43 = vadd.f32 %v6211_v21, %v2928_v40 }
 0x2fd   :  { %v3734_v18 = vrot.slane %v3733_v10, 4  ;;  %v3740_v37 = vsel %vm3648_vm4, %v3473_v6, -inf  ;;  %v3747_v56 = vsel %vm3648_vm4, %v3488_v12, -inf  ;;  %v3154_v55 = vadd.f32 %v6203_v58, %v2945_v41 }
 0x2fe   :  { %v3741_v32 = vrot.slane %v3740_v37, 4  ;;  %v3748_v34 = vrot.slane %v3747_v56, 4  ;;  %v3156_v47 = vadd.f32 %v6190_v5, %v2942_v26  ;;  %v3157_v28 = vadd.f32 %v6197_v53, %v2944_v63 }
 0x2ff   :  { %v3735_v17 = vmax.f32 %v3733_v10, %v3734_v18  ;;  %v3199_v25 = vmax.f32 %v3151_v46, 0.0  ;;  %v3200_v38 = vmax.f32 %v3152_v54, 0.0  ;;  %v3201_v0 = vmax.f32 %v3153_v2, 0.0 }
 0x300   :  { %v3742_v29 = vmax.f32 %v3740_v37, %v3741_v32  ;;  %v6372_v24 = vmax.f32 %v3747_v56, %v3748_v34  ;;  %v3202_v52 = vmax.f32 %v3154_v55, 0.0  ;;  %v3203_v36 = vmax.f32 %v3155_v43, 0.0 }
 0x301   :  { %v3736_v13 = vrot.slane %v3735_v17, 2  ;;  %v3204_v49 = vmax.f32 %v3156_v47, 0.0  ;;  %v3205_v6 = vmax.f32 %v3157_v28, 0.0  ;;  %v3489_v42 = vcombine.low %v3198_v61, %v3199_v25 }
 0x302   :  { %v3743_v19 = vrot.slane %v3742_v29, 2  ;;  %v2946_v12 = vcombine.high %v2942_v26, %v2942_v26  ;;  %v3504_v10 = vcombine.low %v3200_v38, %v3201_v0  ;;  %v3519_v41 = vcombine.low %v3202_v52, %v3203_v36 }
 0x303   :  { %v6374_v40 = vmax.f32 %v3735_v17, %v3736_v13  ;;  %v3496_v63 = vrot.slane %v3489_v42, %v5977_v27  ;;  %v6379_v46 = vcombine.low %v3204_v49, %v3205_v6  ;;  %v2961_v37 = vrot.slane %v2947_v22, %v5977_v27 }
 0x304   :  { %v6376_v18 = vmax.f32 %v3742_v29, %v3743_v19  ;;  %v3750_v54 = vrot.slane %v6372_v24, 2  ;;  %v3511_v2 = vrot.slane %v3504_v10, %v5977_v27  ;;  %v3526_v32 = vrot.slane %v3519_v41, %v5977_v27 }
 0x305   :  { %v2962_v61 = vcombine.high %v2954_v59, %v2954_v59  ;;  %v3738_v56 = vrot.slane %v6374_v40, 1  ;;  %v3503_v55 = vrot.slane %v3496_v63, %v5977_v27  ;;  %v2963_v43 = vcombine.high %v2961_v37, %v2961_v37 }
 0x306   :  { %v3745_v26 = vrot.slane %v6376_v18, 1  ;;  %v3518_v17 = vrot.slane %v3511_v2, %v5977_v27  ;;  %v3541_v34 = vrot.slane %v6379_v46, %v5977_v27  ;;  %v2970_v22 = vrot.slane %v2954_v59, %v5977_v27 }
 0x307   :  { %v2977_v47 = vrot.slane %v2961_v37, %v5977_v27  ;;  %v3754_v28 = vsel %vm3648_vm4, %v3503_v55, -inf  ;;  %v2984_v29 = vrot.slane %v2962_v61, %v5977_v27  ;;  %v2991_v25 = vrot.slane %v2963_v43, %v5977_v27 }
 0x308   :  { %v3158_v38 = vadd.f32 %v6207_v9, %v2946_v12  ;;  %v6398_v0 = vrot.slane %v3526_v32, %v5977_v27  ;;  %v3755_v13 = vrot.slane %v3754_v28, 4  ;;  %v2992_v52 = vcombine.high %v2970_v22, %v2970_v22 }
 0x309   :  { %v2993_v36 = vcombine.high %v2977_v47, %v2977_v47  ;;  %v6401_v19 = vsel %vm3648_vm4, %v3518_v17, -inf  ;;  %v2994_v59 = vcombine.high %v2984_v29, %v2984_v29  ;;  %v2995_v49 = vcombine.high %v2991_v25, %v2991_v25 }
 0x30a   :  { %v3159_v6 = vadd.f32 %v6217_v14, %v2970_v22  ;;  %v6404_v42 = vmax.f32 %v3754_v28, %v3755_v13  ;;  %v3160_v10 = vadd.f32 %v6187_v62, %v2984_v29  ;;  %v3161_v41 = vadd.f32 %v6193_v7, %v2992_v52 }
 0x30b   :  { %v3163_v12 = vadd.f32 %v6211_v21, %v2977_v47  ;;  %v3162_v63 = vadd.f32 %v6203_v58, %v2994_v59  ;;  %v3164_v37 = vadd.f32 %v6190_v5, %v2991_v25  ;;  %v3165_v2 = vadd.f32 %v6197_v53, %v2993_v36 }
 0x30c   :  { %v3206_v32 = vmax.f32 %v3158_v38, 0.0  ;;  %v3762_v61 = vrot.slane %v6401_v19, 4  ;;  %v3207_v55 = vmax.f32 %v3159_v6, 0.0  ;;  %v3208_v43 = vmax.f32 %v3160_v10, 0.0 }
 0x30d   :  { %v3209_v17 = vmax.f32 %v3161_v41, 0.0  ;;  %v3210_v22 = vmax.f32 %v3162_v63, 0.0  ;;  %v3211_v28 = vmax.f32 %v3163_v12, 0.0  ;;  %v3212_v13 = vmax.f32 %v3164_v37, 0.0 }
 0x30e   :  { %v3213_v62 = vmax.f32 %v3165_v2, 0.0  ;;  %v3549_v29 = vcombine.low %v3206_v32, %v3207_v55  ;;  %v3002_v21 = vrot.slane %v6269_v1, %v5977_v27  ;;  %v3166_v58 = vadd.f32 %v6207_v9, %v2995_v49 }
 0x30f   :  { %v3564_v7 = vcombine.low %v3208_v43, %v3209_v17  ;;  %v3757_v5 = vrot.slane %v6404_v42, 2  ;;  %v3579_v53 = vcombine.low %v3210_v22, %v3211_v28  ;;  %v3383_v25 = vrot.slane %v3376_v50, %v5977_v27 }
 0x310   :  { %v3594_v47 = vcombine.low %v3212_v13, %v3213_v62  ;;  %v3556_v38 = vrot.slane %v3549_v29, %v5977_v27  ;;  %v3009_v36 = vrot.slane %v3002_v21, %v5977_v27  ;;  %v3662_v1 = vmax.f32 %v6266_v15, %v3661_v31 }
 0x311   :  { %v3571_v52 = vrot.slane %v3564_v7, %v5977_v27  ;;  %v3586_v9 = vrot.slane %v3579_v53, %v5977_v27  ;;  %v3668_v49 = vrot.slane %v6275_v51, 1  ;;  %v3672_v39 = vmax.f32 %v6261_v44, %v3671_v33 }
 0x312   :  { %v3601_v59 = vrot.slane %v3594_v47, %v5977_v27  ;;  %v3167_v6 = vadd.f32 %v6217_v14, %v3009_v36  ;;  %v3214_v10 = vmax.f32 %v3166_v58, 0.0  ;;  %v3680_v41 = vrot.slane %v6305_v8, 2 }
 0x313   :  { %v3578_v50 = vrot.slane %v3571_v52, %v5977_v27  ;;  %v6437_v12 = vrot.slane %v3556_v38, %v5977_v27  ;;  %v3593_v15 = vrot.slane %v3586_v9, %v5977_v27  ;;  %v3673_v63 = vrot.slane %v3672_v39, 2 }
 0x314   :  { %v6441_v31 = vrot.slane %v3601_v59, %v5977_v27  ;;  %v3215_v44 = vmax.f32 %v3167_v6, 0.0  ;;  %v3681_v33 = vmax.f32 %v6305_v8, %v3680_v41  ;;  %v3684_v14 = vsel %vm3648_vm4, %v6289_v30, -inf }
 0x315   :  { %v6444_v37 = vsel %vm3648_vm4, %v3578_v50, -inf  ;;  %v6450_v2 = vsel %vm3648_vm4, %v3593_v15, -inf  ;;  %v3669_v32 = vmax.f32 %v6275_v51, %v3668_v49  ;;  %v3674_v55 = vmax.f32 %v3672_v39, %v3673_v63 }
 0x316   :  { %v3685_v43 = vrot.slane %v3684_v14, 4  ;;  %v3790_v17 = vrot.slane %v6444_v37, 4  ;;  %v6454_v22 = vcombine.low %v3214_v10, %v3215_v44  ;;  %v3682_v28 = vrot.slane %v3681_v33, 1 }
 0x317   :  { %v3691_v13 = vsel %vm3648_vm4, %v6303_v60, -inf  ;;  %v3675_v62 = vrot.slane %v3674_v55, 1  ;;  %v3698_v30 = vsel %vm3648_vm4, %v3383_v25, -inf  ;;  %v3797_v7 = vrot.slane %v6450_v2, 4 }
 0x318   :  { %v3686_v8 = vmax.f32 %v3684_v14, %v3685_v43  ;;  %v3692_v29 = vrot.slane %v3691_v13, 4  ;;  %v3683_v21 = vmax.f32 %v3681_v33, %v3682_v28  ;;  %v3699_v58 = vrot.slane %v3698_v30, 4 }
 0x319   :  { %v3841_v51 = vsel %vm1576_vm7, %v3662_v1, %v6280_v3  ;;  %v3676_v53 = vmax.f32 %v3674_v55, %v3675_v62  ;;  %v3616_v60 = vrot.slane %v6454_v22, %v5977_v27  ;;  %v3443_v25 = vrot.slane %v3436_v11, %v5977_v27 }
 0x31a   :  { %v3687_v47 = vrot.slane %v3686_v8, 2  ;;  %v3693_v38 = vmax.f32 %v3691_v13, %v3692_v29  ;;  %v3842_v52 = vsel %vm1578_vm8, %v3669_v32, %v3841_v51  ;;  %v3700_v36 = vmax.f32 %v3698_v30, %v3699_v58 }
 0x31b   :  { %v3708_v9 = vrot.slane %v6345_v57, 2  ;;  %v3843_v3 = vsel %vm1580_vm9, %v3676_v53, %v3842_v52  ;;  %v3714_v1 = vmax.f32 %v6333_v23, %v3713_v35  ;;  %v3719_v10 = vsel %vm3648_vm4, %v6338_v45, -inf }
 0x31c   :  { %v3688_v59 = vmax.f32 %v3686_v8, %v3687_v47  ;;  %v3694_v49 = vrot.slane %v3693_v38, 2  ;;  %v3701_v39 = vrot.slane %v3700_v36, 2  ;;  %v3844_v50 = vsel %vm1582_vm10, %v3683_v21, %v3843_v3 }
 0x31d   :  { %v3709_v6 = vmax.f32 %v6345_v57, %v3708_v9  ;;  %v3715_v41 = vrot.slane %v3714_v1, 2  ;;  %v3720_v15 = vrot.slane %v3719_v10, 4  ;;  %v3726_v33 = vsel %vm3648_vm4, %v3443_v25, -inf }
 0x31e   :  { %v3689_v20 = vrot.slane %v3688_v59, 1  ;;  %v3695_v11 = vmax.f32 %v3693_v38, %v3694_v49  ;;  %v3702_v63 = vmax.f32 %v3700_v36, %v3701_v39  ;;  %v3548_v23 = vrot.slane %v3541_v34, %v5977_v27 }
 0x31f   :  { %v3710_v44 = vrot.slane %v3709_v6, 1  ;;  %v3716_v32 = vmax.f32 %v3714_v1, %v3715_v41  ;;  %v3721_v57 = vmax.f32 %v3719_v10, %v3720_v15  ;;  %v3727_v45 = vrot.slane %v3726_v33, 4 }
 0x320   :  { %v3690_v35 = vmax.f32 %v3688_v59, %v3689_v20  ;;  %v3696_v14 = vrot.slane %v3695_v11, 1  ;;  %v3703_v55 = vrot.slane %v3702_v63, 1  ;;  %v3739_v28 = vmax.f32 %v6374_v40, %v3738_v56 }
 0x321   :  { %v3711_v43 = vmax.f32 %v3709_v6, %v3710_v44  ;;  %v3717_v8 = vrot.slane %v3716_v32, 1  ;;  %v3722_v29 = vrot.slane %v3721_v57, 2  ;;  %v3728_v21 = vmax.f32 %v3726_v33, %v3727_v45 }
 0x322   :  { %v3697_v13 = vmax.f32 %v3695_v11, %v3696_v14  ;;  %v3845_v62 = vsel %vm1584_vm11, %v3690_v35, %v3844_v50  ;;  %v3704_v30 = vmax.f32 %v3702_v63, %v3703_v55  ;;  %v3746_v46 = vmax.f32 %v6376_v18, %v3745_v26 }
 0x323   :  { %v3751_v34 = vmax.f32 %v6372_v24, %v3750_v54  ;;  %v3718_v51 = vmax.f32 %v3716_v32, %v3717_v8  ;;  %v3723_v53 = vmax.f32 %v3721_v57, %v3722_v29  ;;  %v3758_v40 = vmax.f32 %v6404_v42, %v3757_v5 }
 0x324   :  { %v3846_v58 = vsel %vm1586_vm12, %v3697_v13, %v3845_v62  ;;  %v3729_v47 = vrot.slane %v3728_v21, 2  ;;  %v3763_v18 = vmax.f32 %v6401_v19, %v3762_v61  ;;  %v3768_v52 = vsel %vm3648_vm4, %v6398_v0, -inf }
 0x325   :  { %v3847_v56 = vsel %vm1588_vm13, %v3704_v30, %v3846_v58  ;;  %v3752_v38 = vrot.slane %v3751_v34, 1  ;;  %v3724_v26 = vrot.slane %v3723_v53, 1  ;;  %v3848_v24 = vsel %vm1576_vm7, %v3718_v51, %v3711_v43 }
 0x326   :  { %3865 = vxpose.xlu0.b32.start [1/2] (short) (narrow) %v3847_v56, 16  ;;  %v3759_v54 = vrot.slane %v3758_v40, 1  ;;  %v3730_v36 = vmax.f32 %v3728_v21, %v3729_v47  ;;  %v3764_v9 = vrot.slane %v3763_v18, 2  ;;  %v3769_v42 = vrot.slane %v3768_v52, 4 }
 0x327   :  { %v3753_v25 = vmax.f32 %v3751_v34, %v3752_v38  ;;  %v3725_v5 = vmax.f32 %v3723_v53, %v3724_v26  ;;  %v3775_v49 = vsel %vm3648_vm4, %v3548_v23, -inf  ;;  %v3782_v3 = vsel %vm3648_vm4, %v6437_v12, -inf }
 0x328   :  { %v3760_v59 = vmax.f32 %v3758_v40, %v3759_v54  ;;  %v3731_v19 = vrot.slane %v3730_v36, 1  ;;  %v3765_v61 = vmax.f32 %v3763_v18, %v3764_v9  ;;  %v3770_v1 = vmax.f32 %v3768_v52, %v3769_v42 }
 0x329   :  { %v3776_v39 = vrot.slane %v3775_v49, 4  ;;  %v3849_v50 = vsel %vm1578_vm8, %v3725_v5, %v3848_v24  ;;  %v3783_v6 = vrot.slane %v3782_v3, 4  ;;  %v3851_v0 = vsel %vm1576_vm7, %v3746_v46, %v3739_v28 }
 0x32a   :  { %v3791_v10 = vmax.f32 %v6444_v37, %v3790_v17  ;;  %v3732_v20 = vmax.f32 %v3730_v36, %v3731_v19  ;;  %v3766_v11 = vrot.slane %v3765_v61, 1  ;;  %v3771_v41 = vrot.slane %v3770_v1, 2 }
 0x32b   :  { %v3777_v15 = vmax.f32 %v3775_v49, %v3776_v39  ;;  %v3784_v63 = vmax.f32 %v3782_v3, %v3783_v6  ;;  %v3852_v12 = vsel %vm1578_vm8, %v3753_v25, %v3851_v0  ;;  %v3798_v33 = vmax.f32 %v6450_v2, %v3797_v7 }
 0x32c   :  { %v3792_v44 = vrot.slane %v3791_v10, 2  ;;  %v3623_v23 = vrot.slane %v3616_v60, %v5977_v27  ;;  %v3850_v35 = vsel %vm1580_vm9, %v3732_v20, %v3849_v50  ;;  %v3772_v37 = vmax.f32 %v3770_v1, %v3771_v41 }
 0x32d   :  { %v3778_v17 = vrot.slane %v3777_v15, 2  ;;  %3866 = vxpose.xlu0.b32.end [2/2] (short) (narrow) %v3850_v35, 16  ;;  %v3767_v14 = vmax.f32 %v3765_v61, %v3766_v11  ;;  %v3785_v32 = vrot.slane %v3784_v63, 2  ;;  %v3853_v57 = vsel %vm1580_vm9, %v3760_v59, %v3852_v12 }
 0x32e   :  { %v3799_v55 = vrot.slane %v3798_v33, 2  ;;  %v3773_v43 = vrot.slane %v3772_v37, 1  ;;  %v3793_v28 = vmax.f32 %v3791_v10, %v3792_v44  ;;  %v3803_v2 = vsel %vm3648_vm4, %v6441_v31, -inf }
 0x32f   :  { %v3779_v45 = vmax.f32 %v3777_v15, %v3778_v17  ;;  %v3786_v7 = vmax.f32 %v3784_v63, %v3785_v32  ;;  %v3854_v22 = vsel %vm1582_vm10, %v3767_v14, %v3853_v57  ;;  %v3804_v60 = vrot.slane %v3803_v2, 4 }
 0x330   :  { %v3800_v27 = vmax.f32 %v3798_v33, %v3799_v55  ;;  %v3774_v13 = vmax.f32 %v3772_v37, %v3773_v43  ;;  %v3810_v8 = vsel %vm3648_vm4, %v3623_v23, -inf  ;;  %v3794_v58 = vrot.slane %v3793_v28, 1 }
 0x331   :  { %v3780_v62 = vrot.slane %v3779_v45, 1  ;;  %v3787_v29 = vrot.slane %v3786_v7, 1  ;;  %v3805_v21 = vmax.f32 %v3803_v2, %v3804_v60  ;;  %v3811_v51 = vrot.slane %v3810_v8, 4 }
 0x332   :  { %v3801_v30 = vrot.slane %v3800_v27, 1  ;;  %v3855_v34 = vsel %vm1584_vm11, %v3774_v13, %v3854_v22  ;;  %v3795_v26 = vmax.f32 %v3793_v28, %v3794_v58  ;;  %v4302_v49 = vmov 1934713408  }
 0x333   :  { %v3781_v46 = vmax.f32 %v3779_v45, %v3780_v62  ;;  %v3788_v53 = vmax.f32 %v3786_v7, %v3787_v29  ;;  %v3806_v40 = vrot.slane %v3805_v21, 2  ;;  %v3812_v47 = vmax.f32 %v3810_v8, %v3811_v51 }
 0x334   :  { %v3802_v56 = vmax.f32 %v3800_v27, %v3801_v30  ;;  %v3962_v3 = vunpack.c.l.s4 %v4302_v49  ;;  %vm4140_vm10 = vcmask 31744   ;;  %vm4130_vm11 = vcmask 588800  }
 0x335   :  { %v3856_v31 = vsel %vm1586_vm12, %v3781_v46, %v3855_v34  ;;  %v3807_v18 = vmax.f32 %v3805_v21, %v3806_v40  ;;  %v3813_v24 = vrot.slane %v3812_v47, 2  ;;  %vm4132_vm12 = vcmask 687104  }
 0x336   :  { %v3857_v38 = vsel %vm1588_vm13, %v3788_v53, %v3856_v31  ;;  %v3858_v36 = vsel %vm1576_vm7, %v3802_v56, %v3795_v26  ;;  %v3963_v61 = vunpack.c.0.s8 %v3962_v3  ;;  %vm4124_vm7 = vcmask 293888  }
 0x337   :  { %3897 = vxpose.xlu1.b32.start [1/2] (short) (narrow) %v3857_v38, 16  ;;  %v3808_v54 = vrot.slane %v3807_v18, 1  ;;  %v3814_v52 = vmax.f32 %v3812_v47, %v3813_v24  ;;  %vm4134_vm13 = vcmask 785408   ;;  %vm4159_vm4 = vcmask 519170  }
 0x338   :  { %v3966_v10 = vsub.s32 %v3963_v61, %v6753_v16 }
 0x339   :  { %v3809_v25 = vmax.f32 %v3807_v18, %v3808_v54  ;;  %v3815_v9 = vrot.slane %v3814_v52, 1 }
 0x33b   :  { %v3859_v42 = vsel %vm1578_vm8, %v3809_v25, %v3858_v36  ;;  %v3816_v5 = vmax.f32 %v3814_v52, %v3815_v9  ;;  %vm4126_vm8 = vcmask 392192  }
 0x33d   :  { %v3860_v59 = vsel %vm1580_vm9, %v3816_v5, %v3859_v42  ;;  %vm4128_vm9 = vcmask 490496  }
 0x33e   :  { %3898 = vxpose.xlu1.b32.end [2/2] (short) (narrow) %v3860_v59, 16 }
 0x3a5   :  { %v3881_v19 = vpop.trf.xlu0 }
 0x3a6   :  { %v3929_v1 = vcombine.high %v3881_v19, %v4299_v4  ;;  %v3936_v39 = vrot.slane %v3881_v19, %v4441_v48 }
 0x3a8   :  { %v3943_v20 = vrot.slane %v3929_v1, %v4441_v48 }
 0x3a9   :  { %v3882_v11 = vpop.trf.xlu0 }
 0x3aa   :  { %v4002_v44 = vrot.slane %v3882_v11, %v4441_v48  ;;  %v3995_v14 = vcombine.high %v3882_v11, %v4299_v4 }
 0x3ac   :  { %v4009_v45 = vrot.slane %v3995_v14, %v4441_v48 }
 0x3b6   :  { %v3913_v50 = vpop.trf.xlu1 }
 0x3b7   :  { %v3944_v6 = vcombine.high %v3913_v50, %v4299_v4  ;;  %v3951_v0 = vrot.slane %v3913_v50, %v4441_v48 }
 0x3b9   :  { %v3958_v41 = vrot.slane %v3944_v6, %v4441_v48  ;;  %v3959_v15 = vcombine.low %v3936_v39, %v3951_v0  ;;  %v3960_v63 = vcombine.high %v3936_v39, %v3951_v0 }
 0x3ba   :  { %v3914_v12 = vpop.trf.xlu1 }
 0x3bb   :  { %v6540_v33 = vrot.slane %v3959_v15, %v3966_v10  ;;  %v3975_v23 = vcombine.low %v3943_v20, %v3958_v41  ;;  %v3974_v35 = vrot.slane %v3960_v63, %v3966_v10  ;;  %v4017_v37 = vrot.slane %v3914_v12, %v4441_v48 }
 0x3bc   :  { %v4010_v17 = vcombine.high %v3914_v12, %v4299_v4  ;;  %v3976_v57 = vcombine.high %v3943_v20, %v3958_v41 }
 0x3bd   :  { %4066 = vrot.lane.b32.xlu1 %v3974_v35, %s4296_s28  ;;  %v3991_v16 = vcombine.high %v6540_v33, %v4299_v4  ;;  %v4026_v32 = vcombine.high %v4002_v44, %v4017_v37  ;;  %v3983_v55 = vrot.slane %v3975_v23, %v3966_v10  ;;  %v3992_v2 = vcombine.high %v3974_v35, %v4299_v4  ;;  %s4316_s28 = smov [#allocation2]  }
 0x3be   :  { %v4024_v43 = vrot.slane %v4010_v17, %v4441_v48  ;;  %v3990_v7 = vrot.slane %v3976_v57, %v3966_v10  ;;  %v4025_v62 = vcombine.low %v4002_v44, %v4017_v37 }
 0x3bf   :  { %4062 = vrot.lane.b32.xlu0 %v3991_v16, %s4303_s4  ;;  %v4040_v28 = vrot.slane %v4026_v32, %v3966_v10  ;;  %v3993_v27 = vcombine.high %v3983_v55, %v4299_v4 }
 0x3c0   :  { %v4041_v22 = vcombine.low %v4009_v45, %v4024_v43  ;;  %v3994_v8 = vcombine.high %v3990_v7, %v4299_v4  ;;  %v4042_v29 = vcombine.high %v4009_v45, %v4024_v43  ;;  %v4033_v21 = vrot.slane %v4025_v62, %v3966_v10 }
 0x3c1   :  { %4074 = vrot.lane.b32.xlu1 %v3983_v55, %s4304_s18  ;;  %v4058_v60 = vcombine.high %v4040_v28, %v4299_v4 }
 0x3c2   :  { %v4049_v13 = vrot.slane %v4041_v22, %v3966_v10  ;;  %v4056_v46 = vrot.slane %v4042_v29, %v3966_v10  ;;  %v4057_v34 = vcombine.high %v4033_v21, %v4299_v4 }
 0x3c3   :  { %4070 = vrot.lane.b32.xlu0 %v3992_v2, %s4305_s19 }
 0x3c4   :  { %v4059_v30 = vcombine.high %v4049_v13, %v4299_v4  ;;  %v4060_v58 = vcombine.high %v4056_v46, %v4299_v4 }
 0x3c5   :  { %4082 = vrot.lane.b32.xlu1 %v3990_v7, %s4306_s20 }
 0x3c7   :  { %4078 = vrot.lane.b32.xlu0 %v3993_v27, %s4307_s21 }
 0x3c9   :  { %4102 = vrot.lane.b32.xlu1 %v4058_v60, %s4308_s22 }
 0x3cb   :  { %4098 = vrot.lane.b32.xlu0 %v4040_v28, %s4309_s23 }
 0x3cd   :  { %4106 = vrot.lane.b32.xlu1 %v4049_v13, %s4297_s29  ;;  %s4168_s29 = sshll.u32 %s4316_s28, 4  ;;  %s4169_s29 = int_to_ptr.vmem [resolvable:$true] %s4168_s29 }
 0x3ce   :  { %s4271_s30 = scalar_lea.vmem %s4169_s29, 64  ;;  %p4276_p1 = scmp.lt.s32.totalorder %s4169_s29, %s4169_s29 }
 0x3cf   :  { %4086 = vrot.lane.b32.xlu0 %v3994_v8, %s4310_s24  ;;  %p4272_p0 = scmp.ne.s32.totalorder %s4169_s29, %s4271_s30  ;;  %p4277_p2 = scmp.lt.s32.totalorder %s4271_s30, %s4271_s30 }
 0x3d1   :  { %4110 = vrot.lane.b32.xlu1 %v4059_v30, %s4311_s25  ;;  %p4278_p3 = por %p4277_p2, %p4276_p1 }
 0x3d3   :  { %4090 = vrot.lane.b32.xlu0 %v4033_v21, %s4312_s26  ;;  %p4279_p4 = pnand %p4278_p3, %p4272_p0 }
 0x3d5   :  { %4114 = vrot.lane.b32.xlu1 %v4056_v46, %s4313_s0 }
 0x3d7   :  { %4094 = vrot.lane.b32.xlu0 %v4057_v34, %s4314_s1 }
 0x3db   :  { %4118 = vrot.lane.b32.xlu0 %v4060_v58, %s4315_s27 }
 0x42f   :  { %v4067_v51 = vpop.permute.xlu1 %4066 }
 0x431   :  { %v4063_v53 = vpop.permute.xlu0 %4062 }
 0x432   :  { %v4122_v18 = vsel %vm4121_vm6, %v6540_v33, %v4063_v53  ;;  %vm4160_vm6 = vmor %vm4159_vm4, %vm686_vm5 }
 0x433   :  { %v4075_v40 = vpop.permute.xlu1 %4074  ;;  %v4123_v54 = vsel %vm1923_vm2, %v4122_v18, %v4067_v51  ;;  %vm4146_vm2 = vcmask 424960  }
 0x435   :  { %v4071_v31 = vpop.permute.xlu0 %4070 }
 0x436   :  { %v4125_v52 = vsel %vm4124_vm7, %v4123_v54, %v4071_v31 }
 0x437   :  { %v4083_v56 = vpop.permute.xlu1 %4082  ;;  %v4127_v36 = vsel %vm4126_vm8, %v4125_v52, %v4075_v40 }
 0x439   :  { %v4079_v47 = vpop.permute.xlu0 %4078 }
 0x43a   :  { %v4129_v9 = vsel %vm4128_vm9, %v4127_v36, %v4079_v47 }
 0x43b   :  { %v4103_v38 = vpop.permute.xlu1 %4102  ;;  %v4131_v59 = vsel %vm4130_vm11, %v4129_v9, %v4083_v56 }
 0x43d   :  { %v4099_v26 = vpop.permute.xlu0 %4098 }
 0x43e   :  { %v4141_v5 = vsel %vm4140_vm10, %v4099_v26, %v4103_v38 }
 0x43f   :  { %v4107_v24 = vpop.permute.xlu1 %4106 }
 0x440   :  { %v4142_v1 = vsel %vm1914_vm0, %v4141_v5, %v4107_v24 }
 0x441   :  { %v4087_v4 = vpop.permute.xlu0 %4086 }
 0x442   :  { %v4133_v49 = vsel %vm4132_vm12, %v4131_v59, %v4087_v4 }
 0x443   :  { %v4111_v25 = vpop.permute.xlu1 %4110 }
 0x444   :  { %v4144_v50 = vsel %vm4143_vm15, %v4142_v1, %v4111_v25 }
 0x445   :  { %v4091_v42 = vpop.permute.xlu0 %4090 }
 0x446   :  { %v4135_v19 = vsel %vm4134_vm13, %v4133_v49, %v4091_v42 }
 0x447   :  { %v4115_v61 = vpop.permute.xlu1 %4114 }
 0x448   :  { %v4145_v6 = vsel %vm2580_vm3, %v4144_v50, %v4115_v61 }
 0x449   :  { %v4095_v3 = vpop.permute.xlu0 %4094 }
 0x44a   :  { %v4137_v39 = vsel %vm4136_vm14, %v4135_v19, %v4095_v3 }
 0x44b   :  { %v4139_v10 = vsel %vm4138_vm1, %v4137_v39, %v4099_v26 }
 0x44d   :  { %v4119_v0 = vpop.permute.xlu0 %4118 }
 0x44e   :  { %v4147_v20 = vsel %vm4146_vm2, %v4145_v6, %v4119_v0 }
 0x44f   :  { %v4150_v11 = vcombine.low %v4139_v10, %v4147_v20 }
 0x451   :  { %v4157_v41 = vrot.slane %v4150_v11, %v4441_v48 }
 0x453   :  { %4161 = vst.msk [vmem:[#allocation2] sm:$0xf] %vm4160_vm6, %v4157_v41 }
 0x454   :  { %4282 = shalt.err (!%p4279_p4)
}
 0x455   :  { %4171 = dma.vmem_to_hbm [thread:$0]  %s4169_s29, 64, %s6572_s5, [#allocation3]  }
 0x456   :  { %4291 = dma.done.wait [#allocation3], 64  }
 0x457   :  { %4292 = vsyncadd [#allocation3], 4294967232 }
 0x458   :  { %4175 = vsyncpa [#allocation3], 1 }

</bundles_post_ra>
